<compile_context>
chip_gen: v7x
topology: tpu7x:2x2x1
jax: 0.10.0
libtpu: 0.0.40
codegen_flags: <defaults>
</compile_context>

<pallas_src>
import math

import jax
import jax.numpy as jnp
from jax import lax
from jax.experimental import pallas as pl
from jax.experimental.pallas import tpu as pltpu


def hgstem_kernel(xcol_ref, w1_ref, b1_ref, w2a_ref, b2a_ref, w2b_ref, b2b_ref,
                  w3_ref, b3_ref, w4_ref, b4_ref, o_ref,
                  xp, x2p, x1p, x2bp):
    f32, bf16 = jnp.float32, jnp.bfloat16
    Nb = xp.shape[0]
    Ho1, Wo1 = xp.shape[1] - 1, xp.shape[2] - 1        # stem1/stem2/pool spatial size
    Cm = w1_ref.shape[1]
    Ch = w2a_ref.shape[1]
    C2 = w4_ref.shape[1]
    Ho3 = o_ref.shape[0] // Nb                          # stem3/stem4 spatial size
    Wo3 = o_ref.shape[1] // C2
    m1 = Nb * Ho1 * Wo1
    m3 = Nb * Ho3 * Wo3

    # ---- keep only the 1-element pad halos zero; interiors are fully rewritten below.
    # (Re-zeroed every step: with "parallel" batch sharding each core has its own
    #  scratch, so a program_id==0 one-shot init would miss the second core.)
    xp[:, Ho1:Ho1 + 1, :, :] = jnp.zeros((Nb, 1, Wo1 + 1, Cm), f32)
    xp[:, :, Wo1:Wo1 + 1, :] = jnp.zeros((Nb, Ho1 + 1, 1, Cm), f32)
    x2p[:, Ho1:Ho1 + 1, :, :] = jnp.zeros((Nb, 1, Wo1 + 1, Ch), f32)
    x2p[:, :, Wo1:Wo1 + 1, :] = jnp.zeros((Nb, Ho1 + 1, 1, Ch), f32)
    for buf in (x1p, x2bp):
        buf[:, 0:1, :, :] = jnp.zeros((Nb, 1, Wo1 + 2, Cm), f32)
        buf[:, Ho1 + 1:Ho1 + 2, :, :] = jnp.zeros((Nb, 1, Wo1 + 2, Cm), f32)
        buf[:, :, 0:1, :] = jnp.zeros((Nb, Ho1 + 2, 1, Cm), f32)
        buf[:, :, Wo1 + 1:Wo1 + 2, :] = jnp.zeros((Nb, Ho1 + 2, 1, Cm), f32)

    # ---------------- stem1: one K = 9*C1 matmul (im2col done in the wrapper) ----------
    y1 = jnp.dot(xcol_ref[...], w1_ref[...], preferred_element_type=f32)
    y1 = jnp.maximum(y1 + b1_ref[...], 0.0)             # (m1, Cm)
    # F.pad(stem1, [0,1,0,1]) lives in VMEM scratch
    xp[:, 0:Ho1, 0:Wo1, :] = y1.reshape(Nb, Ho1, Wo1, Cm)

    # ---------------- stem2a: 2x2 / s1, all 4 taps packed along K (K = 4*Cm) ------------
    colA = jnp.concatenate(
        [xp[:, kh:kh + Ho1, kw:kw + Wo1, :].reshape(m1, Cm)
         for kh in range(2) for kw in range(2)], axis=-1).astype(bf16)
    y2a = jnp.maximum(jnp.dot(colA, w2a_ref[...], preferred_element_type=f32)
                      + b2a_ref[...], 0.0)               # (m1, Ch)
    x2p[:, 0:Ho1, 0:Wo1, :] = y2a.reshape(Nb, Ho1, Wo1, Ch)

    # ---------------- stem2b: 2x2 / s1, K = 4*Ch -----------------------------------------
    colB = jnp.concatenate(
        [x2p[:, kh:kh + Ho1, kw:kw + Wo1, :].reshape(m1, Ch)
         for kh in range(2) for kw in range(2)], axis=-1).astype(bf16)
    y2b = jnp.maximum(jnp.dot(colB, w2b_ref[...], preferred_element_type=f32)
                      + b2b_ref[...], 0.0)               # (m1, Cm)

    # ---------------- pool: MaxPool2d(2, stride=1, ceil_mode=True) over padded stem1 ----
    x1 = jnp.maximum(
        jnp.maximum(xp[:, 0:Ho1, 0:Wo1, :], xp[:, 0:Ho1, 1:Wo1 + 1, :]),
        jnp.maximum(xp[:, 1:Ho1 + 1, 0:Wo1, :], xp[:, 1:Ho1 + 1, 1:Wo1 + 1, :]))

    # ---------------- cat([pool, stem2b]) folded into stem3's K axis; 3x3 / s2 / p1 ------
    x1p[:, 1:Ho1 + 1, 1:Wo1 + 1, :] = x1
    x2bp[:, 1:Ho1 + 1, 1:Wo1 + 1, :] = y2b.reshape(Nb, Ho1, Wo1, Cm)
    colC = jnp.concatenate(
        [src[:, pl.ds(kh, Ho3, stride=2), pl.ds(kw, Wo3, stride=2), :].reshape(m3, Cm)
         for src in (x1p, x2bp) for kh in range(3) for kw in range(3)],
        axis=-1).astype(bf16)                            # (m3, 18*Cm)
    y3 = jnp.maximum(jnp.dot(colC, w3_ref[...], preferred_element_type=f32)
                     + b3_ref[...], 0.0)                 # (m3, Cm)

    # ---------------- stem4: 1x1 conv -----------------------------------------------------
    y4 = jnp.maximum(jnp.dot(y3.astype(bf16), w4_ref[...], preferred_element_type=f32)
                     + b4_ref[...], 0.0)                 # (m3, C2)

    # lane-dense store: rows = (n, h), lanes = (w, c)  ->  last dim Wo3*C2 (mult of 128)
    y4r = y4.reshape(Nb * Ho3, Wo3, C2)
    o_ref[...] = jnp.concatenate([y4r[:, w, :] for w in range(Wo3)],
                                 axis=-1).astype(o_ref.dtype)


def _fold_bn(w, bn, eps):
    """Fold inference BatchNorm into the conv weight / bias."""
    s = bn["g"] / jnp.sqrt(bn["v"] + eps)
    return w * s[:, None, None, None], bn["b"] - bn["m"] * s


def hgstem_forward(x_nchw, params, *, block_n=1, eps=1e-5):
    N, C1, H, W = x_nchw.shape
    Cm = params["w1"].shape[0]
    Ch = Cm // 2
    C2 = params["w4"].shape[0]
    assert N % block_n == 0, "batch must be divisible by block_n"

    Ho1, Wo1 = (H - 1) // 2 + 1, (W - 1) // 2 + 1
    Ho3, Wo3 = (Ho1 - 1) // 2 + 1, (Wo1 - 1) // 2 + 1

    # ---- fold BN and pack conv weights along the contraction axis (wrapper glue) ----
    w1, b1 = _fold_bn(params["w1"], params["bn1"], eps)
    w2a, b2a = _fold_bn(params["w2a"], params["bn2a"], eps)
    w2b, b2b = _fold_bn(params["w2b"], params["bn2b"], eps)
    w3, b3 = _fold_bn(params["w3"], params["bn3"], eps)
    w4, b4 = _fold_bn(params["w4"], params["bn4"], eps)

    bf = jnp.bfloat16
    pack = lambda w: jnp.transpose(w, (2, 3, 1, 0)).reshape(-1, w.shape[0])
    W1 = pack(w1).astype(bf)                                              # (9*C1,  Cm)
    W2a = pack(w2a).astype(bf)                                            # (4*Cm,  Ch)
    W2b = pack(w2b).astype(bf)                                            # (4*Ch,  Cm)
    W3 = jnp.concatenate([pack(w3[:, :Cm]), pack(w3[:, Cm:])], 0).astype(bf)  # (18*Cm, Cm)
    W4 = jnp.transpose(w4[:, :, 0, 0], (1, 0)).astype(bf)                 # (Cm, C2)
    row = lambda b: b.reshape(1, -1).astype(jnp.float32)

    # ---- stride-2 3x3 im2col of the raw input only (everything else stays fused) ----
    x = jnp.transpose(x_nchw, (0, 2, 3, 1)).astype(jnp.float32)           # NHWC
    xpad = jnp.pad(x, ((0, 0), (1, 1), (1, 1), (0, 0)))
    patches = [xpad[:, kh:kh + 2 * Ho1:2, kw:kw + 2 * Wo1:2, :]
               for kh in range(3) for kw in range(3)]
    xcol = jnp.concatenate(patches, axis=-1).reshape(N * Ho1 * Wo1, 9 * C1).astype(bf)

    flops = 2 * N * (Ho1 * Wo1 * (9 * C1 * Cm + 4 * Cm * Ch + 4 * Ch * Cm)
                     + Ho3 * Wo3 * (18 * Cm * Cm + Cm * C2))
    bytes_accessed = (2 * (xcol.size + W1.size + W2a.size + W2b.size + W3.size + W4.size)
                      + 4 * (N * Ho3 * Wo3 * C2 + 3 * Cm + Ch + C2))

    kfull = lambda shp: pl.BlockSpec(shp, lambda n: (0, 0))

    out2d = pl.pallas_call(
        hgstem_kernel,
        out_shape=jax.ShapeDtypeStruct((N * Ho3, Wo3 * C2), jnp.float32),
        grid_spec=pltpu.PrefetchScalarGridSpec(
            num_scalar_prefetch=0,
            grid=(N // block_n,),
            in_specs=[
                pl.BlockSpec((block_n * Ho1 * Wo1, 9 * C1), lambda n: (n, 0)),
                kfull(W1.shape), kfull((1, Cm)),
                kfull(W2a.shape), kfull((1, Ch)),
                kfull(W2b.shape), kfull((1, Cm)),
                kfull(W3.shape), kfull((1, Cm)),
                kfull(W4.shape), kfull((1, C2)),
            ],
            out_specs=pl.BlockSpec((block_n * Ho3, Wo3 * C2), lambda n: (n, 0)),
            scratch_shapes=[
                pltpu.VMEM((block_n, Ho1 + 1, Wo1 + 1, Cm), jnp.float32),  # F.pad(stem1)
                pltpu.VMEM((block_n, Ho1 + 1, Wo1 + 1, Ch), jnp.float32),  # F.pad(stem2a)
                pltpu.VMEM((block_n, Ho1 + 2, Wo1 + 2, Cm), jnp.float32),  # pool half, padded
                pltpu.VMEM((block_n, Ho1 + 2, Wo1 + 2, Cm), jnp.float32),  # stem2b half, padded
            ],
        ),
        compiler_params=pltpu.CompilerParams(
            dimension_semantics=("parallel",),
            vmem_limit_bytes=64 * 1024 * 1024),
        cost_estimate=pl.CostEstimate(flops=flops, transcendentals=0,
                                      bytes_accessed=bytes_accessed),
    )(xcol, W1, row(b1), W2a, row(b2a), W2b, row(b2b), W3, row(b3), W4, row(b4))

    out = out2d.reshape(N, Ho3, Wo3, C2)                 # undo the lane-dense packing
    return jnp.transpose(out, (0, 3, 1, 2))              # back to NCHW


def hgstem_reference(x, params, eps=1e-5):
    """Pure-JAX (XLA conv) reference for correctness checking."""
    def conv_bn_relu(x, w, bn, stride, pad):
        y = lax.conv_general_dilated(
            x, w, (stride, stride), ((pad, pad), (pad, pad)),
            dimension_numbers=("NCHW", "OIHW", "NCHW"))
        s = bn["g"] / jnp.sqrt(bn["v"] + eps)
        y = y * s[None, :, None, None] + (bn["b"] - bn["m"] * s)[None, :, None, None]
        return jnp.maximum(y, 0.0)

    x = conv_bn_relu(x, params["w1"], params["bn1"], 2, 1)
    x = jnp.pad(x, ((0, 0), (0, 0), (0, 1), (0, 1)))
    x2 = conv_bn_relu(x, params["w2a"], params["bn2a"], 1, 0)
    x2 = jnp.pad(x2, ((0, 0), (0, 0), (0, 1), (0, 1)))
    x2 = conv_bn_relu(x2, params["w2b"], params["bn2b"], 1, 0)
    x1 = lax.reduce_window(x, -jnp.inf, lax.max, (1, 1, 2, 2), (1, 1, 1, 1), "VALID")
    x = jnp.concatenate([x1, x2], axis=1)
    x = conv_bn_relu(x, params["w3"], params["bn3"], 2, 1)
    x = conv_bn_relu(x, params["w4"], params["bn4"], 1, 0)
    return x


def init_params(key, c1, cm, c2):
    ks = jax.random.split(key, 10)

    def conv(k, co, ci, kk):
        bound = 1.0 / math.sqrt(ci * kk * kk)
        return jax.random.uniform(k, (co, ci, kk, kk), jnp.float32, -bound, bound)

    def bn(k, c):
        k1, k2, k3, k4 = jax.random.split(k, 4)
        return dict(g=1.0 + 0.1 * jax.random.uniform(k1, (c,), jnp.float32, -1.0, 1.0),
                    b=0.05 * jax.random.normal(k2, (c,), jnp.float32),
                    m=0.1 * jax.random.normal(k3, (c,), jnp.float32),
                    v=1.0 + 0.2 * jax.random.uniform(k4, (c,), jnp.float32))

    return {
        "w1": conv(ks[0], cm, c1, 3),        "bn1": bn(ks[1], cm),
        "w2a": conv(ks[2], cm // 2, cm, 2),  "bn2a": bn(ks[3], cm // 2),
        "w2b": conv(ks[4], cm, cm // 2, 2),  "bn2b": bn(ks[5], cm),
        "w3": conv(ks[6], cm, 2 * cm, 3),    "bn3": bn(ks[7], cm),
        "w4": conv(ks[8], c2, cm, 1),        "bn4": bn(ks[9], c2),
    }


if __name__ == "__main__":
    key = jax.random.PRNGKey(0)
    kx, kp = jax.random.split(key)

    # small stem shapes: batch=4, RGB input, 16x16 spatial, cm=32, c2=64
    N, C1, H, W = 4, 3, 16, 16
    CM, C2 = 32, 64
    x = jax.random.normal(kx, (N, C1, H, W), jnp.float32)
    params = init_params(kp, C1, CM, C2)

    out = hgstem_forward(x, params, block_n=2)          # block_n=2 -> M=128 rows / matmul
    jax.block_until_ready(out)

    ref = hgstem_reference(x, params)
    assert out.shape == ref.shape == (N, C2, 4, 4), (out.shape, ref.shape)
    # tolerance covers bf16 MXU inputs (same rounding the MXU applies to f32 operands
    # under default precision, used by both the kernel and the XLA reference convs)
    max_err = float(jnp.max(jnp.abs(out - ref)))
    assert jnp.allclose(out, ref, atol=2e-2, rtol=2e-2), max_err

    print("KERNEL_OK")
</pallas_src>

<mosaic_0001>
module attributes {stable_mosaic.version = 11 : i64} {
  func.func @hgstem_kernel(%arg0: i32, %arg1: memref<128x27xbf16, #tpu.memory_space<vmem>>, %arg2: memref<27x32xbf16, #tpu.memory_space<vmem>>, %arg3: memref<1x32xf32, #tpu.memory_space<vmem>>, %arg4: memref<128x16xbf16, #tpu.memory_space<vmem>>, %arg5: memref<1x16xf32, #tpu.memory_space<vmem>>, %arg6: memref<64x32xbf16, #tpu.memory_space<vmem>>, %arg7: memref<1x32xf32, #tpu.memory_space<vmem>>, %arg8: memref<576x32xbf16, #tpu.memory_space<vmem>>, %arg9: memref<1x32xf32, #tpu.memory_space<vmem>>, %arg10: memref<32x64xbf16, #tpu.memory_space<vmem>>, %arg11: memref<1x64xf32, #tpu.memory_space<vmem>>, %arg12: memref<8x256xf32, #tpu.memory_space<vmem>>, %arg13: memref<2x9x9x32xf32, #tpu.memory_space<vmem>>, %arg14: memref<2x9x9x16xf32, #tpu.memory_space<vmem>>, %arg15: memref<2x10x10x32xf32, #tpu.memory_space<vmem>>, %arg16: memref<2x10x10x32xf32, #tpu.memory_space<vmem>>) attributes {dimension_semantics = [#tpu.dimension_semantics<parallel>], iteration_bounds = array<i64: 2>, scalar_prefetch = 0 : i64, scratch_operands = 4 : i64, tpu.core_type = #tpu.core_type<tc>, window_params = [{transform_indices = @transform_0, window_bounds = array<i64: 128, 27>}, {pipeline_mode = #tpu.pipeline_mode<synchronous>, transform_indices = @transform_1, window_bounds = array<i64: 27, 32>}, {pipeline_mode = #tpu.pipeline_mode<synchronous>, transform_indices = @transform_2, window_bounds = array<i64: 1, 32>}, {pipeline_mode = #tpu.pipeline_mode<synchronous>, transform_indices = @transform_3, window_bounds = array<i64: 128, 16>}, {pipeline_mode = #tpu.pipeline_mode<synchronous>, transform_indices = @transform_4, window_bounds = array<i64: 1, 16>}, {pipeline_mode = #tpu.pipeline_mode<synchronous>, transform_indices = @transform_5, window_bounds = array<i64: 64, 32>}, {pipeline_mode = #tpu.pipeline_mode<synchronous>, transform_indices = @transform_6, window_bounds = array<i64: 1, 32>}, {pipeline_mode = #tpu.pipeline_mode<synchronous>, transform_indices = @transform_7, window_bounds = array<i64: 576, 32>}, {pipeline_mode = #tpu.pipeline_mode<synchronous>, transform_indices = @transform_8, window_bounds = array<i64: 1, 32>}, {pipeline_mode = #tpu.pipeline_mode<synchronous>, transform_indices = @transform_9, window_bounds = array<i64: 32, 64>}, {pipeline_mode = #tpu.pipeline_mode<synchronous>, transform_indices = @transform_10, window_bounds = array<i64: 1, 64>}, {transform_indices = @transform_11, window_bounds = array<i64: 8, 256>}]} {
    %cst = arith.constant 0.000000e+00 : f32
    %0 = vector.broadcast %cst : f32 to vector<2x1x9x32xf32>
    %c0 = arith.constant 0 : index
    %c8 = arith.constant 8 : index
    %c0_0 = arith.constant 0 : index
    %c0_1 = arith.constant 0 : index
    %1 = vector.load %arg13[%c0, %c8, %c0_0, %c0_1] : memref<2x9x9x32xf32, #tpu.memory_space<vmem>>, vector<2x1x9x32xf32>
    tpu.vector_store %arg13[%c0, %c8, %c0_0, %c0_1], %0 {strides = array<i32>} : memref<2x9x9x32xf32, #tpu.memory_space<vmem>>, vector<2x1x9x32xf32>,
    %cst_2 = arith.constant 0.000000e+00 : f32
    %2 = vector.broadcast %cst_2 : f32 to vector<2x9x1x32xf32>
    %c0_3 = arith.constant 0 : index
    %c0_4 = arith.constant 0 : index
    %c8_5 = arith.constant 8 : index
    %c0_6 = arith.constant 0 : index
    %3 = vector.load %arg13[%c0_3, %c0_4, %c8_5, %c0_6] : memref<2x9x9x32xf32, #tpu.memory_space<vmem>>, vector<2x9x1x32xf32>
    tpu.vector_store %arg13[%c0_3, %c0_4, %c8_5, %c0_6], %2 {strides = array<i32>} : memref<2x9x9x32xf32, #tpu.memory_space<vmem>>, vector<2x9x1x32xf32>,
    %cst_7 = arith.constant 0.000000e+00 : f32
    %4 = vector.broadcast %cst_7 : f32 to vector<2x1x9x16xf32>
    %c0_8 = arith.constant 0 : index
    %c8_9 = arith.constant 8 : index
    %c0_10 = arith.constant 0 : index
    %c0_11 = arith.constant 0 : index
    %5 = vector.load %arg14[%c0_8, %c8_9, %c0_10, %c0_11] : memref<2x9x9x16xf32, #tpu.memory_space<vmem>>, vector<2x1x9x16xf32>
    tpu.vector_store %arg14[%c0_8, %c8_9, %c0_10, %c0_11], %4 {strides = array<i32>} : memref<2x9x9x16xf32, #tpu.memory_space<vmem>>, vector<2x1x9x16xf32>,
    %cst_12 = arith.constant 0.000000e+00 : f32
    %6 = vector.broadcast %cst_12 : f32 to vector<2x9x1x16xf32>
    %c0_13 = arith.constant 0 : index
    %c0_14 = arith.constant 0 : index
    %c8_15 = arith.constant 8 : index
    %c0_16 = arith.constant 0 : index
    %7 = vector.load %arg14[%c0_13, %c0_14, %c8_15, %c0_16] : memref<2x9x9x16xf32, #tpu.memory_space<vmem>>, vector<2x9x1x16xf32>
    tpu.vector_store %arg14[%c0_13, %c0_14, %c8_15, %c0_16], %6 {strides = array<i32>} : memref<2x9x9x16xf32, #tpu.memory_space<vmem>>, vector<2x9x1x16xf32>,
    %cst_17 = arith.constant 0.000000e+00 : f32
    %8 = vector.broadcast %cst_17 : f32 to vector<2x1x10x32xf32>
    %c0_18 = arith.constant 0 : index
    %c0_19 = arith.constant 0 : index
    %c0_20 = arith.constant 0 : index
    %c0_21 = arith.constant 0 : index
    %9 = vector.load %arg15[%c0_18, %c0_19, %c0_20, %c0_21] : memref<2x10x10x32xf32, #tpu.memory_space<vmem>>, vector<2x1x10x32xf32>
    tpu.vector_store %arg15[%c0_18, %c0_19, %c0_20, %c0_21], %8 {strides = array<i32>} : memref<2x10x10x32xf32, #tpu.memory_space<vmem>>, vector<2x1x10x32xf32>,
    %cst_22 = arith.constant 0.000000e+00 : f32
    %10 = vector.broadcast %cst_22 : f32 to vector<2x1x10x32xf32>
    %c0_23 = arith.constant 0 : index
    %c9 = arith.constant 9 : index
    %c0_24 = arith.constant 0 : index
    %c0_25 = arith.constant 0 : index
    %11 = vector.load %arg15[%c0_23, %c9, %c0_24, %c0_25] : memref<2x10x10x32xf32, #tpu.memory_space<vmem>>, vector<2x1x10x32xf32>
    tpu.vector_store %arg15[%c0_23, %c9, %c0_24, %c0_25], %10 {strides = array<i32>} : memref<2x10x10x32xf32, #tpu.memory_space<vmem>>, vector<2x1x10x32xf32>,
    %cst_26 = arith.constant 0.000000e+00 : f32
    %12 = vector.broadcast %cst_26 : f32 to vector<2x10x1x32xf32>
    %c0_27 = arith.constant 0 : index
    %c0_28 = arith.constant 0 : index
    %c0_29 = arith.constant 0 : index
    %c0_30 = arith.constant 0 : index
    %13 = vector.load %arg15[%c0_27, %c0_28, %c0_29, %c0_30] : memref<2x10x10x32xf32, #tpu.memory_space<vmem>>, vector<2x10x1x32xf32>
    tpu.vector_store %arg15[%c0_27, %c0_28, %c0_29, %c0_30], %12 {strides = array<i32>} : memref<2x10x10x32xf32, #tpu.memory_space<vmem>>, vector<2x10x1x32xf32>,
    %cst_31 = arith.constant 0.000000e+00 : f32
    %14 = vector.broadcast %cst_31 : f32 to vector<2x10x1x32xf32>
    %c0_32 = arith.constant 0 : index
    %c0_33 = arith.constant 0 : index
    %c9_34 = arith.constant 9 : index
    %c0_35 = arith.constant 0 : index
    %15 = vector.load %arg15[%c0_32, %c0_33, %c9_34, %c0_35] : memref<2x10x10x32xf32, #tpu.memory_space<vmem>>, vector<2x10x1x32xf32>
    tpu.vector_store %arg15[%c0_32, %c0_33, %c9_34, %c0_35], %14 {strides = array<i32>} : memref<2x10x10x32xf32, #tpu.memory_space<vmem>>, vector<2x10x1x32xf32>,
    %cst_36 = arith.constant 0.000000e+00 : f32
    %16 = vector.broadcast %cst_36 : f32 to vector<2x1x10x32xf32>
    %c0_37 = arith.constant 0 : index
    %c0_38 = arith.constant 0 : index
    %c0_39 = arith.constant 0 : index
    %c0_40 = arith.constant 0 : index
    %17 = vector.load %arg16[%c0_37, %c0_38, %c0_39, %c0_40] : memref<2x10x10x32xf32, #tpu.memory_space<vmem>>, vector<2x1x10x32xf32>
    tpu.vector_store %arg16[%c0_37, %c0_38, %c0_39, %c0_40], %16 {strides = array<i32>} : memref<2x10x10x32xf32, #tpu.memory_space<vmem>>, vector<2x1x10x32xf32>,
    %cst_41 = arith.constant 0.000000e+00 : f32
    %18 = vector.broadcast %cst_41 : f32 to vector<2x1x10x32xf32>
    %c0_42 = arith.constant 0 : index
    %c9_43 = arith.constant 9 : index
    %c0_44 = arith.constant 0 : index
    %c0_45 = arith.constant 0 : index
    %19 = vector.load %arg16[%c0_42, %c9_43, %c0_44, %c0_45] : memref<2x10x10x32xf32, #tpu.memory_space<vmem>>, vector<2x1x10x32xf32>
    tpu.vector_store %arg16[%c0_42, %c9_43, %c0_44, %c0_45], %18 {strides = array<i32>} : memref<2x10x10x32xf32, #tpu.memory_space<vmem>>, vector<2x1x10x32xf32>,
    %cst_46 = arith.constant 0.000000e+00 : f32
    %20 = vector.broadcast %cst_46 : f32 to vector<2x10x1x32xf32>
    %c0_47 = arith.constant 0 : index
    %c0_48 = arith.constant 0 : index
    %c0_49 = arith.constant 0 : index
    %c0_50 = arith.constant 0 : index
    %21 = vector.load %arg16[%c0_47, %c0_48, %c0_49, %c0_50] : memref<2x10x10x32xf32, #tpu.memory_space<vmem>>, vector<2x10x1x32xf32>
    tpu.vector_store %arg16[%c0_47, %c0_48, %c0_49, %c0_50], %20 {strides = array<i32>} : memref<2x10x10x32xf32, #tpu.memory_space<vmem>>, vector<2x10x1x32xf32>,
    %cst_51 = arith.constant 0.000000e+00 : f32
    %22 = vector.broadcast %cst_51 : f32 to vector<2x10x1x32xf32>
    %c0_52 = arith.constant 0 : index
    %c0_53 = arith.constant 0 : index
    %c9_54 = arith.constant 9 : index
    %c0_55 = arith.constant 0 : index
    %23 = vector.load %arg16[%c0_52, %c0_53, %c9_54, %c0_55] : memref<2x10x10x32xf32, #tpu.memory_space<vmem>>, vector<2x10x1x32xf32>
    tpu.vector_store %arg16[%c0_52, %c0_53, %c9_54, %c0_55], %22 {strides = array<i32>} : memref<2x10x10x32xf32, #tpu.memory_space<vmem>>, vector<2x10x1x32xf32>,
    %c0_56 = arith.constant 0 : index
    %c0_57 = arith.constant 0 : index
    %24 = vector.load %arg1[%c0_56, %c0_57] : memref<128x27xbf16, #tpu.memory_space<vmem>>, vector<128x27xbf16>
    %c0_58 = arith.constant 0 : index
    %c0_59 = arith.constant 0 : index
    %25 = vector.load %arg2[%c0_58, %c0_59] : memref<27x32xbf16, #tpu.memory_space<vmem>>, vector<27x32xbf16>
    %cst_60 = arith.constant dense<0.000000e+00> : vector<128x32xf32>
    %26 = tpu.matmul %24, %25, %cst_60 {dimension_numbers = #tpu.dot_dimension_numbers<[1], [0], [0], [1], [0, 0, 1, 1], [], []>} : vector<128x27xbf16>, vector<27x32xbf16>, vector<128x32xf32> -> vector<128x32xf32>
    %c0_61 = arith.constant 0 : index
    %c0_62 = arith.constant 0 : index
    %27 = vector.load %arg3[%c0_61, %c0_62] : memref<1x32xf32, #tpu.memory_space<vmem>>, vector<1x32xf32>
    %28 = vector.broadcast %27 : vector<1x32xf32> to vector<128x32xf32>
    %29 = arith.addf %26, %28 : vector<128x32xf32>
    %cst_63 = arith.constant 0.000000e+00 : f32
    %30 = vector.broadcast %cst_63 : f32 to vector<128x32xf32>
    %31 = arith.maximumf %29, %30 : vector<128x32xf32>
    %32 = vector.shape_cast %31 : vector<128x32xf32> to vector<2x8x8x32xf32>
    %c0_64 = arith.constant 0 : index
    %c0_65 = arith.constant 0 : index
    %c0_66 = arith.constant 0 : index
    %c0_67 = arith.constant 0 : index
    %33 = vector.load %arg13[%c0_64, %c0_65, %c0_66, %c0_67] : memref<2x9x9x32xf32, #tpu.memory_space<vmem>>, vector<2x8x8x32xf32>
    tpu.vector_store %arg13[%c0_64, %c0_65, %c0_66, %c0_67], %32 {strides = array<i32>} : memref<2x9x9x32xf32, #tpu.memory_space<vmem>>, vector<2x8x8x32xf32>,
    %c0_68 = arith.constant 0 : index
    %c0_69 = arith.constant 0 : index
    %c0_70 = arith.constant 0 : index
    %c0_71 = arith.constant 0 : index
    %34 = vector.load %arg13[%c0_68, %c0_69, %c0_70, %c0_71] : memref<2x9x9x32xf32, #tpu.memory_space<vmem>>, vector<2x8x8x32xf32>
    %35 = vector.shape_cast %34 : vector<2x8x8x32xf32> to vector<128x32xf32>
    %c0_72 = arith.constant 0 : index
    %c0_73 = arith.constant 0 : index
    %c1 = arith.constant 1 : index
    %c0_74 = arith.constant 0 : index
    %36 = vector.load %arg13[%c0_72, %c0_73, %c1, %c0_74] : memref<2x9x9x32xf32, #tpu.memory_space<vmem>>, vector<2x8x8x32xf32>
    %37 = vector.shape_cast %36 : vector<2x8x8x32xf32> to vector<128x32xf32>
    %c0_75 = arith.constant 0 : index
    %c1_76 = arith.constant 1 : index
    %c0_77 = arith.constant 0 : index
    %c0_78 = arith.constant 0 : index
    %38 = vector.load %arg13[%c0_75, %c1_76, %c0_77, %c0_78] : memref<2x9x9x32xf32, #tpu.memory_space<vmem>>, vector<2x8x8x32xf32>
    %39 = vector.shape_cast %38 : vector<2x8x8x32xf32> to vector<128x32xf32>
    %c0_79 = arith.constant 0 : index
    %c1_80 = arith.constant 1 : index
    %c1_81 = arith.constant 1 : index
    %c0_82 = arith.constant 0 : index
    %40 = vector.load %arg13[%c0_79, %c1_80, %c1_81, %c0_82] : memref<2x9x9x32xf32, #tpu.memory_space<vmem>>, vector<2x8x8x32xf32>
    %41 = vector.shape_cast %40 : vector<2x8x8x32xf32> to vector<128x32xf32>
    %42 = tpu.concatenate %35, %37, %39, %41 in 1 : vector<128x32xf32>, vector<128x32xf32>, vector<128x32xf32>, vector<128x32xf32> -> vector<128x128xf32>
    %43 = arith.truncf %42 : vector<128x128xf32> to vector<128x128xbf16>
    %c0_83 = arith.constant 0 : index
    %c0_84 = arith.constant 0 : index
    %44 = vector.load %arg4[%c0_83, %c0_84] : memref<128x16xbf16, #tpu.memory_space<vmem>>, vector<128x16xbf16>
    %cst_85 = arith.constant dense<0.000000e+00> : vector<128x16xf32>
    %45 = tpu.matmul %43, %44, %cst_85 {dimension_numbers = #tpu.dot_dimension_numbers<[1], [0], [0], [1], [0, 0, 1, 1], [], []>} : vector<128x128xbf16>, vector<128x16xbf16>, vector<128x16xf32> -> vector<128x16xf32>
    %c0_86 = arith.constant 0 : index
    %c0_87 = arith.constant 0 : index
    %46 = vector.load %arg5[%c0_86, %c0_87] : memref<1x16xf32, #tpu.memory_space<vmem>>, vector<1x16xf32>
    %47 = vector.broadcast %46 : vector<1x16xf32> to vector<128x16xf32>
    %48 = arith.addf %45, %47 : vector<128x16xf32>
    %cst_88 = arith.constant 0.000000e+00 : f32
    %49 = vector.broadcast %cst_88 : f32 to vector<128x16xf32>
    %50 = arith.maximumf %48, %49 : vector<128x16xf32>
    %51 = vector.shape_cast %50 : vector<128x16xf32> to vector<2x8x8x16xf32>
    %c0_89 = arith.constant 0 : index
    %c0_90 = arith.constant 0 : index
    %c0_91 = arith.constant 0 : index
    %c0_92 = arith.constant 0 : index
    %52 = vector.load %arg14[%c0_89, %c0_90, %c0_91, %c0_92] : memref<2x9x9x16xf32, #tpu.memory_space<vmem>>, vector<2x8x8x16xf32>
    tpu.vector_store %arg14[%c0_89, %c0_90, %c0_91, %c0_92], %51 {strides = array<i32>} : memref<2x9x9x16xf32, #tpu.memory_space<vmem>>, vector<2x8x8x16xf32>,
    %c0_93 = arith.constant 0 : index
    %c0_94 = arith.constant 0 : index
    %c0_95 = arith.constant 0 : index
    %c0_96 = arith.constant 0 : index
    %53 = vector.load %arg14[%c0_93, %c0_94, %c0_95, %c0_96] : memref<2x9x9x16xf32, #tpu.memory_space<vmem>>, vector<2x8x8x16xf32>
    %54 = vector.shape_cast %53 : vector<2x8x8x16xf32> to vector<128x16xf32>
    %c0_97 = arith.constant 0 : index
    %c0_98 = arith.constant 0 : index
    %c1_99 = arith.constant 1 : index
    %c0_100 = arith.constant 0 : index
    %55 = vector.load %arg14[%c0_97, %c0_98, %c1_99, %c0_100] : memref<2x9x9x16xf32, #tpu.memory_space<vmem>>, vector<2x8x8x16xf32>
    %56 = vector.shape_cast %55 : vector<2x8x8x16xf32> to vector<128x16xf32>
    %c0_101 = arith.constant 0 : index
    %c1_102 = arith.constant 1 : index
    %c0_103 = arith.constant 0 : index
    %c0_104 = arith.constant 0 : index
    %57 = vector.load %arg14[%c0_101, %c1_102, %c0_103, %c0_104] : memref<2x9x9x16xf32, #tpu.memory_space<vmem>>, vector<2x8x8x16xf32>
    %58 = vector.shape_cast %57 : vector<2x8x8x16xf32> to vector<128x16xf32>
    %c0_105 = arith.constant 0 : index
    %c1_106 = arith.constant 1 : index
    %c1_107 = arith.constant 1 : index
    %c0_108 = arith.constant 0 : index
    %59 = vector.load %arg14[%c0_105, %c1_106, %c1_107, %c0_108] : memref<2x9x9x16xf32, #tpu.memory_space<vmem>>, vector<2x8x8x16xf32>
    %60 = vector.shape_cast %59 : vector<2x8x8x16xf32> to vector<128x16xf32>
    %61 = tpu.concatenate %54, %56, %58, %60 in 1 : vector<128x16xf32>, vector<128x16xf32>, vector<128x16xf32>, vector<128x16xf32> -> vector<128x64xf32>
    %62 = arith.truncf %61 : vector<128x64xf32> to vector<128x64xbf16>
    %c0_109 = arith.constant 0 : index
    %c0_110 = arith.constant 0 : index
    %63 = vector.load %arg6[%c0_109, %c0_110] : memref<64x32xbf16, #tpu.memory_space<vmem>>, vector<64x32xbf16>
    %cst_111 = arith.constant dense<0.000000e+00> : vector<128x32xf32>
    %64 = tpu.matmul %62, %63, %cst_111 {dimension_numbers = #tpu.dot_dimension_numbers<[1], [0], [0], [1], [0, 0, 1, 1], [], []>} : vector<128x64xbf16>, vector<64x32xbf16>, vector<128x32xf32> -> vector<128x32xf32>
    %c0_112 = arith.constant 0 : index
    %c0_113 = arith.constant 0 : index
    %65 = vector.load %arg7[%c0_112, %c0_113] : memref<1x32xf32, #tpu.memory_space<vmem>>, vector<1x32xf32>
    %66 = vector.broadcast %65 : vector<1x32xf32> to vector<128x32xf32>
    %67 = arith.addf %64, %66 : vector<128x32xf32>
    %cst_114 = arith.constant 0.000000e+00 : f32
    %68 = vector.broadcast %cst_114 : f32 to vector<128x32xf32>
    %69 = arith.maximumf %67, %68 : vector<128x32xf32>
    %c0_115 = arith.constant 0 : index
    %c0_116 = arith.constant 0 : index
    %c0_117 = arith.constant 0 : index
    %c0_118 = arith.constant 0 : index
    %70 = vector.load %arg13[%c0_115, %c0_116, %c0_117, %c0_118] : memref<2x9x9x32xf32, #tpu.memory_space<vmem>>, vector<2x8x8x32xf32>
    %c0_119 = arith.constant 0 : index
    %c0_120 = arith.constant 0 : index
    %c1_121 = arith.constant 1 : index
    %c0_122 = arith.constant 0 : index
    %71 = vector.load %arg13[%c0_119, %c0_120, %c1_121, %c0_122] : memref<2x9x9x32xf32, #tpu.memory_space<vmem>>, vector<2x8x8x32xf32>
    %72 = arith.maximumf %70, %71 : vector<2x8x8x32xf32>
    %c0_123 = arith.constant 0 : index
    %c1_124 = arith.constant 1 : index
    %c0_125 = arith.constant 0 : index
    %c0_126 = arith.constant 0 : index
    %73 = vector.load %arg13[%c0_123, %c1_124, %c0_125, %c0_126] : memref<2x9x9x32xf32, #tpu.memory_space<vmem>>, vector<2x8x8x32xf32>
    %c0_127 = arith.constant 0 : index
    %c1_128 = arith.constant 1 : index
    %c1_129 = arith.constant 1 : index
    %c0_130 = arith.constant 0 : index
    %74 = vector.load %arg13[%c0_127, %c1_128, %c1_129, %c0_130] : memref<2x9x9x32xf32, #tpu.memory_space<vmem>>, vector<2x8x8x32xf32>
    %75 = arith.maximumf %73, %74 : vector<2x8x8x32xf32>
    %76 = arith.maximumf %72, %75 : vector<2x8x8x32xf32>
    %c0_131 = arith.constant 0 : index
    %c1_132 = arith.constant 1 : index
    %c1_133 = arith.constant 1 : index
    %c0_134 = arith.constant 0 : index
    %77 = vector.load %arg15[%c0_131, %c1_132, %c1_133, %c0_134] : memref<2x10x10x32xf32, #tpu.memory_space<vmem>>, vector<2x8x8x32xf32>
    tpu.vector_store %arg15[%c0_131, %c1_132, %c1_133, %c0_134], %76 {strides = array<i32>} : memref<2x10x10x32xf32, #tpu.memory_space<vmem>>, vector<2x8x8x32xf32>,
    %78 = vector.shape_cast %69 : vector<128x32xf32> to vector<2x8x8x32xf32>
    %c0_135 = arith.constant 0 : index
    %c1_136 = arith.constant 1 : index
    %c1_137 = arith.constant 1 : index
    %c0_138 = arith.constant 0 : index
    %79 = vector.load %arg16[%c0_135, %c1_136, %c1_137, %c0_138] : memref<2x10x10x32xf32, #tpu.memory_space<vmem>>, vector<2x8x8x32xf32>
    tpu.vector_store %arg16[%c0_135, %c1_136, %c1_137, %c0_138], %78 {strides = array<i32>} : memref<2x10x10x32xf32, #tpu.memory_space<vmem>>, vector<2x8x8x32xf32>,
    %c0_139 = arith.constant 0 : index
    %c0_140 = arith.constant 0 : index
    %c0_141 = arith.constant 0 : index
    %c0_142 = arith.constant 0 : index
    %80 = tpu.strided_load %arg15[%c0_139, %c0_140, %c0_141, %c0_142] {strides = array<i32: 1, 2, 2, 1>} : memref<2x10x10x32xf32, #tpu.memory_space<vmem>>, vector<2x4x4x32xf32>
    %81 = vector.shape_cast %80 : vector<2x4x4x32xf32> to vector<32x32xf32>
    %c0_143 = arith.constant 0 : index
    %c0_144 = arith.constant 0 : index
    %c1_145 = arith.constant 1 : index
    %c0_146 = arith.constant 0 : index
    %82 = tpu.strided_load %arg15[%c0_143, %c0_144, %c1_145, %c0_146] {strides = array<i32: 1, 2, 2, 1>} : memref<2x10x10x32xf32, #tpu.memory_space<vmem>>, vector<2x4x4x32xf32>
    %83 = vector.shape_cast %82 : vector<2x4x4x32xf32> to vector<32x32xf32>
    %c0_147 = arith.constant 0 : index
    %c0_148 = arith.constant 0 : index
    %c2 = arith.constant 2 : index
    %c0_149 = arith.constant 0 : index
    %84 = tpu.strided_load %arg15[%c0_147, %c0_148, %c2, %c0_149] {strides = array<i32: 1, 2, 2, 1>} : memref<2x10x10x32xf32, #tpu.memory_space<vmem>>, vector<2x4x4x32xf32>
    %85 = vector.shape_cast %84 : vector<2x4x4x32xf32> to vector<32x32xf32>
    %c0_150 = arith.constant 0 : index
    %c1_151 = arith.constant 1 : index
    %c0_152 = arith.constant 0 : index
    %c0_153 = arith.constant 0 : index
    %86 = tpu.strided_load %arg15[%c0_150, %c1_151, %c0_152, %c0_153] {strides = array<i32: 1, 2, 2, 1>} : memref<2x10x10x32xf32, #tpu.memory_space<vmem>>, vector<2x4x4x32xf32>
    %87 = vector.shape_cast %86 : vector<2x4x4x32xf32> to vector<32x32xf32>
    %c0_154 = arith.constant 0 : index
    %c1_155 = arith.constant 1 : index
    %c1_156 = arith.constant 1 : index
    %c0_157 = arith.constant 0 : index
    %88 = tpu.strided_load %arg15[%c0_154, %c1_155, %c1_156, %c0_157] {strides = array<i32: 1, 2, 2, 1>} : memref<2x10x10x32xf32, #tpu.memory_space<vmem>>, vector<2x4x4x32xf32>
    %89 = vector.shape_cast %88 : vector<2x4x4x32xf32> to vector<32x32xf32>
    %c0_158 = arith.constant 0 : index
    %c1_159 = arith.constant 1 : index
    %c2_160 = arith.constant 2 : index
    %c0_161 = arith.constant 0 : index
    %90 = tpu.strided_load %arg15[%c0_158, %c1_159, %c2_160, %c0_161] {strides = array<i32: 1, 2, 2, 1>} : memref<2x10x10x32xf32, #tpu.memory_space<vmem>>, vector<2x4x4x32xf32>
    %91 = vector.shape_cast %90 : vector<2x4x4x32xf32> to vector<32x32xf32>
    %c0_162 = arith.constant 0 : index
    %c2_163 = arith.constant 2 : index
    %c0_164 = arith.constant 0 : index
    %c0_165 = arith.constant 0 : index
    %92 = tpu.strided_load %arg15[%c0_162, %c2_163, %c0_164, %c0_165] {strides = array<i32: 1, 2, 2, 1>} : memref<2x10x10x32xf32, #tpu.memory_space<vmem>>, vector<2x4x4x32xf32>
    %93 = vector.shape_cast %92 : vector<2x4x4x32xf32> to vector<32x32xf32>
    %c0_166 = arith.constant 0 : index
    %c2_167 = arith.constant 2 : index
    %c1_168 = arith.constant 1 : index
    %c0_169 = arith.constant 0 : index
    %94 = tpu.strided_load %arg15[%c0_166, %c2_167, %c1_168, %c0_169] {strides = array<i32: 1, 2, 2, 1>} : memref<2x10x10x32xf32, #tpu.memory_space<vmem>>, vector<2x4x4x32xf32>
    %95 = vector.shape_cast %94 : vector<2x4x4x32xf32> to vector<32x32xf32>
    %c0_170 = arith.constant 0 : index
    %c2_171 = arith.constant 2 : index
    %c2_172 = arith.constant 2 : index
    %c0_173 = arith.constant 0 : index
    %96 = tpu.strided_load %arg15[%c0_170, %c2_171, %c2_172, %c0_173] {strides = array<i32: 1, 2, 2, 1>} : memref<2x10x10x32xf32, #tpu.memory_space<vmem>>, vector<2x4x4x32xf32>
    %97 = vector.shape_cast %96 : vector<2x4x4x32xf32> to vector<32x32xf32>
    %c0_174 = arith.constant 0 : index
    %c0_175 = arith.constant 0 : index
    %c0_176 = arith.constant 0 : index
    %c0_177 = arith.constant 0 : index
    %98 = tpu.strided_load %arg16[%c0_174, %c0_175, %c0_176, %c0_177] {strides = array<i32: 1, 2, 2, 1>} : memref<2x10x10x32xf32, #tpu.memory_space<vmem>>, vector<2x4x4x32xf32>
    %99 = vector.shape_cast %98 : vector<2x4x4x32xf32> to vector<32x32xf32>
    %c0_178 = arith.constant 0 : index
    %c0_179 = arith.constant 0 : index
    %c1_180 = arith.constant 1 : index
    %c0_181 = arith.constant 0 : index
    %100 = tpu.strided_load %arg16[%c0_178, %c0_179, %c1_180, %c0_181] {strides = array<i32: 1, 2, 2, 1>} : memref<2x10x10x32xf32, #tpu.memory_space<vmem>>, vector<2x4x4x32xf32>
    %101 = vector.shape_cast %100 : vector<2x4x4x32xf32> to vector<32x32xf32>
    %c0_182 = arith.constant 0 : index
    %c0_183 = arith.constant 0 : index
    %c2_184 = arith.constant 2 : index
    %c0_185 = arith.constant 0 : index
    %102 = tpu.strided_load %arg16[%c0_182, %c0_183, %c2_184, %c0_185] {strides = array<i32: 1, 2, 2, 1>} : memref<2x10x10x32xf32, #tpu.memory_space<vmem>>, vector<2x4x4x32xf32>
    %103 = vector.shape_cast %102 : vector<2x4x4x32xf32> to vector<32x32xf32>
    %c0_186 = arith.constant 0 : index
    %c1_187 = arith.constant 1 : index
    %c0_188 = arith.constant 0 : index
    %c0_189 = arith.constant 0 : index
    %104 = tpu.strided_load %arg16[%c0_186, %c1_187, %c0_188, %c0_189] {strides = array<i32: 1, 2, 2, 1>} : memref<2x10x10x32xf32, #tpu.memory_space<vmem>>, vector<2x4x4x32xf32>
    %105 = vector.shape_cast %104 : vector<2x4x4x32xf32> to vector<32x32xf32>
    %c0_190 = arith.constant 0 : index
    %c1_191 = arith.constant 1 : index
    %c1_192 = arith.constant 1 : index
    %c0_193 = arith.constant 0 : index
    %106 = tpu.strided_load %arg16[%c0_190, %c1_191, %c1_192, %c0_193] {strides = array<i32: 1, 2, 2, 1>} : memref<2x10x10x32xf32, #tpu.memory_space<vmem>>, vector<2x4x4x32xf32>
    %107 = vector.shape_cast %106 : vector<2x4x4x32xf32> to vector<32x32xf32>
    %c0_194 = arith.constant 0 : index
    %c1_195 = arith.constant 1 : index
    %c2_196 = arith.constant 2 : index
    %c0_197 = arith.constant 0 : index
    %108 = tpu.strided_load %arg16[%c0_194, %c1_195, %c2_196, %c0_197] {strides = array<i32: 1, 2, 2, 1>} : memref<2x10x10x32xf32, #tpu.memory_space<vmem>>, vector<2x4x4x32xf32>
    %109 = vector.shape_cast %108 : vector<2x4x4x32xf32> to vector<32x32xf32>
    %c0_198 = arith.constant 0 : index
    %c2_199 = arith.constant 2 : index
    %c0_200 = arith.constant 0 : index
    %c0_201 = arith.constant 0 : index
    %110 = tpu.strided_load %arg16[%c0_198, %c2_199, %c0_200, %c0_201] {strides = array<i32: 1, 2, 2, 1>} : memref<2x10x10x32xf32, #tpu.memory_space<vmem>>, vector<2x4x4x32xf32>
    %111 = vector.shape_cast %110 : vector<2x4x4x32xf32> to vector<32x32xf32>
    %c0_202 = arith.constant 0 : index
    %c2_203 = arith.constant 2 : index
    %c1_204 = arith.constant 1 : index
    %c0_205 = arith.constant 0 : index
    %112 = tpu.strided_load %arg16[%c0_202, %c2_203, %c1_204, %c0_205] {strides = array<i32: 1, 2, 2, 1>} : memref<2x10x10x32xf32, #tpu.memory_space<vmem>>, vector<2x4x4x32xf32>
    %113 = vector.shape_cast %112 : vector<2x4x4x32xf32> to vector<32x32xf32>
    %c0_206 = arith.constant 0 : index
    %c2_207 = arith.constant 2 : index
    %c2_208 = arith.constant 2 : index
    %c0_209 = arith.constant 0 : index
    %114 = tpu.strided_load %arg16[%c0_206, %c2_207, %c2_208, %c0_209] {strides = array<i32: 1, 2, 2, 1>} : memref<2x10x10x32xf32, #tpu.memory_space<vmem>>, vector<2x4x4x32xf32>
    %115 = vector.shape_cast %114 : vector<2x4x4x32xf32> to vector<32x32xf32>
    %116 = tpu.concatenate %81, %83, %85, %87, %89, %91, %93, %95, %97, %99, %101, %103, %105, %107, %109, %111 in 1 : vector<32x32xf32>, vector<32x32xf32>, vector<32x32xf32>, vector<32x32xf32>, vector<32x32xf32>, vector<32x32xf32>, vector<32x32xf32>, vector<32x32xf32>, vector<32x32xf32>, vector<32x32xf32>, vector<32x32xf32>, vector<32x32xf32>, vector<32x32xf32>, vector<32x32xf32>, vector<32x32xf32>, vector<32x32xf32> -> vector<32x512xf32>
    %117 = tpu.concatenate %113, %115 in 1 : vector<32x32xf32>, vector<32x32xf32> -> vector<32x64xf32>
    %118 = tpu.concatenate %116, %117 in 1 : vector<32x512xf32>, vector<32x64xf32> -> vector<32x576xf32>
    %119 = arith.truncf %118 : vector<32x576xf32> to vector<32x576xbf16>
    %c0_210 = arith.constant 0 : index
    %c0_211 = arith.constant 0 : index
    %120 = vector.load %arg8[%c0_210, %c0_211] : memref<576x32xbf16, #tpu.memory_space<vmem>>, vector<576x32xbf16>
    %cst_212 = arith.constant dense<0.000000e+00> : vector<32x32xf32>
    %121 = tpu.matmul %119, %120, %cst_212 {dimension_numbers = #tpu.dot_dimension_numbers<[1], [0], [0], [1], [0, 0, 1, 1], [], []>} : vector<32x576xbf16>, vector<576x32xbf16>, vector<32x32xf32> -> vector<32x32xf32>
    %c0_213 = arith.constant 0 : index
    %c0_214 = arith.constant 0 : index
    %122 = vector.load %arg9[%c0_213, %c0_214] : memref<1x32xf32, #tpu.memory_space<vmem>>, vector<1x32xf32>
    %123 = vector.broadcast %122 : vector<1x32xf32> to vector<32x32xf32>
    %124 = arith.addf %121, %123 : vector<32x32xf32>
    %cst_215 = arith.constant 0.000000e+00 : f32
    %125 = vector.broadcast %cst_215 : f32 to vector<32x32xf32>
    %126 = arith.maximumf %124, %125 : vector<32x32xf32>
    %127 = arith.truncf %126 : vector<32x32xf32> to vector<32x32xbf16>
    %c0_216 = arith.constant 0 : index
    %c0_217 = arith.constant 0 : index
    %128 = vector.load %arg10[%c0_216, %c0_217] : memref<32x64xbf16, #tpu.memory_space<vmem>>, vector<32x64xbf16>
    %cst_218 = arith.constant dense<0.000000e+00> : vector<32x64xf32>
    %129 = tpu.matmul %127, %128, %cst_218 {dimension_numbers = #tpu.dot_dimension_numbers<[1], [0], [0], [1], [0, 0, 1, 1], [], []>} : vector<32x32xbf16>, vector<32x64xbf16>, vector<32x64xf32> -> vector<32x64xf32>
    %c0_219 = arith.constant 0 : index
    %c0_220 = arith.constant 0 : index
    %130 = vector.load %arg11[%c0_219, %c0_220] : memref<1x64xf32, #tpu.memory_space<vmem>>, vector<1x64xf32>
    %131 = vector.broadcast %130 : vector<1x64xf32> to vector<32x64xf32>
    %132 = arith.addf %129, %131 : vector<32x64xf32>
    %cst_221 = arith.constant 0.000000e+00 : f32
    %133 = vector.broadcast %cst_221 : f32 to vector<32x64xf32>
    %134 = arith.maximumf %132, %133 : vector<32x64xf32>
    %135 = vector.shape_cast %134 : vector<32x64xf32> to vector<8x4x64xf32>
    %136 = vector.extract_strided_slice %135 {offsets = [0, 0, 0], sizes = [8, 1, 64], strides = [1, 1, 1]} : vector<8x4x64xf32> to vector<8x1x64xf32>
    %137 = vector.shape_cast %136 : vector<8x1x64xf32> to vector<8x64xf32>
    %138 = vector.extract_strided_slice %135 {offsets = [0, 1, 0], sizes = [8, 1, 64], strides = [1, 1, 1]} : vector<8x4x64xf32> to vector<8x1x64xf32>
    %139 = vector.shape_cast %138 : vector<8x1x64xf32> to vector<8x64xf32>
    %140 = vector.extract_strided_slice %135 {offsets = [0, 2, 0], sizes = [8, 1, 64], strides = [1, 1, 1]} : vector<8x4x64xf32> to vector<8x1x64xf32>
    %141 = vector.shape_cast %140 : vector<8x1x64xf32> to vector<8x64xf32>
    %142 = vector.extract_strided_slice %135 {offsets = [0, 3, 0], sizes = [8, 1, 64], strides = [1, 1, 1]} : vector<8x4x64xf32> to vector<8x1x64xf32>
    %143 = vector.shape_cast %142 : vector<8x1x64xf32> to vector<8x64xf32>
    %144 = tpu.concatenate %137, %139, %141, %143 in 1 : vector<8x64xf32>, vector<8x64xf32>, vector<8x64xf32>, vector<8x64xf32> -> vector<8x256xf32>
    %c0_222 = arith.constant 0 : index
    %c0_223 = arith.constant 0 : index
    %145 = vector.load %arg12[%c0_222, %c0_223] : memref<8x256xf32, #tpu.memory_space<vmem>>, vector<8x256xf32>
    tpu.vector_store %arg12[%c0_222, %c0_223], %144 {strides = array<i32>} : memref<8x256xf32, #tpu.memory_space<vmem>>, vector<8x256xf32>,
    return
  }
  func.func @transform_0(%arg0: i32) -> (i32, i32) {
    %c0_i32 = arith.constant 0 : i32
    %c0_i32_0 = arith.constant 0 : i32
    return %arg0, %c0_i32 : i32, i32
  }
  func.func @transform_1(%arg0: i32) -> (i32, i32) {
    %c0_i32 = arith.constant 0 : i32
    %c0_i32_0 = arith.constant 0 : i32
    %c0_i32_1 = arith.constant 0 : i32
    return %c0_i32, %c0_i32_0 : i32, i32
  }
  func.func @transform_2(%arg0: i32) -> (i32, i32) {
    %c0_i32 = arith.constant 0 : i32
    %c0_i32_0 = arith.constant 0 : i32
    %c0_i32_1 = arith.constant 0 : i32
    return %c0_i32, %c0_i32_0 : i32, i32
  }
  func.func @transform_3(%arg0: i32) -> (i32, i32) {
    %c0_i32 = arith.constant 0 : i32
    %c0_i32_0 = arith.constant 0 : i32
    %c0_i32_1 = arith.constant 0 : i32
    return %c0_i32, %c0_i32_0 : i32, i32
  }
  func.func @transform_4(%arg0: i32) -> (i32, i32) {
    %c0_i32 = arith.constant 0 : i32
    %c0_i32_0 = arith.constant 0 : i32
    %c0_i32_1 = arith.constant 0 : i32
    return %c0_i32, %c0_i32_0 : i32, i32
  }
  func.func @transform_5(%arg0: i32) -> (i32, i32) {
    %c0_i32 = arith.constant 0 : i32
    %c0_i32_0 = arith.constant 0 : i32
    %c0_i32_1 = arith.constant 0 : i32
    return %c0_i32, %c0_i32_0 : i32, i32
  }
  func.func @transform_6(%arg0: i32) -> (i32, i32) {
    %c0_i32 = arith.constant 0 : i32
    %c0_i32_0 = arith.constant 0 : i32
    %c0_i32_1 = arith.constant 0 : i32
    return %c0_i32, %c0_i32_0 : i32, i32
  }
  func.func @transform_7(%arg0: i32) -> (i32, i32) {
    %c0_i32 = arith.constant 0 : i32
    %c0_i32_0 = arith.constant 0 : i32
    %c0_i32_1 = arith.constant 0 : i32
    return %c0_i32, %c0_i32_0 : i32, i32
  }
  func.func @transform_8(%arg0: i32) -> (i32, i32) {
    %c0_i32 = arith.constant 0 : i32
    %c0_i32_0 = arith.constant 0 : i32
    %c0_i32_1 = arith.constant 0 : i32
    return %c0_i32, %c0_i32_0 : i32, i32
  }
  func.func @transform_9(%arg0: i32) -> (i32, i32) {
    %c0_i32 = arith.constant 0 : i32
    %c0_i32_0 = arith.constant 0 : i32
    %c0_i32_1 = arith.constant 0 : i32
    return %c0_i32, %c0_i32_0 : i32, i32
  }
  func.func @transform_10(%arg0: i32) -> (i32, i32) {
    %c0_i32 = arith.constant 0 : i32
    %c0_i32_0 = arith.constant 0 : i32
    %c0_i32_1 = arith.constant 0 : i32
    return %c0_i32, %c0_i32_0 : i32, i32
  }
  func.func @transform_11(%arg0: i32) -> (i32, i32) {
    %c0_i32 = arith.constant 0 : i32
    %c0_i32_0 = arith.constant 0 : i32
    return %arg0, %c0_i32 : i32, i32
  }
}

</mosaic_0001>

<bundles_post_ra>
// kernel: tpu_custom_call.1
= control target key start
LH: loop header
LB: loop body
LE: loop exit
PB: predicated region body
PF: predicated region fallthrough
CT: control target
= control target key end

     0   :  { %s6453_s0 = inlined_call_operand.hbm [shape: bf16[256,27], index: 0, kind: input, shape index: {}]   ;;  %s6454_s1 = inlined_call_operand.hbm [shape: bf16[27,32], index: 1, kind: input, shape index: {}]   ;;  %s6455_s2 = inlined_call_operand.hbm [shape: f32[1,32], index: 2, kind: input, shape index: {}]   ;;  %s6456_s3 = inlined_call_operand.hbm [shape: bf16[128,16], index: 3, kind: input, shape index: {}]   ;;  %s6457_s4 = inlined_call_operand.hbm [shape: f32[1,16], index: 4, kind: input, shape index: {}]   ;;  %s6458_s5 = inlined_call_operand.hbm [shape: bf16[64,32], index: 5, kind: input, shape index: {}]   ;;  %s6459_s6 = inlined_call_operand.hbm [shape: f32[1,32], index: 6, kind: input, shape index: {}]   ;;  %s6460_s7 = inlined_call_operand.hbm [shape: bf16[576,32], index: 7, kind: input, shape index: {}]   ;;  %s6461_s8 = inlined_call_operand.hbm [shape: f32[1,32], index: 8, kind: input, shape index: {}]   ;;  %s6462_s9 = inlined_call_operand.hbm [shape: bf16[32,64], index: 9, kind: input, shape index: {}]   ;;  %s6463_s10 = inlined_call_operand.hbm [shape: f32[1,64], index: 10, kind: input, shape index: {}]   ;;  %s6464_s11 = inlined_call_operand.hbm [shape: f32[16,256], index: 11, kind: output, shape index: {}]  }
   0x1   :  { %6473 = sst [smem:[#allocation33_spill]] %s6453_s0 }
   0x2   :  { %6474 = sst [smem:[#allocation34_spill]] %s6454_s1 }
   0x3   :  { %6475 = sst [smem:[#allocation35_spill]] %s6464_s11 }
   0x4   :  { %16 = vsyncpa [#allocation7], 0 }
   0x5   :  { %18 = vsyncpa [#allocation7 + $0x1], 0 }
   0x6   :  { %19 = vsyncpa [#allocation10], 0 }
   0x7   :  { %20 = vsyncpa [#allocation13], 0 }
   0x8   :  { %21 = vsyncpa [#allocation16], 0 }
   0x9   :  { %22 = vsyncpa [#allocation19], 0 }
   0xa   :  { %23 = vsyncpa [#allocation22], 0 }
   0xb   :  { %24 = vsyncpa [#allocation8], 0 }
   0xc   :  { %26 = vsyncpa [#allocation8 + $0x1], 0  ;;  %s5196_s17 = smov 0   ;;  %s5198_s18 = smov 0  }
   0xd   :  { %s5200_s19 = smov 0   ;;  %s5202_s20 = smov 0  }
   0xe LB: > { %s5115_s21 = smov [#allocation9]   ;;  %s5217_s23 = sadd.s32 4294967295, %s5113_s20   ;;  %s5113_s20 = sphi %s5202_s20, %s6509_s20   ;;  %s5109_s19 = sphi %s5200_s19, %s6508_s19   ;;  %s5105_s18 = sphi %s5198_s18, %s6507_s18   ;;  %s5101_s17 = sphi %s5196_s17, %s6506_s17  }
   0xf   : > { %s311_s22 = sshll.u32 %s5115_s21, 4  ;;  %p3811_p0 = scmp.ge.s32.totalorder %s5113_s20, 1  ;;  %s5222_s22 = int_to_ptr.vmem [resolvable:$true] %s311_s22 }
  0x10   : > { %p6468_p1 = scmp.eq.s32.totalorder %s5217_s23, 0  ;;  %p299_p2 = scmp.lt.s32.totalorder %s5113_s20, 3 }
  0x11   : > { %s5116_s25 = smov [#allocation12]   ;;  %s5117_s28 = smov [#allocation15]  }
  0x12   : > { %p5224_p3 = pnand %p3811_p0, %p299_p2  ;;  %s335_s26 = sshll.u32 %s5116_s25, 4  ;;  %s5237_s26 = int_to_ptr.vmem [resolvable:$true] %s335_s26 }
  0x13   : > { %s359_s29 = sshll.u32 %s5117_s28, 4  ;;  %s6479_s1 = sld [smem:[#allocation34_spill]]  ;;  %s5239_s29 = int_to_ptr.vmem [resolvable:$true] %s359_s29 }
  0x14   : > { %s6476_s24 = scalar_select %p5224_p3, 1, 0 }
  0x15   : > { %p4175_p5 = pneg %p5224_p3 }
  0x16   : > { %6477 = sst [smem:[#allocation32_spill]] %s6476_s24 }
  0x17   : > { %p5233_p6 = pnand %p4175_p5, %p6468_p1 }
  0x19   : > { %s4717_s13 = scalar_lea.hbm %s6479_s1, 256  ;;  %p5249_p8 = pneg %p5233_p6 }
  0x1a   : > { %p4718_p7 = scmp.ne.s32.totalorder %s6479_s1, %s4717_s13  ;;  %p4724_p11 = scmp.lt.u32.totalorder %s4717_s13, %s6479_s1 }
  0x1c   : > { %p4720_p9 = pnand %p5249_p8, %p4718_p7 }
  0x1e   : > { %p4721_p10 = pneg %p4720_p9 }
  0x20   : > { %p4726_p12 = pnand %p4724_p11, %p4721_p10 }
  0x22   : > { %4729 = shalt.err (!%p4726_p12)
}
  0x23   : > { %s4730_s28 = scalar_lea.vmem %s5222_s22, 256  ;;  %p4738_p5 = scmp.lt.s32.totalorder %s5222_s22, %s5222_s22 }
  0x24   : > { %p4731_p13 = scmp.ne.s32.totalorder %s5222_s22, %s4730_s28  ;;  %p4739_p4 = scmp.lt.s32.totalorder %s4730_s28, %s4730_s28 }
  0x26   : > { %p4733_p0 = pnand %p4731_p13, %p5249_p8  ;;  %p4740_p7 = por %p4739_p4, %p4738_p5 }
  0x28   : > { %p4734_p2 = pneg %p4733_p0 }
  0x2a   : > { %p4741_p9 = pnand %p4740_p7, %p4734_p2 }
  0x2c   : > { %4744 = shalt.err (!%p4741_p9)
}
  0x2d   : > { %s6470_s30 = smov 64   ;;  %s6471_s12 = smov 4  }
  0x2e   : > { %4178 = dma.hbm_to_vmem [thread:$0]  (!%p5233_p6), %s6479_s1, 256, %s5222_s22, [#allocation10], %s6470_s30, %s6470_s30, %s6471_s12  }
  0x2f   : > { %s4745_s25 = scalar_lea.hbm %s6456_s3, 1024 }
  0x30   : > { %p4746_p4 = scmp.ne.s32.totalorder %s6456_s3, %s4745_s25  ;;  %p4752_p12 = scmp.lt.u32.totalorder %s4745_s25, %s6456_s3 }
  0x32   : > { %p4748_p10 = pnand %p4746_p4, %p5249_p8 }
  0x34   : > { %p4749_p11 = pneg %p4748_p10 }
  0x36   : > { %p4754_p13 = pnand %p4752_p12, %p4749_p11 }
  0x38   : > { %4757 = shalt.err (!%p4754_p13)
}
  0x39   : > { %s4758_s22 = scalar_lea.vmem %s5237_s26, 1024  ;;  %p4766_p7 = scmp.lt.s32.totalorder %s5237_s26, %s5237_s26 }
  0x3a   : > { %p4759_p0 = scmp.ne.s32.totalorder %s5237_s26, %s4758_s22  ;;  %p4767_p9 = scmp.lt.s32.totalorder %s4758_s22, %s4758_s22 }
  0x3c   : > { %p4761_p2 = pnand %p4759_p0, %p5249_p8  ;;  %p4768_p4 = por %p4767_p9, %p4766_p7 }
  0x3e   : > { %p4762_p5 = pneg %p4761_p2 }
  0x40   : > { %p4769_p10 = pnand %p4768_p4, %p4762_p5 }
  0x42   : > { %4772 = shalt.err (!%p4769_p10)
}
  0x43   : > { %4184 = dma.hbm_to_vmem [thread:$0]  (!%p5233_p6), %s6456_s3, 1024, %s5237_s26, [#allocation13], %s6470_s30, %s6470_s30, %s6471_s12  }
  0x44   : > { %s4773_s14 = scalar_lea.hbm %s6458_s5, 512 }
  0x45   : > { %p4774_p11 = scmp.ne.s32.totalorder %s6458_s5, %s4773_s14  ;;  %p4780_p0 = scmp.lt.u32.totalorder %s4773_s14, %s6458_s5 }
  0x47   : > { %p4776_p12 = pnand %p4774_p11, %p5249_p8 }
  0x49   : > { %p4777_p13 = pneg %p4776_p12 }
  0x4b   : > { %p4782_p2 = pnand %p4780_p0, %p4777_p13 }
  0x4d   : > { %4785 = shalt.err (!%p4782_p2)
}
  0x4e   : > { %s4786_s26 = scalar_lea.vmem %s5239_s29, 512  ;;  %p4794_p4 = scmp.lt.s32.totalorder %s5239_s29, %s5239_s29 }
  0x4f   : > { %p4787_p5 = scmp.ne.s32.totalorder %s5239_s29, %s4786_s26  ;;  %p4795_p10 = scmp.lt.s32.totalorder %s4786_s26, %s4786_s26 }
  0x51   : > { %p4789_p7 = pnand %p4787_p5, %p5249_p8  ;;  %p4796_p11 = por %p4795_p10, %p4794_p4 }
  0x53   : > { %p4790_p9 = pneg %p4789_p7 }
  0x55   : > { %p4797_p12 = pnand %p4796_p11, %p4790_p9 }
  0x57   : > { %4800 = shalt.err (!%p4797_p12)
}
  0x58   : > { %4190 = dma.hbm_to_vmem [thread:$0]  (!%p5233_p6), %s6458_s5, 512, %s5239_s29, [#allocation16], %s6470_s30, %s6470_s30, %s6471_s12  }
  0x59   : > { %s5120_s11 = smov [#allocation18]   ;;  %s5121_s13 = smov [#allocation21]  }
  0x5a   : > { %s383_s24 = sshll.u32 %s5120_s11, 4  ;;  %s407_s14 = sshll.u32 %s5121_s13, 4  ;;  %s384_s24 = int_to_ptr.vmem [resolvable:$true] %s383_s24  ;;  %s408_s14 = int_to_ptr.vmem [resolvable:$true] %s407_s14 }
  0x5b   : > { %s4801_s25 = scalar_lea.hbm %s6460_s7, 4608 }
  0x5c   : > { %p4802_p13 = scmp.ne.s32.totalorder %s6460_s7, %s4801_s25  ;;  %p4808_p5 = scmp.lt.u32.totalorder %s4801_s25, %s6460_s7 }
  0x5e   : > { %p4804_p0 = pnand %p4802_p13, %p5249_p8 }
  0x60   : > { %p4805_p2 = pneg %p4804_p0 }
  0x62   : > { %p4810_p7 = pnand %p4808_p5, %p4805_p2 }
  0x64   : > { %4813 = shalt.err (!%p4810_p7)
}
  0x65   : > { %s4814_s29 = scalar_lea.vmem %s384_s24, 4608  ;;  %p4822_p11 = scmp.lt.s32.totalorder %s384_s24, %s384_s24 }
  0x66   : > { %p4815_p9 = scmp.ne.s32.totalorder %s384_s24, %s4814_s29  ;;  %p4823_p12 = scmp.lt.s32.totalorder %s4814_s29, %s4814_s29 }
  0x68   : > { %p4817_p4 = pnand %p4815_p9, %p5249_p8  ;;  %p4824_p1 = por %p4823_p12, %p4822_p11 }
  0x6a   : > { %p4818_p10 = pneg %p4817_p4 }
  0x6c   : > { %p4825_p3 = pnand %p4824_p1, %p4818_p10 }
  0x6e   : > { %4828 = shalt.err (!%p4825_p3)
}
  0x6f   : > { %4196 = dma.hbm_to_vmem [thread:$0]  (!%p5233_p6), %s6460_s7, 4608, %s384_s24, [#allocation19], %s6470_s30, %s6470_s30, %s6471_s12  }
  0x70   : > { %s4829_s15 = scalar_lea.hbm %s6462_s9, 256 }
  0x71   : > { %p4830_p1 = scmp.ne.s32.totalorder %s6462_s9, %s4829_s15  ;;  %p4836_p0 = scmp.lt.u32.totalorder %s4829_s15, %s6462_s9 }
  0x73   : > { %p4832_p3 = pnand %p4830_p1, %p5249_p8 }
  0x75   : > { %p4833_p13 = pneg %p4832_p3 }
  0x77   : > { %p4838_p2 = pnand %p4836_p0, %p4833_p13 }
  0x79   : > { %4841 = shalt.err (!%p4838_p2)
}
  0x7a   : > { %s4842_s22 = scalar_lea.vmem %s408_s14, 256  ;;  %p4850_p4 = scmp.lt.s32.totalorder %s408_s14, %s408_s14 }
  0x7b   : > { %p4843_p5 = scmp.ne.s32.totalorder %s408_s14, %s4842_s22  ;;  %p4851_p10 = scmp.lt.s32.totalorder %s4842_s22, %s4842_s22 }
  0x7d   : > { %p4845_p7 = pnand %p4843_p5, %p5249_p8  ;;  %p4852_p11 = por %p4851_p10, %p4850_p4 }
  0x7f   : > { %p4846_p9 = pneg %p4845_p7 }
  0x81   : > { %p4853_p12 = pnand %p4852_p11, %p4846_p9 }
  0x83   : > { %4856 = shalt.err (!%p4853_p12)
}
  0x84   : > { %4202 = dma.hbm_to_vmem [thread:$0]  (!%p5233_p6), %s6462_s9, 256, %s408_s14, [#allocation22], %s6470_s30, %s6470_s30, %s6471_s12  }
  0x85   : > { %s5122_s1 = smov [#allocation11]   ;;  %s5123_s11 = smov [#allocation14]  }
  0x86   : > { %s325_s0 = sshll.u32 %s5122_s1, 4  ;;  %s349_s13 = sshll.u32 %s5123_s11, 4  ;;  %s326_s0 = int_to_ptr.vmem [resolvable:$true] %s325_s0  ;;  %s350_s13 = int_to_ptr.vmem [resolvable:$true] %s349_s13 }
  0x87   : > { %s4857_s25 = scalar_lea.hbm %s6455_s2, 16 }
  0x88   : > { %p4858_p1 = scmp.ne.s32.totalorder %s6455_s2, %s4857_s25  ;;  %p4864_p0 = scmp.lt.u32.totalorder %s4857_s25, %s6455_s2 }
  0x8a   : > { %p4860_p3 = pnand %p4858_p1, %p5249_p8 }
  0x8c   : > { %p4861_p13 = pneg %p4860_p3 }
  0x8e   : > { %p4866_p2 = pnand %p4864_p0, %p4861_p13 }
  0x90   : > { %4869 = shalt.err (!%p4866_p2)
}
  0x91   : > { %s4870_s14 = scalar_lea.vmem %s326_s0, 16  ;;  %s4877_s29 = scalar_lea.vmem %s326_s0, 32 }
  0x92   : > { %p4871_p5 = scmp.ne.s32.totalorder %s326_s0, %s4870_s14  ;;  %p4878_p4 = scmp.lt.s32.totalorder %s326_s0, %s326_s0 }
  0x93   : > { %p4879_p10 = scmp.lt.s32.totalorder %s4877_s29, %s4870_s14 }
  0x94   : > { %p4873_p7 = pnand %p4871_p5, %p5249_p8 }
  0x95   : > { %p4880_p11 = por %p4879_p10, %p4878_p4 }
  0x96   : > { %p4874_p9 = pneg %p4873_p7 }
  0x98   : > { %p4881_p12 = pnand %p4880_p11, %p4874_p9 }
  0x9a   : > { %4884 = shalt.err (!%p4881_p12)
}
  0x9b   : > { %4181 = dma.hbm_to_vmem [thread:$0]  (!%p5233_p6), %s6455_s2, 16, %s326_s0, [#allocation10]  }
  0x9c   : > { %s4885_s25 = scalar_lea.hbm %s6457_s4, 16 }
  0x9d   : > { %p4886_p1 = scmp.ne.s32.totalorder %s6457_s4, %s4885_s25  ;;  %p4892_p0 = scmp.lt.u32.totalorder %s4885_s25, %s6457_s4 }
  0x9f   : > { %p4888_p3 = pnand %p4886_p1, %p5249_p8 }
  0xa1   : > { %p4889_p13 = pneg %p4888_p3 }
  0xa3   : > { %p4894_p2 = pnand %p4892_p0, %p4889_p13 }
  0xa5   : > { %4897 = shalt.err (!%p4894_p2)
}
  0xa6   : > { %s4898_s14 = scalar_lea.vmem %s350_s13, 16  ;;  %s4905_s0 = scalar_lea.vmem %s350_s13, 32 }
  0xa7   : > { %p4899_p5 = scmp.ne.s32.totalorder %s350_s13, %s4898_s14  ;;  %p4906_p4 = scmp.lt.s32.totalorder %s350_s13, %s350_s13 }
  0xa8   : > { %p4907_p10 = scmp.lt.s32.totalorder %s4905_s0, %s4898_s14 }
  0xa9   : > { %p4901_p7 = pnand %p4899_p5, %p5249_p8 }
  0xaa   : > { %p4908_p11 = por %p4907_p10, %p4906_p4 }
  0xab   : > { %p4902_p9 = pneg %p4901_p7 }
  0xad   : > { %p4909_p12 = pnand %p4908_p11, %p4902_p9 }
  0xaf   : > { %4912 = shalt.err (!%p4909_p12)
}
  0xb0   : > { %4187 = dma.hbm_to_vmem [thread:$0]  (!%p5233_p6), %s6457_s4, 16, %s350_s13, [#allocation13]  }
  0xb1   : > { %s5124_s11 = smov [#allocation17]   ;;  %s5125_s21 = smov [#allocation20]  }
  0xb2   : > { %s373_s15 = sshll.u32 %s5124_s11, 4  ;;  %s397_s25 = sshll.u32 %s5125_s21, 4  ;;  %s374_s15 = int_to_ptr.vmem [resolvable:$true] %s373_s15  ;;  %s398_s25 = int_to_ptr.vmem [resolvable:$true] %s397_s25 }
  0xb3   : > { %s4913_s22 = scalar_lea.hbm %s6459_s6, 16 }
  0xb4   : > { %p4914_p1 = scmp.ne.s32.totalorder %s6459_s6, %s4913_s22  ;;  %p4920_p0 = scmp.lt.u32.totalorder %s4913_s22, %s6459_s6 }
  0xb6   : > { %p4916_p3 = pnand %p4914_p1, %p5249_p8 }
  0xb8   : > { %p4917_p13 = pneg %p4916_p3 }
  0xba   : > { %p4922_p2 = pnand %p4920_p0, %p4917_p13 }
  0xbc   : > { %4925 = shalt.err (!%p4922_p2)
}
  0xbd   : > { %s4926_s13 = scalar_lea.vmem %s374_s15, 16  ;;  %s4933_s1 = scalar_lea.vmem %s374_s15, 32 }
  0xbe   : > { %p4927_p5 = scmp.ne.s32.totalorder %s374_s15, %s4926_s13  ;;  %p4934_p4 = scmp.lt.s32.totalorder %s374_s15, %s374_s15 }
  0xbf   : > { %p4935_p10 = scmp.lt.s32.totalorder %s4933_s1, %s4926_s13 }
  0xc0   : > { %p4929_p7 = pnand %p4927_p5, %p5249_p8 }
  0xc1   : > { %p4936_p11 = por %p4935_p10, %p4934_p4 }
  0xc2   : > { %p4930_p9 = pneg %p4929_p7 }
  0xc4   : > { %p4937_p12 = pnand %p4936_p11, %p4930_p9 }
  0xc6   : > { %4940 = shalt.err (!%p4937_p12)
}
  0xc7   : > { %4193 = dma.hbm_to_vmem [thread:$0]  (!%p5233_p6), %s6459_s6, 16, %s374_s15, [#allocation16]  }
  0xc8   : > { %s4941_s22 = scalar_lea.hbm %s6461_s8, 16 }
  0xc9   : > { %p4942_p1 = scmp.ne.s32.totalorder %s6461_s8, %s4941_s22  ;;  %p4948_p0 = scmp.lt.u32.totalorder %s4941_s22, %s6461_s8 }
  0xcb   : > { %p4944_p3 = pnand %p4942_p1, %p5249_p8 }
  0xcd   : > { %p4945_p13 = pneg %p4944_p3 }
  0xcf   : > { %p4950_p2 = pnand %p4948_p0, %p4945_p13 }
  0xd1   : > { %4953 = shalt.err (!%p4950_p2)
}
  0xd2   : > { %s4954_s13 = scalar_lea.vmem %s398_s25, 16  ;;  %s4961_s15 = scalar_lea.vmem %s398_s25, 32 }
  0xd3   : > { %p4955_p5 = scmp.ne.s32.totalorder %s398_s25, %s4954_s13  ;;  %p4962_p4 = scmp.lt.s32.totalorder %s398_s25, %s398_s25 }
  0xd4   : > { %p4963_p10 = scmp.lt.s32.totalorder %s4961_s15, %s4954_s13 }
  0xd5   : > { %p4957_p7 = pnand %p4955_p5, %p5249_p8 }
  0xd6   : > { %p4964_p11 = por %p4963_p10, %p4962_p4 }
  0xd7   : > { %p4958_p9 = pneg %p4957_p7 }
  0xd9   : > { %p4965_p12 = pnand %p4964_p11, %p4958_p9 }
  0xdb   : > { %4968 = shalt.err (!%p4965_p12)
}
  0xdc   : > { %4199 = dma.hbm_to_vmem [thread:$0]  (!%p5233_p6), %s6461_s8, 16, %s398_s25, [#allocation19]  }
  0xdd   : > { %s5126_s21 = smov [#allocation23]   ;;  %s4969_s24 = scalar_lea.hbm %s6463_s10, 16 }
  0xde   : > { %s421_s28 = sshll.u32 %s5126_s21, 4  ;;  %p4970_p1 = scmp.ne.s32.totalorder %s6463_s10, %s4969_s24  ;;  %s422_s28 = int_to_ptr.vmem [resolvable:$true] %s421_s28 }
  0xdf   : > { %p4976_p0 = scmp.lt.u32.totalorder %s4969_s24, %s6463_s10 }
  0xe0   : > { %p4972_p3 = pnand %p4970_p1, %p5249_p8 }
  0xe2   : > { %p4973_p13 = pneg %p4972_p3 }
  0xe4   : > { %p4978_p2 = pnand %p4976_p0, %p4973_p13 }
  0xe6   : > { %4981 = shalt.err (!%p4978_p2)
}
  0xe7   : > { %s4982_s25 = scalar_lea.vmem %s422_s28, 16  ;;  %s4989_s15 = scalar_lea.vmem %s422_s28, 32 }
  0xe8   : > { %p4983_p5 = scmp.ne.s32.totalorder %s422_s28, %s4982_s25  ;;  %p4990_p4 = scmp.lt.s32.totalorder %s422_s28, %s422_s28 }
  0xe9   : > { %p4991_p10 = scmp.lt.s32.totalorder %s4989_s15, %s4982_s25 }
  0xea   : > { %p4985_p7 = pnand %p4983_p5, %p5249_p8 }
  0xeb   : > { %p4992_p11 = por %p4991_p10, %p4990_p4 }
  0xec   : > { %p4986_p9 = pneg %p4985_p7 }
  0xee   : > { %p4993_p12 = pnand %p4992_p11, %p4986_p9 }
  0xf0   : > { %4996 = shalt.err (!%p4993_p12)
}
  0xf1   : > { %4205 = dma.hbm_to_vmem [thread:$0]  (!%p5233_p6), %s6463_s10, 16, %s422_s28, [#allocation22]  }
  0xf2   : > { %s3810_s16 = sadd.s32 4294967294, %s5113_s20   ;;  %s5459_s27 = sadd.s32 1, %s5113_s20  }
  0xf3   : > { %s36_s21 = ssub.s32 %s5113_s20, %s5459_s27  ;;  %s39_s26 = sadd.s32 1, %s5109_s19 }
  0xf4   : > { %p37_p8 = scmp.eq.s32.totalorder %s36_s21, 0  ;;  %p46_p1 = scmp.ne.s32.totalorder %s5109_s19, %s5105_s18 }
  0xf5   : > { %p47_p3 = scmp.eq.s32.totalorder %s5113_s20, 0  ;;  %p52_p13 = scmp.ne.s32.totalorder %s5105_s18, %s5101_s17 }
  0xf6   : > { %s5470_s22 = scalar_select %p37_p8, %s5109_s19, %s39_s26  }
  0xf7   : > { %p5472_p0 = por %p47_p3, %p46_p1  ;;  %p6482_p2 = scmp.eq.s32.totalorder %s5217_s23, 0 }
  0xf8   : > { %p286_p5 = scmp.eq.s32.totalorder %s5217_s23, 1  ;;  %p292_p7 = scmp.eq.s32.totalorder %s3810_s16, 1 }
  0xf9   : > { %p5478_p6 = por %p6482_p2, %p52_p13  ;;  %p4224_p9 = scmp.lt.s32.totalorder %s5113_s20, 2 }
  0xfa   : > { %s432_s14 = sand.u32 1, %s5109_s19   ;;  %p5485_p4 = por %p286_p5, %p46_p1 }
  0xfb   : > { %p5489_p10 = por %p292_p7, %p52_p13  ;;  %s3823_s13 = sshll.u32 %s432_s14, 6 }
  0xfc   : > { %s6484_s0 = scalar_select %p5485_p4, 1, 0 }
  0xfd   : > { %s6485_s29 = scalar_select %p5489_p10, 1, 0 }
  0xfe   : > { %s3929_s25 = sshll.u32 %s5113_s20, 10  ;;  %s6486_s11 = sld [smem:[#allocation33_spill]] }
  0xff   : > { %s436_s16 = scalar_lea.vmem [#allocation6], %s3823_s13  ;;  %p5503_p11 = pnand %p4224_p9, %p5472_p0 }
 0x100   : > { %s443_s26 = sshll.u32 %s436_s16, 4  ;;  %s5507_s12 = scalar_lea.sflag [#allocation7], %s432_s14  ;;  %s5499_s26 = int_to_ptr.vmem [resolvable:$true] %s443_s26 }
 0x101   : > { %p4999_p8 = pneg %p5503_p11 }
 0x104   : > { %s5497_s21 = scalar_lea.hbm %s6486_s11, %s3929_s25  ;;  %s5002_s24 = scalar_lea.hbm %s6486_s11, 2048 }
 0x105   : > { %s4997_s15 = scalar_lea.hbm %s5497_s21, 1024  ;;  %p5003_p13 = scmp.lt.u32.totalorder %s5497_s21, %s6486_s11 }
 0x106   : > { %p4998_p12 = scmp.ne.s32.totalorder %s5497_s21, %s4997_s15  ;;  %p5004_p0 = scmp.lt.u32.totalorder %s5002_s24, %s4997_s15 }
 0x107   : > { %p5006_p5 = scmp.lt.u32.totalorder %s4997_s15, %s5497_s21 }
 0x108   : > { %p5000_p1 = pnand %p4999_p8, %p4998_p12  ;;  %p5005_p2 = por %p5004_p0, %p5003_p13 }
 0x10a   : > { %p5001_p3 = pneg %p5000_p1  ;;  %p5007_p7 = por %p5006_p5, %p5005_p2 }
 0x10c   : > { %p5008_p9 = pnand %p5007_p7, %p5001_p3 }
 0x10e   : > { %5011 = shalt.err (!%p5008_p9)
}
 0x10f   : > { %s5012_s14 = scalar_lea.vmem %s5499_s26, 1024  ;;  %s5127_s13 = smov [#allocation6]  }
 0x110   : > { %p5013_p12 = scmp.ne.s32.totalorder %s5499_s26, %s5012_s14  ;;  %s5017_s25 = sshll.u32 %s5127_s13, 4  ;;  %s5018_s25 = int_to_ptr.vmem [resolvable:$false] %s5017_s25 }
 0x111   : > { %s5019_s1 = scalar_lea.vmem %s5018_s25, 2048  ;;  %p5020_p4 = scmp.lt.s32.totalorder %s5499_s26, %s5018_s25 }
 0x112   : > { %p5015_p1 = pnand %p5013_p12, %p4999_p8  ;;  %p5021_p13 = scmp.lt.s32.totalorder %s5019_s1, %s5012_s14 }
 0x114   : > { %p5016_p10 = pneg %p5015_p1  ;;  %p5022_p0 = por %p5021_p13, %p5020_p4 }
 0x116   : > { %p5023_p2 = pnand %p5022_p0, %p5016_p10 }
 0x118   : > { %5026 = shalt.err (!%p5023_p2)
}
 0x119   : > { %s6488_s15 = smov 4   ;;  %s6489_s24 = smov 64  }
 0x11a   : > { %4209 = dma.hbm_to_vmem [thread:$0]  (!%p5503_p11), %s5497_s21, 1024, %s5499_s26, %s5507_s12, %s6489_s24, %s6489_s24, %s6488_s15  }
 0x11b   : > { %s6490_s16 = sld [smem:[#allocation32_spill]] }
 0x121   : > { %p6491_p8 = scmp.ne.s32.totalorder %s6490_s16, 0 }
 0x122   : > { %s5541_s13 = sand.u32 (!%p6491_p8), 1, %s5105_s18  }
 0x123   : > { %455 = sbr.rel (%p6491_p8) target bundleno = 2032 (0x7f0), region = 64  ;;  %s3827_s14 = sshll.u32 (!%p6491_p8), %s5541_s13, 6 }
 0x124   : > { %s458_s25 = scalar_lea.sflag (!%p6491_p8), [#allocation7], %s5541_s13  ;;  %s5545_s1 = scalar_lea.vmem (!%p6491_p8), [#allocation6], %s3827_s14 }
 0x12a   : > { %5072 = dma.done.wait (%p5478_p6), %s458_s25, 1024  }
 0x12b   : > { %5074 = vsyncadd (%p5478_p6), %s458_s25, 4294966272  ;;  %p6492_p4 = scmp.eq.s32.totalorder %s5217_s23, 0 }
 0x12d   : > { %5076 = dma.done.wait (%p6492_p4), [#allocation10], 272   ;;  %p6493_p10 = pmov %p6492_p4 }
 0x12e   : > { %p6494_p11 = pmov %p6492_p4 }
 0x12f   : > { %5078 = vsyncadd (%p6493_p10), [#allocation10], 4294967024 }
 0x130   : > { %5080 = dma.done.wait (%p6494_p11), [#allocation13], 1040   ;;  %p6495_p3 = pmov %p6492_p4 }
 0x132   : > { %5082 = vsyncadd (%p6495_p3), [#allocation13], 4294966256  ;;  %p6496_p5 = pmov %p6495_p3 }
 0x133   : > { %p6497_p7 = pmov %p6495_p3 }
 0x134   : > { %5084 = dma.done.wait (%p6496_p5), [#allocation16], 528  }
 0x135   : > { %5086 = vsyncadd (%p6497_p7), [#allocation16], 4294966768  ;;  %p6498_p6 = pmov %p6495_p3 }
 0x136   : > { %p6499_p9 = pmov %p6495_p3 }
 0x137   : > { %5088 = dma.done.wait (%p6498_p6), [#allocation19], 4624  }
 0x138   : > { %5090 = vsyncadd (%p6499_p9), [#allocation19], 4294962672  ;;  %p6500_p12 = pmov %p6495_p3 }
 0x139   : > { %p6501_p1 = pmov %p6495_p3 }
 0x13a   : > { %5092 = dma.done.wait (%p6500_p12), [#allocation22], 272  }
 0x13b   : > { %5094 = vsyncadd (%p6501_p1), [#allocation22], 4294967024  ;;  %vm543_vm0 = vcmask 261120   ;;  %vm545_vm1 = vcmask 253952   ;;  %v5128_v0 = vmov 0.0   ;;  %vm794_vm2 = vcmask 1044480  }
 0x13c   : > { %544 = vst.msk [vmem:[#allocation2 + $0x80] sm:$0xff] %vm543_vm0, %v5128_v0  ;;  %547 = vst.msk [vmem:[#allocation2 + $0x110] sm:$0xff] %vm543_vm0, %v5128_v0  ;;  %vm795_vm3 = vcmask 1045504   ;;  %v5129_v1 = vmov 65535   ;;  %vm769_vm4 = vcmask 220160   ;;  %v4657_v3 = vld [vmem:[#allocation9] sm:$0xff]  }
 0x13d   : > { %546 = vst.msk [vmem:[#allocation2 + $0x88] sm:$0x1] %vm545_vm1, %v5128_v0  ;;  %548 = vst.msk [vmem:[#allocation2 + $0x118] sm:$0x1] %vm545_vm1, %v5128_v0  ;;  %v796_v2 = vsel %vm794_vm2, 4294967295, %v5129_v1  ;;  %4035 = vmatprep.subr.bf16.mxu0 %v4657_v3  ;;  %v4659_v6 = vld [vmem:[%s5545_s1] sm:$0xff]  }
 0x13e   : > { %549 = vst.msk [vmem:[#allocation2 + $0x8] sm:$0x1] %vm545_vm1, %v5128_v0  ;;  %550 = vst.msk [vmem:[#allocation2 + $0x18] sm:$0x1] %vm545_vm1, %v5128_v0  ;;  %v797_v4 = vsel %vm795_vm3, %v796_v2, 0  ;;  %4036 = vmatpush3.bf16.msra.mxu0 %v4657_v3  ;;  %4039 = vmatprep.mubr.msk.bf16.mxu0 %vm769_vm4, %v4659_v6  ;;  %v4660_v8 = vld [vmem:[%s5545_s1 + $0x8] sm:$0xff]  }
 0x13f   : > { %551 = vst.msk [vmem:[#allocation2 + $0x28] sm:$0x1] %vm545_vm1, %v5128_v0  ;;  %552 = vst.msk [vmem:[#allocation2 + $0x38] sm:$0x1] %vm545_vm1, %v5128_v0  ;;  %v4658_v5 = vld [vmem:[#allocation9 + $0x8] sm:$0x3f]  }
 0x140   : > { %553 = vst.msk [vmem:[#allocation2 + $0x48] sm:$0x1] %vm545_vm1, %v5128_v0  ;;  %554 = vst.msk [vmem:[#allocation2 + $0x58] sm:$0x1] %vm545_vm1, %v5128_v0  ;;  %v799_v7 = vand.u32 %v4658_v5, %v797_v4  ;;  %v4661_v9 = vld [vmem:[%s5545_s1 + $0x10] sm:$0xff]   ;;  %v4662_v10 = vld [vmem:[%s5545_s1 + $0x18] sm:$0xff]  }
 0x141   : > { %555 = vst.msk [vmem:[#allocation2 + $0x68] sm:$0x1] %vm545_vm1, %v5128_v0  ;;  %556 = vst.msk [vmem:[#allocation2 + $0x78] sm:$0x1] %vm545_vm1, %v5128_v0  ;;  %v4663_v11 = vld [vmem:[%s5545_s1 + $0x20] sm:$0xff]   ;;  %v4664_v12 = vld [vmem:[%s5545_s1 + $0x28] sm:$0xff]  }
 0x142   : > { %558 = vst.msk [vmem:[#allocation2 + $0x98] sm:$0x1] %vm545_vm1, %v5128_v0  ;;  %559 = vst.msk [vmem:[#allocation2 + $0xa8] sm:$0x1] %vm545_vm1, %v5128_v0  ;;  %4037 = vmatprep.subr.bf16.mxu0 %v799_v7  ;;  %v4665_v13 = vld [vmem:[%s5545_s1 + $0x30] sm:$0xff]   ;;  %v4666_v14 = vld [vmem:[%s5545_s1 + $0x38] sm:$0xff]  }
 0x143   : > { %560 = vst.msk [vmem:[#allocation2 + $0xb8] sm:$0x1] %vm545_vm1, %v5128_v0  ;;  %561 = vst.msk [vmem:[#allocation2 + $0xc8] sm:$0x1] %vm545_vm1, %v5128_v0  ;;  %4038 = vmatpush3.bf16.msra.mxu0 %v799_v7  ;;  %vm593_vm5 = vcmask 254976   ;;  %v4667_v15 = vld [vmem:[#allocation12] sm:$0xff]  }
 0x144   : > { %562 = vst.msk [vmem:[#allocation2 + $0xd8] sm:$0x1] %vm545_vm1, %v5128_v0  ;;  %563 = vst.msk [vmem:[#allocation2 + $0xe8] sm:$0x1] %vm545_vm1, %v5128_v0  ;;  %v4668_v16 = vld [vmem:[#allocation12 + $0x8] sm:$0xff]   ;;  %4055 = vmatprep.subr.bf16.mxu1 %v4667_v15  ;;  %v4669_v17 = vld [vmem:[#allocation12 + $0x10] sm:$0xff]  }
 0x145   : > { %564 = vst.msk [vmem:[#allocation2 + $0xf8] sm:$0x1] %vm545_vm1, %v5128_v0  ;;  %565 = vst.msk [vmem:[#allocation2 + $0x108] sm:$0x1] %vm545_vm1, %v5128_v0  ;;  %4056 = vmatpush3.bf16.msra.mxu1 %v4667_v15  ;;  %v4670_v18 = vld [vmem:[#allocation12 + $0x18] sm:$0xff]   ;;  %v4671_v25 = vld [vmem:[#allocation12 + $0x20] sm:$0xff]  }
 0x146   : > { %592 = vst.msk [vmem:[#allocation4] sm:$0xff] %vm543_vm0, %v5128_v0  ;;  %595 = vst.msk [vmem:[#allocation4 + $0xa0] sm:$0xff] %vm543_vm0, %v5128_v0  ;;  %4040 = vmatmul.mubr.msk.bf16.vlgmr.msra.gmra.mrb[0].mxu0 %vm769_vm4, %v4660_v8  ;;  %4057 = vmatprep.subr.bf16.mxu1 %v4668_v16  ;;  %v5715_v19 = vld [vmem:[#allocation11] ss:$0 sm:$0xff]  ;;  %v4672_v33 = vld [vmem:[#allocation12 + $0x28] sm:$0xff]   ;;  %s5130_s30 = smov 32  }
 0x147   : > { %603 = vst.msk [vmem:[#allocation4 + $0x10] sm:$0x1] %vm545_vm1, %v5128_v0  ;;  %604 = vst.msk [vmem:[#allocation4 + $0x20] sm:$0x1] %vm545_vm1, %v5128_v0  ;;  %4043 = vmatprep.mubr.msk.bf16.mxu0 %vm769_vm4, %v4661_v9  ;;  %v4673_v39 = vld [vmem:[#allocation12 + $0x30] sm:$0xff]   ;;  %v4674_v54 = vld [vmem:[#allocation12 + $0x38] sm:$0xff]  }
 0x148   : > { %605 = vst.msk [vmem:[#allocation4 + $0x30] sm:$0x1] %vm545_vm1, %v5128_v0  ;;  %606 = vst.msk [vmem:[#allocation4 + $0x40] sm:$0x1] %vm545_vm1, %v5128_v0  ;;  %s5131_s12 = smov 64   ;;  %v5758_v9 = vld [vmem:[#allocation2 + $0x80] sm:$0xff] }
 0x149   : > { %607 = vst.msk [vmem:[#allocation4 + $0x50] sm:$0x1] %vm545_vm1, %v5128_v0  ;;  %608 = vst.msk [vmem:[#allocation4 + $0x60] sm:$0x1] %vm545_vm1, %v5128_v0  ;;  %4058 = vmatpush3.bf16.msra.mxu1 %v4668_v16  ;;  %s5132_s28 = smov 96   ;;  %vm568_vm6 = vcmask 130048  }
 0x14a   : > { %609 = vst.msk [vmem:[#allocation4 + $0x70] sm:$0x1] %vm545_vm1, %v5128_v0  ;;  %610 = vst.msk [vmem:[#allocation4 + $0x80] sm:$0x1] %vm545_vm1, %v5128_v0  ;;  %4059 = vmatprep.subr.bf16.mxu1 %v4669_v17  ;;  %vm1203_vm7 = vcmask 523264   ;;  %vm1220_vm8 = vcmask 785408  }
 0x14b   : > { %613 = vst.msk [vmem:[#allocation4 + $0xb0] sm:$0x1] %vm545_vm1, %v5128_v0  ;;  %614 = vst.msk [vmem:[#allocation4 + $0xc0] sm:$0x1] %vm545_vm1, %v5128_v0  ;;  %vm570_vm9 = vcmask 122880   ;;  %s5133_s21 = smov 16  }
 0x14c   : > { %615 = vst.msk [vmem:[#allocation4 + $0xd0] sm:$0x1] %vm545_vm1, %v5128_v0  ;;  %616 = vst.msk [vmem:[#allocation4 + $0xe0] sm:$0x1] %vm545_vm1, %v5128_v0  ;;  %s5134_s26 = smov 48   ;;  %vm1734_vm10 = vcmask 392192  }
 0x14d   : > { %617 = vst.msk [vmem:[#allocation4 + $0xf0] sm:$0x1] %vm545_vm1, %v5128_v0  ;;  %618 = vst.msk [vmem:[#allocation4 + $0x100] sm:$0x1] %vm545_vm1, %v5128_v0  ;;  %4060 = vmatpush3.bf16.msra.mxu1 %v4669_v17  ;;  %vm3395_vm11 = vcmask 1041409   ;;  %vm3397_vm12 = vcmask 1042434  }
 0x14e   : > { %619 = vst.msk [vmem:[#allocation4 + $0x110] sm:$0x1] %vm545_vm1, %v5128_v0  ;;  %620 = vst.msk [vmem:[#allocation4 + $0x120] sm:$0x1] %vm545_vm1, %v5128_v0  ;;  %4044 = vmatmul.mubr.msk.bf16.gmra.mrb[4].mxu0 %vm769_vm4, %v4662_v10  ;;  %4061 = vmatprep.subr.bf16.mxu1 %v4670_v18  ;;  %vm3399_vm13 = vcmask 1043459   ;;  %vm3401_vm14 = vcmask 1044484  }
 0x14f   : > { %642 = vst.msk [vmem:[#allocation5] sm:$0xff] %vm543_vm0, %v5128_v0  ;;  %644 = vst.msk [vmem:[#allocation5 + $0xa0] sm:$0xff] %vm543_vm0, %v5128_v0  ;;  %4047 = vmatprep.mubr.msk.bf16.mxu0 %vm769_vm4, %v4663_v11  ;;  %vm3403_vm15 = vcmask 1045509   ;;  %s3838_s15 = sshll.u32 %s5541_s13, 4  ;;  %s3930_s14 = sshll.u32 %s5217_s23, 8 }
 0x150   : > { %652 = vst.msk [vmem:[#allocation5 + $0x10] sm:$0x1] %vm545_vm1, %v5128_v0  ;;  %653 = vst.msk [vmem:[#allocation5 + $0x20] sm:$0x1] %vm545_vm1, %v5128_v0  ;;  %s539_s24 = scalar_lea.vmem [#allocation24], %s3838_s15  ;;  %p6503_p0 = scmp.ne.s32.totalorder %s6484_s0, 0 }
 0x151   : > { %654 = vst.msk [vmem:[#allocation5 + $0x30] sm:$0x1] %vm545_vm1, %v5128_v0  ;;  %655 = vst.msk [vmem:[#allocation5 + $0x40] sm:$0x1] %vm545_vm1, %v5128_v0  ;;  %4062 = vmatpush3.bf16.msra.mxu1 %v4670_v18  ;;  %s3553_s16 = sshll.u32 %s539_s24, 4  ;;  %s6410_s16 = int_to_ptr.vmem [resolvable:$true] %s3553_s16 }
 0x152   : > { %656 = vst.msk [vmem:[#allocation5 + $0x50] sm:$0x1] %vm545_vm1, %v5128_v0  ;;  %657 = vst.msk [vmem:[#allocation5 + $0x60] sm:$0x1] %vm545_vm1, %v5128_v0  ;;  %4063 = vmatprep.subr.bf16.mxu1 %v4671_v25  ;;  %s5027_s23 = scalar_lea.vmem %s6410_s16, 256 }
 0x153   : > { %658 = vst.msk [vmem:[#allocation5 + $0x70] sm:$0x1] %vm545_vm1, %v5128_v0  ;;  %659 = vst.msk [vmem:[#allocation5 + $0x80] sm:$0x1] %vm545_vm1, %v5128_v0  ;;  %p5028_p13 = scmp.ne.s32.totalorder %s6410_s16, %s5027_s23 }
 0x154   : > { %662 = vst.msk [vmem:[#allocation5 + $0xb0] sm:$0x1] %vm545_vm1, %v5128_v0  ;;  %663 = vst.msk [vmem:[#allocation5 + $0xc0] sm:$0x1] %vm545_vm1, %v5128_v0 }
 0x155   : > { %664 = vst.msk [vmem:[#allocation5 + $0xd0] sm:$0x1] %vm545_vm1, %v5128_v0  ;;  %665 = vst.msk [vmem:[#allocation5 + $0xe0] sm:$0x1] %vm545_vm1, %v5128_v0  ;;  %4064 = vmatpush3.bf16.msra.mxu1 %v4671_v25  ;;  %p5029_p2 = pnand %p5028_p13, %p6503_p0 }
 0x156   : > { %666 = vst.msk [vmem:[#allocation5 + $0xf0] sm:$0x1] %vm545_vm1, %v5128_v0  ;;  %667 = vst.msk [vmem:[#allocation5 + $0x100] sm:$0x1] %vm545_vm1, %v5128_v0  ;;  %4048 = vmatmul.mubr.msk.bf16.gmra.mrb[8].mxu0 %vm769_vm4, %v4664_v12  ;;  %4065 = vmatprep.subr.bf16.mxu1 %v4672_v33 }
 0x157   : > { %668 = vst.msk [vmem:[#allocation5 + $0x110] sm:$0x1] %vm545_vm1, %v5128_v0  ;;  %669 = vst.msk [vmem:[#allocation5 + $0x120] sm:$0x1] %vm545_vm1, %v5128_v0  ;;  %4051 = vmatprep.mubr.msk.bf16.mxu0 %vm769_vm4, %v4665_v13  ;;  %p5030_p8 = pneg %p5029_p2 }
 0x158   : > { %557 = vst.msk [vmem:[#allocation2 + $0x88] sm:$0x1] %vm545_vm1, %v5128_v0  ;;  %566 = vst.msk [vmem:[#allocation2 + $0x118] sm:$0x1] %vm545_vm1, %v5128_v0 }
 0x159   : > { %602 = vst.msk [vmem:[#allocation4] sm:$0x1] %vm545_vm1, %v5128_v0  ;;  %612 = vst.msk [vmem:[#allocation4 + $0xa0] sm:$0x1] %vm545_vm1, %v5128_v0  ;;  %4066 = vmatpush3.bf16.msra.mxu1 %v4672_v33 }
 0x15a   : > { %651 = vst.msk [vmem:[#allocation5] sm:$0x1] %vm545_vm1, %v5128_v0  ;;  %661 = vst.msk [vmem:[#allocation5 + $0xa0] sm:$0x1] %vm545_vm1, %v5128_v0  ;;  %4067 = vmatprep.subr.bf16.mxu1 %v4673_v39  ;;  %vm3407_vm1 = vcmask 1047559  }
 0x15b   : > { %594 = vst.msk [vmem:[#allocation4 + $0x8] sm:$0x3] %vm593_vm5, %v5128_v0  ;;  %596 = vst.msk [vmem:[#allocation4 + $0xa8] sm:$0x3] %vm593_vm5, %v5128_v0 }
 0x15c   : > { %643 = vst.msk [vmem:[#allocation5 + $0x8] sm:$0x3] %vm593_vm5, %v5128_v0  ;;  %645 = vst.msk [vmem:[#allocation5 + $0xa8] sm:$0x3] %vm593_vm5, %v5128_v0 }
 0x15d   : > { %4068 = vmatpush3.bf16.msra.mxu1 %v4673_v39  ;;  %569 = vst.msk [vmem:[#allocation3 + $0x80] sm:$0xff] %vm568_vm6, %v5128_v0  ;;  %572 = vst.msk [vmem:[#allocation3 + $0x110] sm:$0xff] %vm568_vm6, %v5128_v0 }
 0x15e   : > { %4052 = vmatmul.mubr.msk.bf16.gmra.mrb[12].mxu0 %vm769_vm4, %v4666_v14  ;;  %4069 = vmatprep.subr.bf16.mxu1 %v4674_v54  ;;  %576 = vst.msk [vmem:[#allocation3 + $0x28] sm:$0x1] %vm570_vm9, %v5128_v0  ;;  %577 = vst.msk [vmem:[#allocation3 + $0x38] sm:$0x1] %vm570_vm9, %v5128_v0 }
 0x15f   : > { %v5760_v10 = vld [vmem:[#allocation2 + $0x81] sm:$0xff]  ;;  %571 = vst.msk [vmem:[#allocation3 + $0x88] sm:$0x1] %vm570_vm9, %v5128_v0  ;;  %573 = vst.msk [vmem:[#allocation3 + $0x118] sm:$0x1] %vm570_vm9, %v5128_v0 }
 0x160   : > { %v2022_v25 = vmax.f32 %v5758_v9, %v5760_v10  ;;  %574 = vst.msk [vmem:[#allocation3 + $0x8] sm:$0x1] %vm570_vm9, %v5128_v0  ;;  %575 = vst.msk [vmem:[#allocation3 + $0x18] sm:$0x1] %vm570_vm9, %v5128_v0 }
 0x161   : > { %4070 = vmatpush3.bf16.msra.mxu1 %v4674_v54  ;;  %578 = vst.msk [vmem:[#allocation3 + $0x48] sm:$0x1] %vm570_vm9, %v5128_v0  ;;  %579 = vst.msk [vmem:[#allocation3 + $0x58] sm:$0x1] %vm570_vm9, %v5128_v0 }
 0x162   : > { %580 = vst.msk [vmem:[#allocation3 + $0x68] sm:$0x1] %vm570_vm9, %v5128_v0  ;;  %581 = vst.msk [vmem:[#allocation3 + $0x78] sm:$0x1] %vm570_vm9, %v5128_v0 }
 0x163   : > { %583 = vst.msk [vmem:[#allocation3 + $0x98] sm:$0x1] %vm570_vm9, %v5128_v0  ;;  %584 = vst.msk [vmem:[#allocation3 + $0xa8] sm:$0x1] %vm570_vm9, %v5128_v0 }
 0x164   : > { %585 = vst.msk [vmem:[#allocation3 + $0xb8] sm:$0x1] %vm570_vm9, %v5128_v0  ;;  %586 = vst.msk [vmem:[#allocation3 + $0xc8] sm:$0x1] %vm570_vm9, %v5128_v0 }
 0x165   : > { %587 = vst.msk [vmem:[#allocation3 + $0xd8] sm:$0x1] %vm570_vm9, %v5128_v0  ;;  %588 = vst.msk [vmem:[#allocation3 + $0xe8] sm:$0x1] %vm570_vm9, %v5128_v0 }
 0x166   : > { %589 = vst.msk [vmem:[#allocation3 + $0xf8] sm:$0x1] %vm570_vm9, %v5128_v0  ;;  %590 = vst.msk [vmem:[#allocation3 + $0x108] sm:$0x1] %vm570_vm9, %v5128_v0 }
 0x167   : > { %582 = vst.msk [vmem:[#allocation3 + $0x88] sm:$0x1] %vm570_vm9, %v5128_v0  ;;  %591 = vst.msk [vmem:[#allocation3 + $0x118] sm:$0x1] %vm570_vm9, %v5128_v0 }
 0x219   : > { %v4041_v20 = vpop.f32.mrb[0].mxu0 }
 0x21a   : > { %v844_v21 = vadd.f32 %v4041_v20, %v5715_v19  ;;  %v835_v22 = vpop.f32.mrb[1].mxu0 }
 0x21b   : > { %v836_v23 = vadd.f32 %v5715_v19, %v835_v22  ;;  %v4042_v24 = vpop.f32.mrb[2].mxu0 }
 0x21c   : > { %v900_v26 = vmax.f32 %v844_v21, 0.0  ;;  %v847_v27 = vadd.f32 %v4042_v24, %v5715_v19  ;;  %v838_v28 = vpop.f32.mrb[3].mxu0 }
 0x21d   : > { %v898_v29 = vmax.f32 %v836_v23, 0.0  ;;  %v839_v30 = vadd.f32 %v5715_v19, %v838_v28 }
 0x21e   : > { %916 = vst.msk [vmem:[#allocation2 + $0x20] sm:$0xff] %vm543_vm0, %v900_v26  ;;  %v901_v31 = vmax.f32 %v847_v27, 0.0 }
 0x21f   : > { %914 = vst.msk [vmem:[#allocation2] sm:$0xff] %vm543_vm0, %v898_v29  ;;  %v899_v32 = vmax.f32 %v839_v30, 0.0 }
 0x220   : > { %917 = vst.msk [vmem:[#allocation2 + $0x30] sm:$0xff] %vm543_vm0, %v901_v31 }
 0x221   : > { %915 = vst.msk [vmem:[#allocation2 + $0x10] sm:$0xff] %vm543_vm0, %v899_v32  ;;  %v4045_v34 = vpop.f32.mrb[4].mxu0 }
 0x222   : > { %v860_v35 = vadd.f32 %v4045_v34, %v5715_v19  ;;  %v851_v36 = vpop.f32.mrb[5].mxu0 }
 0x223   : > { %v852_v37 = vadd.f32 %v5715_v19, %v851_v36  ;;  %v4046_v38 = vpop.f32.mrb[6].mxu0 }
 0x224   : > { %v904_v40 = vmax.f32 %v860_v35, 0.0  ;;  %v863_v41 = vadd.f32 %v4046_v38, %v5715_v19  ;;  %v854_v42 = vpop.f32.mrb[7].mxu0 }
 0x225   : > { %v5728_v43 = vld [vmem:[#allocation2 + $0x20] sm:$0xff]  ;;  %v902_v44 = vmax.f32 %v852_v37, 0.0  ;;  %v855_v45 = vadd.f32 %v5715_v19, %v854_v42 }
 0x226   : > { %v5731_v46 = vld [vmem:[#allocation2 + $0x21] sm:$0xff]  ;;  %920 = vst.msk [vmem:[#allocation2 + $0x60] sm:$0xff] %vm543_vm0, %v904_v40  ;;  %v905_v48 = vmax.f32 %v863_v41, 0.0 }
 0x227   : > { %v5733_v47 = vld [vmem:[#allocation2] sm:$0xff]  ;;  %v5736_v51 = vld [vmem:[#allocation2 + $0x30] sm:$0xff]  ;;  %918 = vst.msk [vmem:[#allocation2 + $0x40] sm:$0xff] %vm543_vm0, %v902_v44  ;;  %v903_v52 = vmax.f32 %v855_v45, 0.0 }
 0x228   : > { %v946_v49 = vld [vmem:[#allocation2 + $0x1] sm:$0xff]  ;;  %v5739_v53 = vld [vmem:[#allocation2 + $0x31] sm:$0xff]  ;;  %921 = vst.msk [vmem:[#allocation2 + $0x70] sm:$0xff] %vm543_vm0, %v905_v48 }
 0x229   : > { %v1953_v50 = vld [vmem:[#allocation2 + $0x21] sm:$0xff]  ;;  %v5741_v55 = vld [vmem:[#allocation2 + $0x10] sm:$0xff]  ;;  %v4287_v56 = vpack.i.bf16 %v5739_v53, %v5731_v46  ;;  %919 = vst.msk [vmem:[#allocation2 + $0x50] sm:$0xff] %vm543_vm0, %v903_v52  ;;  %v4049_v60 = vpop.f32.mrb[8].mxu0  ;;  %v1967_v61 = vmax.f32 %v5733_v47, %v946_v49 }
 0x22a   : > { %v947_v57 = vld [vmem:[#allocation2 + $0x11] sm:$0xff]  ;;  %v4297_v59 = vpack.i.bf16 %v5728_v43, %v5741_v55  ;;  %v1969_v62 = vmax.f32 %v5728_v43, %v1953_v50  ;;  %v876_v2 = vadd.f32 %v4049_v60, %v5715_v19  ;;  %v867_v3 = vpop.f32.mrb[9].mxu0 }
 0x22b   : > { %v2001_v58 = vld [vmem:[#allocation2 + $0x31] sm:$0xff]  ;;  %v2015_v63 = vmax.f32 %v5741_v55, %v947_v57  ;;  %4288 = vrot.lane.b32.xlu0 %v4287_v56, %s5130_s30  ;;  %v868_v6 = vadd.f32 %v5715_v19, %v867_v3  ;;  %v4292_v7 = vpack.i.bf16 %v947_v57, %v946_v49  ;;  %v4050_v8 = vpop.f32.mrb[10].mxu0  ;;  %v4302_v32 = vpack.i.bf16 %v5731_v46, %v947_v57 }
 0x22c   : > { %v1952_v1 = vld [vmem:[#allocation2 + $0x11] sm:$0xff]  ;;  %v2017_v4 = vmax.f32 %v5736_v51, %v2001_v58  ;;  %4298 = vrot.lane.b32.xlu1 %v4297_v59, %s5131_s12  ;;  %v908_v12 = vmax.f32 %v876_v2, 0.0  ;;  %v879_v13 = vadd.f32 %v4050_v8, %v5715_v19  ;;  %v870_v14 = vpop.f32.mrb[11].mxu0 }
 0x22d   : > { %v1968_v5 = vmax.f32 %v5741_v55, %v1952_v1  ;;  %v2031_v11 = vmax.f32 %v1967_v61, %v2015_v63  ;;  %v5763_v17 = vld [vmem:[#allocation2 + $0x60] sm:$0xff]  ;;  %v906_v18 = vmax.f32 %v868_v6, 0.0  ;;  %v871_v20 = vadd.f32 %v5715_v19, %v870_v14  ;;  %v5839_v14 = vld [vmem:[#allocation2 + $0x110] sm:$0xff] }
 0x22e   : > { %v2033_v15 = vmax.f32 %v1969_v62, %v2017_v4  ;;  %v5766_v21 = vld [vmem:[#allocation2 + $0x61] sm:$0xff]  ;;  %924 = vst.msk [vmem:[#allocation2 + $0xb0] sm:$0xff] %vm543_vm0, %v908_v12  ;;  %v909_v23 = vmax.f32 %v879_v13, 0.0 }
 0x22f   : > { %v2032_v16 = vmax.f32 %v1968_v5, %v1969_v62  ;;  %2048 = vst.msk [vmem:[#allocation4 + $0x11] sm:$0xff] %vm543_vm0, %v2031_v11  ;;  %v5769_v22 = vld [vmem:[#allocation2 + $0x40] sm:$0xff]  ;;  %4293 = vrot.lane.b32.xlu0 %v4292_v7, %s5130_s30  ;;  %v5777_v26 = vld [vmem:[#allocation2 + $0x70] sm:$0xff]  ;;  %922 = vst.msk [vmem:[#allocation2 + $0x90] sm:$0xff] %vm543_vm0, %v906_v18  ;;  %v907_v27 = vmax.f32 %v871_v20, 0.0  ;;  %v1973_v34 = vmax.f32 %v5763_v17, %v5766_v21 }
 0x230   : > { %v982_v24 = vld [vmem:[#allocation2 + $0x41] sm:$0xff]  ;;  %2050 = vst.msk [vmem:[#allocation4 + $0x31] sm:$0xff] %vm543_vm0, %v2033_v15  ;;  %v4307_v28 = vpack.i.bf16 %v5769_v22, %v5736_v51  ;;  %v5782_v29 = vld [vmem:[#allocation2 + $0x71] sm:$0xff]  ;;  %925 = vst.msk [vmem:[#allocation2 + $0xc0] sm:$0xff] %vm543_vm0, %v909_v23  ;;  %v4322_v8 = vpack.i.bf16 %v5758_v9, %v5777_v26 }
 0x231   : > { %2049 = vst.msk [vmem:[#allocation4 + $0x21] sm:$0xff] %vm543_vm0, %v2032_v16  ;;  %v1971_v30 = vmax.f32 %v5769_v22, %v982_v24  ;;  %v5785_v31 = vld [vmem:[#allocation2 + $0x50] sm:$0xff]  ;;  %v2021_v35 = vmax.f32 %v5777_v26, %v5782_v29  ;;  %923 = vst.msk [vmem:[#allocation2 + $0xa0] sm:$0xff] %vm543_vm0, %v907_v27  ;;  %v4053_v36 = vpop.f32.mrb[12].mxu0  ;;  %v4312_v46 = vpack.i.bf16 %v982_v24, %v5739_v53 }
 0x232   : > { %v5789_v33 = vld [vmem:[#allocation2 + $0x51] sm:$0xff]  ;;  %4308 = vrot.lane.b32.xlu1 %v4307_v28, %s5131_s12  ;;  %v892_v38 = vadd.f32 %v4053_v36, %v5715_v19  ;;  %v883_v39 = vpop.f32.mrb[13].mxu0  ;;  %v4317_v61 = vpack.i.bf16 %v5782_v29, %v5766_v21  ;;  %v4337_v1 = vpack.i.bf16 %v5763_v17, %v5785_v31 }
 0x233   : > { %v2019_v37 = vmax.f32 %v5785_v31, %v5789_v33  ;;  %4303 = vrot.lane.b32.xlu0 %v4302_v32, %s5132_s28  ;;  %v2037_v40 = vmax.f32 %v1973_v34, %v2021_v35  ;;  %v2034_v41 = vmax.f32 %v2017_v4, %v1971_v30  ;;  %v2038_v42 = vmax.f32 %v2021_v35, %v2022_v25  ;;  %v4054_v45 = vpop.f32.mrb[14].mxu0  ;;  %v5842_v18 = vld [vmem:[#allocation2 + $0x111] sm:$0xff] }
 0x234   : > { %v884_v44 = vadd.f32 %v5715_v19, %v883_v39  ;;  %v912_v50 = vmax.f32 %v892_v38, 0.0  ;;  %v895_v52 = vadd.f32 %v4054_v45, %v5715_v19  ;;  %v886_v54 = vpop.f32.mrb[15].mxu0  ;;  %v4332_v56 = vpack.i.bf16 %v5789_v33, %v982_v24 }
 0x235   : > { %v2035_v48 = vmax.f32 %v1971_v30, %v2019_v37  ;;  %v2036_v49 = vmax.f32 %v2019_v37, %v1973_v34  ;;  %2054 = vst.msk [vmem:[#allocation4 + $0x71] sm:$0xff] %vm543_vm0, %v2037_v40  ;;  %2051 = vst.msk [vmem:[#allocation4 + $0x41] sm:$0xff] %vm543_vm0, %v2034_v41  ;;  %v887_v58 = vadd.f32 %v5715_v19, %v886_v54  ;;  %v5819_v19 = vld [vmem:[#allocation2 + $0xb0] sm:$0xff] }
 0x236   : > { %2055 = vst.msk [vmem:[#allocation4 + $0x81] sm:$0xff] %vm543_vm0, %v2038_v42  ;;  %v910_v57 = vmax.f32 %v884_v44, 0.0  ;;  %4313 = vrot.lane.b32.xlu1 %v4312_v46, %s5132_s28  ;;  %928 = vst.msk [vmem:[#allocation2 + $0xf0] sm:$0xff] %vm543_vm0, %v912_v50  ;;  %v913_v53 = vmax.f32 %v895_v52, 0.0  ;;  %v5821_v62 = vld [vmem:[#allocation2 + $0x90] sm:$0xff]  ;;  %v4342_v13 = vpack.i.bf16 %v5766_v21, %v5789_v33  ;;  %v4327_v25 = vpack.i.bf16 %v5760_v10, %v5782_v29 }
 0x237   : > { %2052 = vst.msk [vmem:[#allocation4 + $0x51] sm:$0xff] %vm543_vm0, %v2035_v48  ;;  %2053 = vst.msk [vmem:[#allocation4 + $0x61] sm:$0xff] %vm543_vm0, %v2036_v49  ;;  %4333 = vrot.lane.b32.xlu0 %v4332_v56, %s5130_s30  ;;  %v5814_v59 = vld [vmem:[#allocation2 + $0xc0] sm:$0xff]  ;;  %v911_v60 = vmax.f32 %v887_v58, 0.0  ;;  %v2008_v6 = vld [vmem:[#allocation2 + $0xb1] sm:$0xff]  ;;  %v2030_v34 = vmax.f32 %v5839_v14, %v5842_v18 }
 0x238   : > { %926 = vst.msk [vmem:[#allocation2 + $0xd0] sm:$0xff] %vm543_vm0, %v910_v57  ;;  %v5823_v63 = vld [vmem:[#allocation2 + $0xa0] sm:$0xff]  ;;  %929 = vst.msk [vmem:[#allocation2 + $0x100] sm:$0xff] %vm543_vm0, %v913_v53  ;;  %v1959_v7 = vld [vmem:[#allocation2 + $0x91] sm:$0xff]  ;;  %v2024_v11 = vmax.f32 %v5819_v19, %v2008_v6 }
 0x239   : > { %927 = vst.msk [vmem:[#allocation2 + $0xe0] sm:$0xff] %vm543_vm0, %v911_v60  ;;  %v1960_v2 = vld [vmem:[#allocation2 + $0xa1] sm:$0xff]  ;;  %v1975_v12 = vmax.f32 %v5821_v62, %v1959_v7  ;;  %v954_v15 = vld [vmem:[#allocation2 + $0x91] sm:$0xff]  ;;  %v4357_v40 = vpack.i.bf16 %v5819_v19, %v5823_v63 }
 0x23a   : > { %4318 = vrot.lane.b32.xlu1 %v4317_v61, %s5130_s30  ;;  %v1962_v3 = vld [vmem:[#allocation2 + $0xc1] sm:$0xff]  ;;  %v1976_v4 = vmax.f32 %v5823_v63, %v1960_v2  ;;  %v956_v27 = vld [vmem:[#allocation2 + $0xb1] sm:$0xff] }
 0x23b   : > { %4338 = vrot.lane.b32.xlu0 %v4337_v1, %s5131_s12  ;;  %v1978_v5 = vmax.f32 %v5814_v59, %v1962_v3  ;;  %v955_v16 = vld [vmem:[#allocation2 + $0xa1] sm:$0xff] }
 0x23c   : > { %v2040_v20 = vmax.f32 %v1976_v4, %v2024_v11  ;;  %v2039_v23 = vmax.f32 %v1975_v12, %v1976_v4  ;;  %v4352_v30 = vpack.i.bf16 %v955_v16, %v954_v15  ;;  %v957_v32 = vld [vmem:[#allocation2 + $0xc1] sm:$0xff]  ;;  %v4362_v56 = vpack.i.bf16 %v956_v27, %v955_v16 }
 0x23d   : > { %v2041_v24 = vmax.f32 %v2024_v11, %v1978_v5  ;;  %v5856_v35 = vld [vmem:[#allocation2 + $0xf0] sm:$0xff]  ;;  %v4347_v37 = vpack.i.bf16 %v957_v32, %v956_v27 }
 0x23e   : > { %4323 = vrot.lane.b32.xlu1 %v4322_v8, %s5131_s12  ;;  %2057 = vst.msk [vmem:[#allocation4 + $0xc1] sm:$0xff] %vm543_vm0, %v2040_v20  ;;  %2056 = vst.msk [vmem:[#allocation4 + $0xb1] sm:$0xff] %vm543_vm0, %v2039_v23  ;;  %v2012_v39 = vld [vmem:[#allocation2 + $0xf1] sm:$0xff] }
 0x23f   : > { %4343 = vrot.lane.b32.xlu0 %v4342_v13, %s5132_s28  ;;  %v5845_v9 = vld [vmem:[#allocation2 + $0x100] sm:$0xff]  ;;  %2058 = vst.msk [vmem:[#allocation4 + $0xd1] sm:$0xff] %vm543_vm0, %v2041_v24  ;;  %v5858_v36 = vld [vmem:[#allocation2 + $0xd0] sm:$0xff]  ;;  %v2028_v42 = vmax.f32 %v5856_v35, %v2012_v39 }
 0x240   : > { %v961_v21 = vld [vmem:[#allocation2 + $0x101] sm:$0xff]  ;;  %v2010_v38 = vld [vmem:[#allocation2 + $0xd1] sm:$0xff]  ;;  %v4367_v54 = vpack.i.bf16 %v5858_v36, %v5814_v59  ;;  %v4382_v4 = vpack.i.bf16 %v5839_v14, %v5845_v9 }
 0x241   : > { %v5852_v28 = vld [vmem:[#allocation2 + $0xe0] sm:$0xff]  ;;  %v1982_v29 = vmax.f32 %v5845_v9, %v961_v21  ;;  %v2026_v41 = vmax.f32 %v5858_v36, %v2010_v38  ;;  %v990_v57 = vld [vmem:[#allocation2 + $0xd1] sm:$0xff]  ;;  %v4402_v6 = vpack.i.bf16 %v5842_v18, %v961_v21 }
 0x242   : > { %v959_v33 = vld [vmem:[#allocation2 + $0xe1] sm:$0xff]  ;;  %4328 = vrot.lane.b32.xlu1 %v4327_v25, %s5132_s28  ;;  %v4372_v60 = vpack.i.bf16 %v990_v57, %v957_v32  ;;  %v960_v1 = vld [vmem:[#allocation2 + $0xf1] sm:$0xff]  ;;  %v4392_v3 = vpack.i.bf16 %v5856_v35, %v5852_v28 }
 0x243   : > { %4353 = vrot.lane.b32.xlu0 %v4352_v30, %s5130_s30  ;;  %v1980_v10 = vmax.f32 %v5852_v28, %v959_v33  ;;  %v2046_v44 = vmax.f32 %v1982_v29, %v2030_v34  ;;  %v2011_v45 = vld [vmem:[#allocation2 + $0xe1] sm:$0xff]  ;;  %v2042_v48 = vmax.f32 %v1978_v5, %v2026_v41  ;;  %v4387_v61 = vpack.i.bf16 %v959_v33, %v990_v57 }
 0x244   : > { %v2013_v46 = vld [vmem:[#allocation2 + $0x101] sm:$0xff]  ;;  %v2027_v50 = vmax.f32 %v5852_v28, %v2011_v45  ;;  %v4377_v2 = vpack.i.bf16 %v961_v21, %v960_v1  ;;  %v4397_v5 = vpack.i.bf16 %v960_v1, %v959_v33 }
 0x245   : > { %v2044_v49 = vmax.f32 %v1980_v10, %v2028_v42  ;;  %2063 = vst.msk [vmem:[#allocation4 + $0x121] sm:$0xff] %vm543_vm0, %v2046_v44  ;;  %v2029_v52 = vmax.f32 %v5845_v9, %v2013_v46  ;;  %2059 = vst.msk [vmem:[#allocation4 + $0xe1] sm:$0xff] %vm543_vm0, %v2042_v48 }
 0x246   : > { %4348 = vrot.lane.b32.xlu1 %v4347_v37, %s5130_s30  ;;  %v2043_v58 = vmax.f32 %v2026_v41, %v2027_v50 }
 0x247   : > { %4358 = vrot.lane.b32.xlu0 %v4357_v40, %s5131_s12  ;;  %2061 = vst.msk [vmem:[#allocation4 + $0x101] sm:$0xff] %vm543_vm0, %v2044_v49  ;;  %v2045_v53 = vmax.f32 %v2028_v42, %v2029_v52 }
 0x248   : > { %2060 = vst.msk [vmem:[#allocation4 + $0xf1] sm:$0xff] %vm543_vm0, %v2043_v58 }
 0x249   : > { %2062 = vst.msk [vmem:[#allocation4 + $0x111] sm:$0xff] %vm543_vm0, %v2045_v53 }
 0x24a   : > { %4368 = vrot.lane.b32.xlu1 %v4367_v54, %s5131_s12 }
 0x24b   : > { %4363 = vrot.lane.b32.xlu0 %v4362_v56, %s5132_s28 }
 0x24e   : > { %4373 = vrot.lane.b32.xlu1 %v4372_v60, %s5132_s28 }
 0x24f   : > { %4388 = vrot.lane.b32.xlu0 %v4387_v61, %s5130_s30 }
 0x252   : > { %4378 = vrot.lane.b32.xlu1 %v4377_v2, %s5130_s30 }
 0x253   : > { %4393 = vrot.lane.b32.xlu0 %v4392_v3, %s5131_s12 }
 0x256   : > { %4383 = vrot.lane.b32.xlu1 %v4382_v4, %s5131_s12 }
 0x257   : > { %4398 = vrot.lane.b32.xlu0 %v4397_v5, %s5132_s28 }
 0x25a   : > { %4403 = vrot.lane.b32.xlu1 %v4402_v6, %s5132_s28 }
 0x29d   : > { %v4289_v7 = vpop.permute.xlu0 %4288 }
 0x29e   : > { %v4299_v8 = vpop.permute.xlu1 %4298  ;;  %v4291_v15 = vunpack.i.h.bf16 %v4289_v7  ;;  %v4290_v23 = vunpack.i.l.bf16 %v4289_v7 }
 0x29f   : > { %v4301_v24 = vunpack.i.h.bf16 %v4299_v8  ;;  %v4300_v25 = vunpack.i.l.bf16 %v4299_v8 }
 0x2a0   : > { %v1190_v10 = vsel %vm543_vm0, %v5736_v51, %v4291_v15  ;;  %v1189_v37 = vsel %vm543_vm0, %v5728_v43, %v4290_v23 }
 0x2a1   : > { %v4294_v11 = vpop.permute.xlu0 %4293 }
 0x2a2   : > { %v4296_v12 = vunpack.i.h.bf16 %v4294_v11  ;;  %v4295_v13 = vunpack.i.l.bf16 %v4294_v11 }
 0x2a4   : > { %v4309_v16 = vpop.permute.xlu1 %4308  ;;  %v1187_v14 = vsel %vm543_vm0, %v5733_v47, %v4295_v13  ;;  %v1188_v20 = vsel %vm543_vm0, %v5741_v55, %v4296_v12 }
 0x2a5   : > { %v4304_v18 = vpop.permute.xlu0 %4303  ;;  %v4311_v27 = vunpack.i.h.bf16 %v4309_v16  ;;  %v4310_v21 = vunpack.i.l.bf16 %v4309_v16  ;;  %v1204_v33 = vsel %vm1203_vm7, %v1187_v14, %v4300_v25  ;;  %v1205_v34 = vsel %vm1203_vm7, %v1188_v20, %v4301_v24 }
 0x2a6   : > { %v4306_v30 = vunpack.i.h.bf16 %v4304_v18  ;;  %v4305_v32 = vunpack.i.l.bf16 %v4304_v18 }
 0x2a7   : > { %v1206_v42 = vsel %vm1203_vm7, %v1189_v37, %v4310_v21  ;;  %v1207_v44 = vsel %vm1203_vm7, %v1190_v10, %v4311_v27 }
 0x2a8   : > { %v4314_v47 = vpop.permute.xlu1 %4313  ;;  %v1221_v29 = vsel %vm1220_vm8, %v1204_v33, %v4305_v32  ;;  %v1222_v55 = vsel %vm1220_vm8, %v1205_v34, %v4306_v30 }
 0x2a9   : > { %v4316_v38 = vunpack.i.h.bf16 %v4314_v47  ;;  %v4315_v39 = vunpack.i.l.bf16 %v4314_v47  ;;  %v4334_v40 = vpop.permute.xlu0 %4333  ;;  %v1237_v41 = vpack.c.bf16 %v1222_v55, %v1221_v29 }
 0x2aa   : > { %v4336_v49 = vunpack.i.h.bf16 %v4334_v40  ;;  %v4335_v50 = vunpack.i.l.bf16 %v4334_v40 }
 0x2ab   : > { %4071 = vmatprep.mubr.bf16.mxu1 %v1237_v41  ;;  %v1223_v45 = vsel %vm1220_vm8, %v1206_v42, %v4315_v39  ;;  %v1224_v51 = vsel %vm1220_vm8, %v1207_v44, %v4316_v38 }
 0x2ac   : > { %v4319_v46 = vpop.permute.xlu1 %4318  ;;  %v1238_v48 = vpack.c.bf16 %v1224_v51, %v1223_v45  ;;  %v1192_v58 = vsel %vm543_vm0, %v5785_v31, %v4336_v49  ;;  %v1191_v53 = vsel %vm543_vm0, %v5769_v22, %v4335_v50 }
 0x2ad   : > { %v4339_v52 = vpop.permute.xlu0 %4338  ;;  %v4321_v56 = vunpack.i.h.bf16 %v4319_v46  ;;  %v4320_v60 = vunpack.i.l.bf16 %v4319_v46 }
 0x2ae   : > { %4072 = vmatmul.mubr.bf16.vlgmr.msra.gmra.mrb[0].mxu1 %v1238_v48  ;;  %v4341_v43 = vunpack.i.h.bf16 %v4339_v52  ;;  %v4340_v54 = vunpack.i.l.bf16 %v4339_v52 }
 0x2af   : > { %v1194_v7 = vsel %vm543_vm0, %v5777_v26, %v4321_v56  ;;  %v1193_v22 = vsel %vm543_vm0, %v5763_v17, %v4320_v60 }
 0x2b0   : > { %v4324_v57 = vpop.permute.xlu1 %4323  ;;  %v1208_v5 = vsel %vm1203_vm7, %v1191_v53, %v4340_v54  ;;  %v1209_v6 = vsel %vm1203_vm7, %v1192_v58, %v4341_v43 }
 0x2b1   : > { %v4344_v61 = vpop.permute.xlu0 %4343  ;;  %v4326_v1 = vunpack.i.h.bf16 %v4324_v57  ;;  %v4325_v2 = vunpack.i.l.bf16 %v4324_v57 }
 0x2b2   : > { %v4346_v3 = vunpack.i.h.bf16 %v4344_v61  ;;  %v4345_v4 = vunpack.i.l.bf16 %v4344_v61 }
 0x2b3   : > { %v1211_v14 = vsel %vm1203_vm7, %v1194_v7, %v4326_v1  ;;  %v1210_v20 = vsel %vm1203_vm7, %v1193_v22, %v4325_v2 }
 0x2b4   : > { %v4329_v8 = vpop.permute.xlu1 %4328  ;;  %v1225_v11 = vsel %vm1220_vm8, %v1208_v5, %v4345_v4  ;;  %v1226_v31 = vsel %vm1220_vm8, %v1209_v6, %v4346_v3 }
 0x2b5   : > { %v4331_v12 = vunpack.i.h.bf16 %v4329_v8  ;;  %v4330_v13 = vunpack.i.l.bf16 %v4329_v8  ;;  %v4354_v15 = vpop.permute.xlu0 %4353  ;;  %v1239_v16 = vpack.c.bf16 %v1226_v31, %v1225_v11 }
 0x2b6   : > { %v4356_v18 = vunpack.i.h.bf16 %v4354_v15  ;;  %v4355_v27 = vunpack.i.l.bf16 %v4354_v15 }
 0x2b7   : > { %4075 = vmatprep.mubr.bf16.mxu1 %v1239_v16  ;;  %v1227_v23 = vsel %vm1220_vm8, %v1210_v20, %v4330_v13  ;;  %v1228_v26 = vsel %vm1220_vm8, %v1211_v14, %v4331_v12 }
 0x2b8   : > { %v4349_v24 = vpop.permute.xlu1 %4348  ;;  %v1240_v25 = vpack.c.bf16 %v1228_v26, %v1227_v23  ;;  %v1196_v34 = vsel %vm543_vm0, %v5823_v63, %v4356_v18  ;;  %v1195_v10 = vsel %vm543_vm0, %v5821_v62, %v4355_v27  ;;  %v6001_v18 = vld [vmem:[#allocation14] ss:$0 sm:$0xff] }
 0x2b9   : > { %v4359_v21 = vpop.permute.xlu0 %4358  ;;  %v4351_v32 = vunpack.i.h.bf16 %v4349_v24  ;;  %v4350_v47 = vunpack.i.l.bf16 %v4349_v24 }
 0x2ba   : > { %4076 = vmatmul.mubr.bf16.gmra.mrb[4].mxu1 %v1240_v25  ;;  %v4361_v17 = vunpack.i.h.bf16 %v4359_v21  ;;  %v4360_v30 = vunpack.i.l.bf16 %v4359_v21 }
 0x2bb   : > { %v1198_v42 = vsel %vm543_vm0, %v5814_v59, %v4351_v32  ;;  %v1197_v62 = vsel %vm543_vm0, %v5819_v19, %v4350_v47 }
 0x2bc   : > { %v4369_v33 = vpop.permute.xlu1 %4368  ;;  %v1212_v40 = vsel %vm1203_vm7, %v1195_v10, %v4360_v30  ;;  %v1213_v41 = vsel %vm1203_vm7, %v1196_v34, %v4361_v17 }
 0x2bd   : > { %v4364_v29 = vpop.permute.xlu0 %4363  ;;  %v4371_v55 = vunpack.i.h.bf16 %v4369_v33  ;;  %v4370_v37 = vunpack.i.l.bf16 %v4369_v33 }
 0x2be   : > { %v4366_v38 = vunpack.i.h.bf16 %v4364_v29  ;;  %v4365_v39 = vunpack.i.l.bf16 %v4364_v29 }
 0x2bf   : > { %v1214_v50 = vsel %vm1203_vm7, %v1197_v62, %v4370_v37  ;;  %v1215_v52 = vsel %vm1203_vm7, %v1198_v42, %v4371_v55  ;;  %v4676_v37 = vld [vmem:[#allocation15 + $0x8] sm:$0xff]  }
 0x2c0   : > { %v4374_v44 = vpop.permute.xlu1 %4373  ;;  %v1229_v45 = vsel %vm1220_vm8, %v1212_v40, %v4365_v39  ;;  %v1230_v63 = vsel %vm1220_vm8, %v1213_v41, %v4366_v38 }
 0x2c1   : > { %v4376_v51 = vunpack.i.h.bf16 %v4374_v44  ;;  %v4375_v46 = vunpack.i.l.bf16 %v4374_v44  ;;  %v4389_v48 = vpop.permute.xlu0 %4388  ;;  %v1241_v49 = vpack.c.bf16 %v1230_v63, %v1229_v45 }
 0x2c2   : > { %v4391_v57 = vunpack.i.h.bf16 %v4389_v48  ;;  %v4390_v58 = vunpack.i.l.bf16 %v4389_v48 }
 0x2c3   : > { %4079 = vmatprep.mubr.bf16.mxu1 %v1241_v49  ;;  %v1231_v43 = vsel %vm1220_vm8, %v1214_v50, %v4375_v46  ;;  %v1232_v59 = vsel %vm1220_vm8, %v1215_v52, %v4376_v51 }
 0x2c4   : > { %v4379_v54 = vpop.permute.xlu1 %4378  ;;  %v1242_v56 = vpack.c.bf16 %v1232_v59, %v1231_v43  ;;  %v1200_v2 = vsel %vm543_vm0, %v5852_v28, %v4391_v57  ;;  %v1199_v3 = vsel %vm543_vm0, %v5858_v36, %v4390_v58 }
 0x2c5   : > { %v4394_v53 = vpop.permute.xlu0 %4393  ;;  %v4381_v61 = vunpack.i.h.bf16 %v4379_v54  ;;  %v4380_v4 = vunpack.i.l.bf16 %v4379_v54 }
 0x2c6   : > { %4080 = vmatmul.mubr.bf16.gmra.mrb[8].mxu1 %v1242_v56  ;;  %v4396_v19 = vunpack.i.h.bf16 %v4394_v53  ;;  %v4395_v60 = vunpack.i.l.bf16 %v4394_v53  ;;  %v4677_v56 = vld [vmem:[#allocation15 + $0x10] sm:$0xff]  }
 0x2c7   : > { %v1202_v12 = vsel %vm543_vm0, %v5845_v9, %v4381_v61  ;;  %v1201_v36 = vsel %vm543_vm0, %v5856_v35, %v4380_v4  ;;  %v4675_v35 = vld [vmem:[#allocation15] sm:$0xff]  }
 0x2c8   : > { %v4384_v1 = vpop.permute.xlu1 %4383  ;;  %v1216_v31 = vsel %vm1203_vm7, %v1199_v3, %v4395_v60  ;;  %v1217_v22 = vsel %vm1203_vm7, %v1200_v2, %v4396_v19  ;;  %4087 = vmatprep.subr.bf16.mxu0 %v4675_v35  ;;  %v4678_v19 = vld [vmem:[#allocation15 + $0x18] sm:$0xff]  }
 0x2c9   : > { %v4399_v5 = vpop.permute.xlu0 %4398  ;;  %v4386_v6 = vunpack.i.h.bf16 %v4384_v1  ;;  %v4385_v7 = vunpack.i.l.bf16 %v4384_v1  ;;  %4088 = vmatpush3.bf16.msra.mxu0 %v4675_v35 }
 0x2ca   : > { %v4401_v8 = vunpack.i.h.bf16 %v4399_v5  ;;  %v4400_v11 = vunpack.i.l.bf16 %v4399_v5  ;;  %4089 = vmatprep.subr.bf16.mxu0 %v4676_v37 }
 0x2cb   : > { %v1218_v23 = vsel %vm1203_vm7, %v1201_v36, %v4385_v7  ;;  %v1219_v26 = vsel %vm1203_vm7, %v1202_v12, %v4386_v6 }
 0x2cc   : > { %v4404_v13 = vpop.permute.xlu1 %4403  ;;  %v1233_v15 = vsel %vm1220_vm8, %v1216_v31, %v4400_v11  ;;  %v1234_v28 = vsel %vm1220_vm8, %v1217_v22, %v4401_v8 }
 0x2cd   : > { %v4406_v16 = vunpack.i.h.bf16 %v4404_v13  ;;  %v4405_v14 = vunpack.i.l.bf16 %v4404_v13  ;;  %v1243_v20 = vpack.c.bf16 %v1234_v28, %v1233_v15  ;;  %4090 = vmatpush3.bf16.msra.mxu0 %v4676_v37 }
 0x2ce   : > { %4091 = vmatprep.subr.bf16.mxu0 %v4677_v56 }
 0x2cf   : > { %4083 = vmatprep.mubr.bf16.mxu1 %v1243_v20  ;;  %v1235_v24 = vsel %vm1220_vm8, %v1218_v23, %v4405_v14  ;;  %v1236_v9 = vsel %vm1220_vm8, %v1219_v26, %v4406_v16 }
 0x2d0   : > { %v1244_v25 = vpack.c.bf16 %v1236_v9, %v1235_v24 }
 0x2d1   : > { %4092 = vmatpush3.bf16.msra.mxu0 %v4677_v56 }
 0x2d2   : > { %4084 = vmatmul.mubr.bf16.gmra.mrb[12].mxu1 %v1244_v25  ;;  %4093 = vmatprep.subr.bf16.mxu0 %v4678_v19 }
 0x2d5   : > { %4094 = vmatpush3.bf16.msra.mxu0 %v4678_v19 }
 0x381   : > { %v4073_v27 = vpop.f32.mrb[0].mxu1 }
 0x382   : > { %v1359_v21 = vadd.f32 %v4073_v27, %v6001_v18  ;;  %v1350_v17 = vpop.f32.mrb[1].mxu1  ;;  %v1485_v27 = vld [vmem:[#allocation3 + $0x80] sm:$0xff] }
 0x383   : > { %v1351_v30 = vadd.f32 %v6001_v18, %v1350_v17  ;;  %v4074_v32 = vpop.f32.mrb[2].mxu1 }
 0x384   : > { %v1415_v33 = vmax.f32 %v1359_v21, 0.0  ;;  %v1362_v34 = vadd.f32 %v4074_v32, %v6001_v18  ;;  %v1353_v10 = vpop.f32.mrb[3].mxu1 }
 0x385   : > { %v1413_v47 = vmax.f32 %v1351_v30, 0.0  ;;  %v1354_v29 = vadd.f32 %v6001_v18, %v1353_v10 }
 0x386   : > { %1431 = vst.msk [vmem:[#allocation3 + $0x20] sm:$0xff] %vm568_vm6, %v1415_v33  ;;  %v1416_v0 = vmax.f32 %v1362_v34, 0.0 }
 0x387   : > { %1429 = vst.msk [vmem:[#allocation3] sm:$0xff] %vm568_vm6, %v1413_v47  ;;  %v1414_v55 = vmax.f32 %v1354_v29, 0.0 }
 0x388   : > { %1432 = vst.msk [vmem:[#allocation3 + $0x30] sm:$0xff] %vm568_vm6, %v1416_v0 }
 0x389   : > { %1430 = vst.msk [vmem:[#allocation3 + $0x10] sm:$0xff] %vm568_vm6, %v1414_v55 }
 0x38d   : > { %v4077_v38 = vpop.f32.mrb[4].mxu1  ;;  %v1463_v44 = vld [vmem:[#allocation3 + $0x21] sm:$0xff] }
 0x38e   : > { %v1375_v39 = vadd.f32 %v4077_v38, %v6001_v18  ;;  %v1366_v40 = vpop.f32.mrb[5].mxu1  ;;  %v1461_v48 = vld [vmem:[#allocation3 + $0x1] sm:$0xff] }
 0x38f   : > { %v1367_v41 = vadd.f32 %v6001_v18, %v1366_v40  ;;  %v4078_v42 = vpop.f32.mrb[6].mxu1  ;;  %v1464_v45 = vld [vmem:[#allocation3 + $0x31] sm:$0xff]  ;;  %v6022_v58 = vld [vmem:[#allocation3 + $0x20] sm:$0xff] }
 0x390   : > { %v1419_v63 = vmax.f32 %v1375_v39, 0.0  ;;  %v1378_v62 = vadd.f32 %v4078_v42, %v6001_v18  ;;  %v1369_v51 = vpop.f32.mrb[7].mxu1  ;;  %v4407_v46 = vpack.i.bf16 %v1464_v45, %v1463_v44  ;;  %v1462_v49 = vld [vmem:[#allocation3 + $0x11] sm:$0xff]  ;;  %v1501_v38 = vld [vmem:[#allocation3 + $0x81] sm:$0xff] }
 0x391   : > { %v1417_v50 = vmax.f32 %v1367_v41, 0.0  ;;  %v1370_v52 = vadd.f32 %v6001_v18, %v1369_v51  ;;  %v4412_v43 = vpack.i.bf16 %v1462_v49, %v1461_v48  ;;  %v6017_v54 = vld [vmem:[#allocation3 + $0x10] sm:$0xff]  ;;  %v4422_v61 = vpack.i.bf16 %v1463_v44, %v1462_v49 }
 0x392   : > { %1435 = vst.msk [vmem:[#allocation3 + $0x60] sm:$0xff] %vm568_vm6, %v1419_v63  ;;  %v1420_v59 = vmax.f32 %v1378_v62, 0.0  ;;  %4408 = vrot.lane.b32.xlu1 %v4407_v46, %s5133_s21  ;;  %v4417_v53 = vpack.i.bf16 %v6022_v58, %v6017_v54  ;;  %v6029_v3 = vld [vmem:[#allocation3 + $0x30] sm:$0xff] }
 0x393   : > { %1433 = vst.msk [vmem:[#allocation3 + $0x40] sm:$0xff] %vm568_vm6, %v1417_v50  ;;  %v1418_v57 = vmax.f32 %v1370_v52, 0.0  ;;  %4413 = vrot.lane.b32.xlu0 %v4412_v43, %s5133_s21  ;;  %v4680_v46 = vld [vmem:[#allocation18] sm:$0xff]   ;;  %v4681_v52 = vld [vmem:[#allocation18 + $0x48] sm:$0xff]  }
 0x394   : > { %1436 = vst.msk [vmem:[#allocation3 + $0x70] sm:$0xff] %vm568_vm6, %v1420_v59  ;;  %v4682_v43 = vld [vmem:[#allocation18 + $0x8] sm:$0xff]  }
 0x395   : > { %1434 = vst.msk [vmem:[#allocation3 + $0x50] sm:$0xff] %vm568_vm6, %v1418_v57 }
 0x397   : > { %4418 = vrot.lane.b32.xlu0 %v4417_v53, %s5130_s30  ;;  %v4683_v53 = vld [vmem:[#allocation18 + $0x50] sm:$0xff]  }
 0x399   : > { %v4081_v60 = vpop.f32.mrb[8].mxu1  ;;  %v6046_v23 = vld [vmem:[#allocation3 + $0x60] sm:$0xff] }
 0x39a   : > { %v1391_v1 = vadd.f32 %v4081_v60, %v6001_v18  ;;  %v1382_v2 = vpop.f32.mrb[9].mxu1  ;;  %v6031_v4 = vld [vmem:[#allocation3 + $0x40] sm:$0xff] }
 0x39b   : > { %v1383_v5 = vadd.f32 %v6001_v18, %v1382_v2  ;;  %4423 = vrot.lane.b32.xlu0 %v4422_v61, %s5134_s26  ;;  %v4082_v6 = vpop.f32.mrb[10].mxu1  ;;  %v4427_v7 = vpack.i.bf16 %v6031_v4, %v6029_v3  ;;  %v1465_v22 = vld [vmem:[#allocation3 + $0x41] sm:$0xff]  ;;  %v1468_v26 = vld [vmem:[#allocation3 + $0x71] sm:$0xff] }
 0x39c   : > { %v1423_v8 = vmax.f32 %v1391_v1, 0.0  ;;  %v1394_v11 = vadd.f32 %v4082_v6, %v6001_v18  ;;  %v1385_v31 = vpop.f32.mrb[11].mxu1  ;;  %v1466_v12 = vld [vmem:[#allocation3 + $0x51] sm:$0xff]  ;;  %v4432_v20 = vpack.i.bf16 %v1465_v22, %v1464_v45  ;;  %v1467_v9 = vld [vmem:[#allocation3 + $0x61] sm:$0xff]  ;;  %v4447_v62 = vpack.i.bf16 %v1501_v38, %v1468_v26 }
 0x39d   : > { %v1421_v13 = vmax.f32 %v1383_v5, 0.0  ;;  %v1386_v15 = vadd.f32 %v6001_v18, %v1385_v31  ;;  %4428 = vrot.lane.b32.xlu1 %v4427_v7, %s5130_s30  ;;  %v4452_v28 = vpack.i.bf16 %v1466_v12, %v1465_v22  ;;  %v6041_v16 = vld [vmem:[#allocation3 + $0x50] sm:$0xff]  ;;  %v4437_v25 = vpack.i.bf16 %v1468_v26, %v1467_v9  ;;  %v4684_v2 = vld [vmem:[#allocation18 + $0x10] sm:$0xff]  }
 0x39e   : > { %1439 = vst.msk [vmem:[#allocation3 + $0xb0] sm:$0xff] %vm568_vm6, %v1423_v8  ;;  %v1424_v36 = vmax.f32 %v1394_v11, 0.0  ;;  %v4457_v24 = vpack.i.bf16 %v6046_v23, %v6041_v16  ;;  %v6053_v35 = vld [vmem:[#allocation3 + $0x70] sm:$0xff]  ;;  %v4462_v17 = vpack.i.bf16 %v1467_v9, %v1466_v12 }
 0x39f   : > { %1437 = vst.msk [vmem:[#allocation3 + $0x90] sm:$0xff] %vm568_vm6, %v1421_v13  ;;  %v1422_v14 = vmax.f32 %v1386_v15, 0.0  ;;  %4453 = vrot.lane.b32.xlu0 %v4452_v28, %s5133_s21  ;;  %v4442_v10 = vpack.i.bf16 %v1485_v27, %v6053_v35  ;;  %v4679_v45 = vld [vmem:[#allocation18 + $0x40] sm:$0xff]   ;;  %v4685_v6 = vld [vmem:[#allocation18 + $0x58] sm:$0xff]  }
 0x3a0   : > { %1440 = vst.msk [vmem:[#allocation3 + $0xc0] sm:$0xff] %vm568_vm6, %v1424_v36  ;;  %3969 = vmatprep.subr.bf16.mxu1 %v4679_v45  ;;  %v4686_v31 = vld [vmem:[#allocation18 + $0x18] sm:$0xff]   ;;  %v4688_v9 = vld [vmem:[#allocation18 + $0x20] sm:$0xff]   ;;  %v4691_v45 = vld [vmem:[#allocation18 + $0x70] sm:$0xff]  }
 0x3a1   : > { %1438 = vst.msk [vmem:[#allocation3 + $0xa0] sm:$0xff] %vm568_vm6, %v1422_v14  ;;  %4433 = vrot.lane.b32.xlu1 %v4432_v20, %s5134_s26  ;;  %3970 = vmatpush3.bf16.msra.mxu1 %v4680_v46  ;;  %v2166_v12 = vld [vmem:[#allocation4 + $0x72] ss:$2 sm:$0xf]  ;;  %v4692_v46 = vld [vmem:[#allocation18 + $0x30] sm:$0xff]  }
 0x3a2   : > { %3971 = vmatprep.subr.bf16.mxu1 %v4681_v52  ;;  %v2160_v15 = vld [vmem:[#allocation4 + $0x12] ss:$2 sm:$0xf]  ;;  %v2119_v52 = vld [vmem:[#allocation4 + $0x62] ss:$2 sm:$0xf] }
 0x3a3   : > { %4458 = vrot.lane.b32.xlu0 %v4457_v24, %s5130_s30  ;;  %v2164_v28 = vld [vmem:[#allocation4 + $0x52] ss:$2 sm:$0xf] }
 0x3a4   : > { %v2162_v14 = vld [vmem:[#allocation4 + $0x32] ss:$2 sm:$0xf]  ;;  %v2478_v27 = vcombine.low %v2164_v28, %v2166_v12 }
 0x3a5   : > { %v4085_v21 = vpop.f32.mrb[12].mxu1  ;;  %4438 = vrot.lane.b32.xlu1 %v4437_v25, %s5133_s21  ;;  %v6069_v51 = vld [vmem:[#allocation3 + $0xb0] sm:$0xff]  ;;  %3972 = vmatpush3.bf16.msra.mxu1 %v4682_v43 }
 0x3a6   : > { %v1407_v30 = vadd.f32 %v4085_v21, %v6001_v18  ;;  %v1398_v32 = vpop.f32.mrb[13].mxu1  ;;  %v1469_v55 = vld [vmem:[#allocation3 + $0x91] sm:$0xff]  ;;  %3973 = vmatprep.subr.bf16.mxu1 %v4683_v53  ;;  %v2180_v21 = vld [vmem:[#allocation4 + $0x60] ss:$2 sm:$0xf] }
 0x3a7   : > { %v1399_v33 = vadd.f32 %v6001_v18, %v1398_v32  ;;  %v4086_v34 = vpop.f32.mrb[14].mxu1  ;;  %4463 = vrot.lane.b32.xlu0 %v4462_v17, %s5134_s26  ;;  %v1471_v49 = vld [vmem:[#allocation3 + $0xb1] sm:$0xff]  ;;  %v6077_v56 = vld [vmem:[#allocation3 + $0xc0] sm:$0xff] }
 0x3a8   : > { %v1427_v47 = vmax.f32 %v1407_v30, 0.0  ;;  %v1410_v29 = vadd.f32 %v4086_v34, %v6001_v18  ;;  %v1401_v0 = vpop.f32.mrb[15].mxu1  ;;  %v1470_v37 = vld [vmem:[#allocation3 + $0xa1] sm:$0xff]  ;;  %v4687_v20 = vld [vmem:[#allocation18 + $0x60] sm:$0xff]   ;;  %v4694_v12 = vld [vmem:[#allocation18 + $0x38] sm:$0xff]  }
 0x3a9   : > { %v1425_v39 = vmax.f32 %v1399_v33, 0.0  ;;  %v1402_v40 = vadd.f32 %v6001_v18, %v1401_v0  ;;  %4443 = vrot.lane.b32.xlu1 %v4442_v10, %s5130_s30  ;;  %v4472_v41 = vpack.i.bf16 %v1470_v37, %v1469_v55  ;;  %v6064_v44 = vld [vmem:[#allocation3 + $0xa0] sm:$0xff]  ;;  %v4482_v59 = vpack.i.bf16 %v1471_v49, %v1470_v37  ;;  %3974 = vmatpush3.bf16.msra.mxu1 %v4684_v2  ;;  %v1493_v24 = vld [vmem:[#allocation3 + $0x110] sm:$0xff] }
 0x3aa   : > { %1443 = vst.msk [vmem:[#allocation3 + $0xf0] sm:$0xff] %vm568_vm6, %v1427_v47  ;;  %v1428_v42 = vmax.f32 %v1410_v29, 0.0  ;;  %v1472_v18 = vld [vmem:[#allocation3 + $0xc1] sm:$0xff]  ;;  %v4477_v48 = vpack.i.bf16 %v6069_v51, %v6064_v44  ;;  %3975 = vmatprep.subr.bf16.mxu1 %v4685_v6  ;;  %v2477_v33 = vcombine.low %v2160_v15, %v2162_v14  ;;  %v1509_v47 = vld [vmem:[#allocation3 + $0x111] sm:$0xff] }
 0x3ab   : > { %1441 = vst.msk [vmem:[#allocation3 + $0xd0] sm:$0xff] %vm568_vm6, %v1425_v39  ;;  %v1426_v63 = vmax.f32 %v1402_v40, 0.0  ;;  %4473 = vrot.lane.b32.xlu0 %v4472_v41, %s5133_s21  ;;  %v4467_v50 = vpack.i.bf16 %v1472_v18, %v1471_v49  ;;  %v2182_v17 = vld [vmem:[#allocation4 + $0x80] ss:$2 sm:$0xf] }
 0x3ac   : > { %1444 = vst.msk [vmem:[#allocation3 + $0x100] sm:$0xff] %vm568_vm6, %v1428_v42  ;;  %v4689_v30 = vld [vmem:[#allocation18 + $0x68] sm:$0xff]   ;;  %v4527_v38 = vpack.i.bf16 %v2478_v27, %v2477_v33  ;;  %v2502_v39 = vcombine.low %v2180_v21, %v2182_v17  ;;  %v2132_v2 = vld [vmem:[#allocation4 + $0x50] ss:$2 sm:$0xf] }
 0x3ad   : > { %1442 = vst.msk [vmem:[#allocation3 + $0xe0] sm:$0xff] %vm568_vm6, %v1426_v63  ;;  %4448 = vrot.lane.b32.xlu1 %v4447_v62, %s5134_s26  ;;  %3976 = vmatpush3.bf16.msra.mxu1 %v4686_v31  ;;  %v2178_v34 = vld [vmem:[#allocation4 + $0x40] ss:$2 sm:$0xf] }
 0x3ae   : > { %3977 = vmatprep.subr.bf16.mxu1 %v4687_v20  ;;  %v4690_v10 = vld [vmem:[#allocation18 + $0x28] sm:$0xff]   ;;  %v2134_v31 = vld [vmem:[#allocation4 + $0x70] ss:$2 sm:$0xf] }
 0x3af   : > { %4478 = vrot.lane.b32.xlu0 %v4477_v48, %s5130_s30  ;;  %v2176_v29 = vld [vmem:[#allocation4 + $0x20] ss:$2 sm:$0xf]  ;;  %v2097_v0 = vld [vmem:[#allocation4 + $0x1] ss:$2 sm:$0xf]  ;;  %v2438_v17 = vcombine.low %v2132_v2, %v2134_v31 }
 0x3b0   : > { %v2099_v55 = vld [vmem:[#allocation4 + $0x21] ss:$2 sm:$0xf]  ;;  %v2501_v62 = vcombine.low %v2176_v29, %v2178_v34  ;;  %v2186_v15 = vld [vmem:[#allocation4 + $0xe0] ss:$2 sm:$0xf] }
 0x3b1   : > { %4468 = vrot.lane.b32.xlu1 %v4467_v50, %s5133_s21  ;;  %v6088_v8 = vld [vmem:[#allocation3 + $0xf0] sm:$0xff]  ;;  %3978 = vmatpush3.bf16.msra.mxu1 %v4688_v9  ;;  %v2103_v37 = vld [vmem:[#allocation4 + $0x61] ss:$2 sm:$0xf] }
 0x3b2   : > { %v6079_v57 = vld [vmem:[#allocation3 + $0xd0] sm:$0xff]  ;;  %3979 = vmatprep.subr.bf16.mxu1 %v4689_v30  ;;  %v2101_v40 = vld [vmem:[#allocation4 + $0x41] ss:$2 sm:$0xf]  ;;  %v4537_v43 = vpack.i.bf16 %v2502_v39, %v2501_v62 }
 0x3b3   : > { %4483 = vrot.lane.b32.xlu0 %v4482_v59, %s5134_s26  ;;  %v4487_v19 = vpack.i.bf16 %v6079_v57, %v6077_v56  ;;  %v1473_v60 = vld [vmem:[#allocation3 + $0xd1] sm:$0xff]  ;;  %v1476_v11 = vld [vmem:[#allocation3 + $0x101] sm:$0xff]  ;;  %v2389_v59 = vcombine.low %v2097_v0, %v2099_v55 }
 0x3b4   : > { %v1474_v61 = vld [vmem:[#allocation3 + $0xe1] sm:$0xff]  ;;  %v4492_v7 = vpack.i.bf16 %v1473_v60, %v1472_v18  ;;  %v1475_v13 = vld [vmem:[#allocation3 + $0xf1] sm:$0xff]  ;;  %v4522_v63 = vpack.i.bf16 %v1509_v47, %v1476_v11  ;;  %v2390_v18 = vcombine.low %v2101_v40, %v2103_v37 }
 0x3b5   : > { %4488 = vrot.lane.b32.xlu1 %v4487_v19, %s5130_s30  ;;  %v4507_v1 = vpack.i.bf16 %v1474_v61, %v1473_v60  ;;  %v6085_v5 = vld [vmem:[#allocation3 + $0xe0] sm:$0xff]  ;;  %v4497_v36 = vpack.i.bf16 %v1476_v11, %v1475_v13  ;;  %v4517_v25 = vpack.i.bf16 %v1475_v13, %v1474_v61  ;;  %3980 = vmatpush3.bf16.msra.mxu1 %v4690_v10  ;;  %v2128_v20 = vld [vmem:[#allocation4 + $0x10] ss:$2 sm:$0xf] }
 0x3b6   : > { %v4512_v22 = vpack.i.bf16 %v6088_v8, %v6085_v5  ;;  %v6094_v26 = vld [vmem:[#allocation3 + $0x100] sm:$0xff]  ;;  %3981 = vmatprep.subr.bf16.mxu1 %v4691_v45  ;;  %v4532_v6 = vpack.i.bf16 %v2390_v18, %v2389_v59  ;;  %v2172_v33 = vld [vmem:[#allocation4 + $0xf2] ss:$2 sm:$0xf] }
 0x3b7   : > { %4508 = vrot.lane.b32.xlu0 %v4507_v1, %s5133_s21  ;;  %v4502_v32 = vpack.i.bf16 %v1493_v24, %v6094_v26  ;;  %v2196_v41 = vld [vmem:[#allocation4 + $0x61] ss:$2 sm:$0xf]  ;;  %v2113_v50 = vld [vmem:[#allocation4 + $0x2] ss:$2 sm:$0xf] }
 0x3b8   : > { %v2198_v42 = vld [vmem:[#allocation4 + $0x81] ss:$2 sm:$0xf]  ;;  %v2115_v19 = vld [vmem:[#allocation4 + $0x22] ss:$2 sm:$0xf] }
 0x3b9   : > { %4493 = vrot.lane.b32.xlu1 %v4492_v7, %s5134_s26  ;;  %v2192_v48 = vld [vmem:[#allocation4 + $0x21] ss:$2 sm:$0xf]  ;;  %v2526_v53 = vcombine.low %v2196_v41, %v2198_v42  ;;  %v2117_v60 = vld [vmem:[#allocation4 + $0x42] ss:$2 sm:$0xf]  ;;  %3982 = vmatpush3.bf16.msra.mxu1 %v4692_v46 }
 0x3ba   : > { %v2194_v49 = vld [vmem:[#allocation4 + $0x41] ss:$2 sm:$0xf]  ;;  %v2188_v61 = vld [vmem:[#allocation4 + $0x100] ss:$2 sm:$0xf]  ;;  %v2414_v11 = vcombine.low %v2117_v60, %v2119_v52 }
 0x3bb   : > { %4513 = vrot.lane.b32.xlu0 %v4512_v22, %s5130_s30  ;;  %v2190_v1 = vld [vmem:[#allocation4 + $0x120] ss:$2 sm:$0xf]  ;;  %v2525_v7 = vcombine.low %v2192_v48, %v2194_v49  ;;  %v4693_v22 = vld [vmem:[#allocation18 + $0x78] sm:$0xff]  }
 0x3bc   : > { %v2184_v13 = vld [vmem:[#allocation4 + $0xc0] ss:$2 sm:$0xf]  ;;  %v2504_v14 = vcombine.low %v2188_v61, %v2190_v1  ;;  %v2130_v24 = vld [vmem:[#allocation4 + $0x30] ss:$2 sm:$0xf]  ;;  %3983 = vmatprep.subr.bf16.mxu1 %v4693_v22 }
 0x3bd   : > { %4498 = vrot.lane.b32.xlu1 %v4497_v36, %s5133_s21  ;;  %v4547_v28 = vpack.i.bf16 %v2526_v53, %v2525_v7  ;;  %v2413_v36 = vcombine.low %v2113_v50, %v2115_v19  ;;  %v2204_v9 = vld [vmem:[#allocation4 + $0x101] ss:$2 sm:$0xf]  ;;  %v2503_v21 = vcombine.low %v2184_v13, %v2186_v15  ;;  %3984 = vmatpush3.bf16.msra.mxu1 %v4694_v12  ;;  %v2174_v34 = vld [vmem:[#allocation4 + $0x112] ss:$2 sm:$0xf] }
 0x3be   : > { %v2200_v30 = vld [vmem:[#allocation4 + $0xc1] ss:$2 sm:$0xf]  ;;  %v2437_v47 = vcombine.low %v2128_v20, %v2130_v24  ;;  %v2168_v0 = vld [vmem:[#allocation4 + $0xb2] ss:$2 sm:$0xf]  ;;  %v2480_v39 = vcombine.low %v2172_v33, %v2174_v34 }
 0x3bf   : > { %4518 = vrot.lane.b32.xlu0 %v4517_v25, %s5134_s26  ;;  %v2206_v25 = vld [vmem:[#allocation4 + $0x121] ss:$2 sm:$0xf]  ;;  %v4542_v27 = vpack.i.bf16 %v2414_v11, %v2413_v36  ;;  %v4567_v10 = vpack.i.bf16 %v2504_v14, %v2503_v21  ;;  %v2170_v55 = vld [vmem:[#allocation4 + $0xd2] ss:$2 sm:$0xf] }
 0x3c0   : > { %v2528_v29 = vcombine.low %v2204_v9, %v2206_v25  ;;  %v4552_v37 = vpack.i.bf16 %v2438_v17, %v2437_v47  ;;  %v2111_v40 = vld [vmem:[#allocation4 + $0x101] ss:$2 sm:$0xf]  ;;  %v2479_v42 = vcombine.low %v2168_v0, %v2170_v55  ;;  %v2127_v48 = vld [vmem:[#allocation4 + $0x102] ss:$2 sm:$0xf] }
 0x3c1   : > { %4503 = vrot.lane.b32.xlu1 %v4502_v32, %s5130_s30  ;;  %v2202_v32 = vld [vmem:[#allocation4 + $0xe1] ss:$2 sm:$0xf]  ;;  %v2121_v50 = vld [vmem:[#allocation4 + $0xa2] ss:$2 sm:$0xf] }
 0x3c2   : > { %v2105_v45 = vld [vmem:[#allocation4 + $0xa1] ss:$2 sm:$0xf]  ;;  %v4557_v18 = vpack.i.bf16 %v2480_v39, %v2479_v42  ;;  %v2123_v52 = vld [vmem:[#allocation4 + $0xc2] ss:$2 sm:$0xf] }
 0x3c3   : > { %4528 = vrot.lane.b32.xlu0 %v4527_v38, %s5130_s30  ;;  %v2527_v38 = vcombine.low %v2200_v30, %v2202_v32  ;;  %v2109_v62 = vld [vmem:[#allocation4 + $0xe1] ss:$2 sm:$0xf]  ;;  %v2140_v19 = vld [vmem:[#allocation4 + $0xf0] ss:$2 sm:$0xf]  ;;  %v2415_v61 = vcombine.low %v2121_v50, %v2123_v52 }
 0x3c4   : > { %v2392_v46 = vcombine.low %v2109_v62, %v2111_v40  ;;  %v2142_v60 = vld [vmem:[#allocation4 + $0x110] ss:$2 sm:$0xf]  ;;  %v1445_v20 = vld [vmem:[#allocation3] sm:$0xff]  ;;  %s5135_s21 = smov [#allocation24]  }
 0x3c5   : > { %4523 = vrot.lane.b32.xlu1 %v4522_v63, %s5134_s26  ;;  %v4577_v41 = vpack.i.bf16 %v2528_v29, %v2527_v38  ;;  %v2107_v63 = vld [vmem:[#allocation4 + $0xc1] ss:$2 sm:$0xf]  ;;  %v2136_v1 = vld [vmem:[#allocation4 + $0xb0] ss:$2 sm:$0xf]  ;;  %v2440_v7 = vcombine.low %v2140_v19, %v2142_v60 }
 0x3c6   : > { %v2391_v49 = vcombine.low %v2105_v45, %v2107_v63  ;;  %v2138_v2 = vld [vmem:[#allocation4 + $0xd0] ss:$2 sm:$0xf]  ;;  %s5031_s26 = sshll.u32 %s5135_s21, 4  ;;  %s5032_s26 = int_to_ptr.vmem [resolvable:$false] %s5031_s26 }
 0x3c7   : > { %4538 = vrot.lane.b32.xlu0 %v4537_v43, %s5131_s12  ;;  %v2125_v43 = vld [vmem:[#allocation4 + $0xe2] ss:$2 sm:$0xf]  ;;  %v2439_v11 = vcombine.low %v2136_v1, %v2138_v2  ;;  %s5033_s15 = scalar_lea.vmem %s5032_s26, 512  ;;  %p5034_p4 = scmp.lt.s32.totalorder %s6410_s16, %s5032_s26 }
 0x3c8   : > { %v4562_v59 = vpack.i.bf16 %v2392_v46, %v2391_v49  ;;  %v2416_v53 = vcombine.low %v2125_v43, %v2127_v48  ;;  %p5035_p10 = scmp.lt.s32.totalorder %s5033_s15, %s5027_s23 }
 0x3c9   : > { %4533 = vrot.lane.b32.xlu1 %v4532_v6, %s5130_s30  ;;  %v4582_v31 = vpack.i.bf16 %v2440_v7, %v2439_v11 }
 0x3ca   : > { %v4572_v6 = vpack.i.bf16 %v2416_v53, %v2415_v61  ;;  %p5036_p11 = por %p5035_p10, %p5034_p4 }
 0x3cb   : > { %4548 = vrot.lane.b32.xlu0 %v4547_v28, %s5132_s28 }
 0x3cc   : > { %p5037_p3 = pnand %p5036_p11, %p5030_p8 }
 0x3cd   : > { %4543 = vrot.lane.b32.xlu1 %v4542_v27, %s5131_s12 }
 0x3cf   : > { %4568 = vrot.lane.b32.xlu0 %v4567_v10, %s5131_s12 }
 0x3d1   : > { %4553 = vrot.lane.b32.xlu1 %v4552_v37, %s5132_s28 }
 0x3d3   : > { %4578 = vrot.lane.b32.xlu0 %v4577_v41, %s5132_s28 }
 0x3d5   : > { %4558 = vrot.lane.b32.xlu1 %v4557_v18, %s5130_s30 }
 0x3d9   : > { %4563 = vrot.lane.b32.xlu1 %v4562_v59, %s5130_s30 }
 0x3dd   : > { %4573 = vrot.lane.b32.xlu1 %v4572_v6, %s5131_s12 }
 0x3e1   : > { %4583 = vrot.lane.b32.xlu1 %v4582_v31, %s5132_s28 }
 0x404   : > { %v4409_v28 = vpop.permute.xlu1 %4408 }
 0x405   : > { %v4414_v22 = vpop.permute.xlu0 %4413  ;;  %v4411_v33 = vunpack.i.h.bf16 %v4409_v28  ;;  %v4410_v34 = vunpack.i.l.bf16 %v4409_v28 }
 0x406   : > { %v4416_v13 = vunpack.i.h.bf16 %v4414_v22  ;;  %v4415_v15 = vunpack.i.l.bf16 %v4414_v22 }
 0x407   : > { %v1705_v38 = vsel %vm568_vm6, %v6029_v3, %v4411_v33  ;;  %v1704_v39 = vsel %vm568_vm6, %v6022_v58, %v4410_v34  ;;  %v1453_v33 = vld [vmem:[#allocation3 + $0x90] sm:$0xff] }
 0x408   : > { %v1703_v9 = vsel %vm568_vm6, %v6017_v54, %v4416_v13  ;;  %v1702_v25 = vsel %vm568_vm6, %v1445_v20, %v4415_v15 }
 0x409   : > { %v4419_v12 = vpop.permute.xlu0 %4418 }
 0x40a   : > { %v4421_v36 = vunpack.i.h.bf16 %v4419_v12  ;;  %v4420_v14 = vunpack.i.l.bf16 %v4419_v12 }
 0x40c   : > { %v1718_v17 = vsel %vm543_vm0, %v1702_v25, %v4420_v14  ;;  %v1719_v30 = vsel %vm543_vm0, %v1703_v9, %v4421_v36 }
 0x40d   : > { %v4424_v24 = vpop.permute.xlu0 %4423 }
 0x40e   : > { %v4426_v27 = vunpack.i.h.bf16 %v4424_v24  ;;  %v4425_v21 = vunpack.i.l.bf16 %v4424_v24 }
 0x40f   : > { %v4429_v32 = vpop.permute.xlu1 %4428 }
 0x410   : > { %v1735_v10 = vsel %vm1734_vm10, %v1718_v17, %v4425_v21  ;;  %v1736_v47 = vsel %vm1734_vm10, %v1719_v30, %v4426_v27  ;;  %v4431_v0 = vunpack.i.h.bf16 %v4429_v32  ;;  %v4430_v55 = vunpack.i.l.bf16 %v4429_v32 }
 0x411   : > { %v1751_v29 = vpack.c.bf16 %v1736_v47, %v1735_v10  ;;  %v4454_v37 = vpop.permute.xlu0 %4453 }
 0x412   : > { %v1721_v42 = vsel %vm543_vm0, %v1705_v38, %v4431_v0  ;;  %v1720_v45 = vsel %vm543_vm0, %v1704_v39, %v4430_v55  ;;  %v4456_v62 = vunpack.i.h.bf16 %v4454_v37  ;;  %v4455_v18 = vunpack.i.l.bf16 %v4454_v37 }
 0x413   : > { %4095 = vmatprep.mubr.msk.bf16.mxu0 %vm1203_vm7, %v1751_v29  ;;  %v4434_v54 = vpop.permute.xlu1 %4433 }
 0x414   : > { %v4436_v40 = vunpack.i.h.bf16 %v4434_v54  ;;  %v4435_v41 = vunpack.i.l.bf16 %v4434_v54  ;;  %v1707_v43 = vsel %vm568_vm6, %v6041_v16, %v4456_v62  ;;  %v1706_v59 = vsel %vm568_vm6, %v6031_v4, %v4455_v18 }
 0x415   : > { %v4459_v63 = vpop.permute.xlu0 %4458 }
 0x416   : > { %v1737_v46 = vsel %vm1734_vm10, %v1720_v45, %v4435_v41  ;;  %v1738_v48 = vsel %vm1734_vm10, %v1721_v42, %v4436_v40  ;;  %v4461_v50 = vunpack.i.h.bf16 %v4459_v63  ;;  %v4460_v52 = vunpack.i.l.bf16 %v4459_v63 }
 0x417   : > { %v1752_v49 = vpack.c.bf16 %v1738_v48, %v1737_v46  ;;  %v4439_v3 = vpop.permute.xlu1 %4438 }
 0x418   : > { %v1722_v60 = vsel %vm543_vm0, %v1706_v59, %v4460_v52  ;;  %v1723_v61 = vsel %vm543_vm0, %v1707_v43, %v4461_v50  ;;  %v4441_v2 = vunpack.i.h.bf16 %v4439_v3  ;;  %v4440_v6 = vunpack.i.l.bf16 %v4439_v3 }
 0x419   : > { %4096 = vmatmul.mubr.msk.bf16.vlgmr.msra.gmra.mrb[16].mxu0 %vm1203_vm7, %v1752_v49  ;;  %v4464_v58 = vpop.permute.xlu0 %4463 }
 0x41a   : > { %v4466_v53 = vunpack.i.h.bf16 %v4464_v58  ;;  %v4465_v19 = vunpack.i.l.bf16 %v4464_v58  ;;  %v1709_v4 = vsel %vm568_vm6, %v6053_v35, %v4441_v2  ;;  %v1708_v15 = vsel %vm568_vm6, %v6046_v23, %v4440_v6 }
 0x41b   : > { %v4444_v1 = vpop.permute.xlu1 %4443 }
 0x41c   : > { %v1739_v7 = vsel %vm1734_vm10, %v1722_v60, %v4465_v19  ;;  %v1740_v11 = vsel %vm1734_vm10, %v1723_v61, %v4466_v53  ;;  %v4446_v22 = vunpack.i.h.bf16 %v4444_v1  ;;  %v4445_v12 = vunpack.i.l.bf16 %v4444_v1 }
 0x41d   : > { %v1753_v31 = vpack.c.bf16 %v1740_v11, %v1739_v7  ;;  %v4474_v16 = vpop.permute.xlu0 %4473 }
 0x41e   : > { %v1724_v14 = vsel %vm543_vm0, %v1708_v15, %v4445_v12  ;;  %v1725_v20 = vsel %vm543_vm0, %v1709_v4, %v4446_v22  ;;  %v4476_v9 = vunpack.i.h.bf16 %v4474_v16  ;;  %v4475_v25 = vunpack.i.l.bf16 %v4474_v16 }
 0x41f   : > { %v4449_v13 = vpop.permute.xlu1 %4448  ;;  %4099 = vmatprep.mubr.msk.bf16.mxu0 %vm1203_vm7, %v1753_v31 }
 0x420   : > { %v4451_v28 = vunpack.i.h.bf16 %v4449_v13  ;;  %v4450_v36 = vunpack.i.l.bf16 %v4449_v13  ;;  %v1711_v23 = vsel %vm568_vm6, %v6064_v44, %v4476_v9  ;;  %v1710_v10 = vsel %vm568_vm6, %v1453_v33, %v4475_v25 }
 0x421   : > { %v4479_v24 = vpop.permute.xlu0 %4478 }
 0x422   : > { %v1741_v27 = vsel %vm1734_vm10, %v1724_v14, %v4450_v36  ;;  %v1742_v21 = vsel %vm1734_vm10, %v1725_v20, %v4451_v28  ;;  %v4481_v30 = vunpack.i.h.bf16 %v4479_v24  ;;  %v4480_v32 = vunpack.i.l.bf16 %v4479_v24  ;;  %v2144_v20 = vld [vmem:[#allocation4 + $0x11] ss:$2 sm:$0xf] }
 0x423   : > { %v1754_v17 = vpack.c.bf16 %v1742_v21, %v1741_v27  ;;  %v4469_v35 = vpop.permute.xlu1 %4468  ;;  %v2146_v24 = vld [vmem:[#allocation4 + $0x31] ss:$2 sm:$0xf] }
 0x424   : > { %v1726_v0 = vsel %vm543_vm0, %v1710_v10, %v4480_v32  ;;  %v1727_v55 = vsel %vm543_vm0, %v1711_v23, %v4481_v30  ;;  %v4471_v54 = vunpack.i.h.bf16 %v4469_v35  ;;  %v4470_v38 = vunpack.i.l.bf16 %v4469_v35  ;;  %v2150_v30 = vld [vmem:[#allocation4 + $0x71] ss:$2 sm:$0xf] }
 0x425   : > { %v4484_v34 = vpop.permute.xlu0 %4483  ;;  %4100 = vmatmul.mubr.msk.bf16.gmra.mrb[20].mxu0 %vm1203_vm7, %v1754_v17  ;;  %v2148_v17 = vld [vmem:[#allocation4 + $0x51] ss:$2 sm:$0xf] }
 0x426   : > { %v4486_v47 = vunpack.i.h.bf16 %v4484_v34  ;;  %v4485_v29 = vunpack.i.l.bf16 %v4484_v34  ;;  %v1713_v62 = vsel %vm568_vm6, %v6077_v56, %v4471_v54  ;;  %v1712_v18 = vsel %vm568_vm6, %v6069_v51, %v4470_v38  ;;  %v2081_v38 = vld [vmem:[#allocation4] ss:$2 sm:$0xf] }
 0x427   : > { %v4489_v37 = vpop.permute.xlu1 %4488 }
 0x428   : > { %v1743_v39 = vsel %vm1734_vm10, %v1726_v0, %v4485_v29  ;;  %v1744_v40 = vsel %vm1734_vm10, %v1727_v55, %v4486_v47  ;;  %v4491_v42 = vunpack.i.h.bf16 %v4489_v37  ;;  %v4490_v45 = vunpack.i.l.bf16 %v4489_v37 }
 0x429   : > { %v1755_v41 = vpack.c.bf16 %v1744_v40, %v1743_v39  ;;  %v4509_v63 = vpop.permute.xlu0 %4508  ;;  %v2461_v29 = vcombine.low %v2144_v20, %v2146_v24  ;;  %v2462_v0 = vcombine.low %v2148_v17, %v2150_v30 }
 0x42a   : > { %v1728_v49 = vsel %vm543_vm0, %v1712_v18, %v4490_v45  ;;  %v1729_v50 = vsel %vm543_vm0, %v1713_v62, %v4491_v42  ;;  %v4511_v3 = vunpack.i.h.bf16 %v4509_v63  ;;  %v4510_v58 = vunpack.i.l.bf16 %v4509_v63  ;;  %v2083_v45 = vld [vmem:[#allocation4 + $0x20] ss:$2 sm:$0xf] }
 0x42b   : > { %v4494_v44 = vpop.permute.xlu1 %4493  ;;  %4103 = vmatprep.mubr.msk.bf16.mxu0 %vm1203_vm7, %v1755_v41  ;;  %v2087_v63 = vld [vmem:[#allocation4 + $0x60] ss:$2 sm:$0xf] }
 0x42c   : > { %v4496_v46 = vunpack.i.h.bf16 %v4494_v44  ;;  %v4495_v48 = vunpack.i.l.bf16 %v4494_v44  ;;  %v1715_v51 = vsel %vm568_vm6, %v6085_v5, %v4511_v3  ;;  %v1714_v1 = vsel %vm568_vm6, %v6079_v57, %v4510_v58 }
 0x42d   : > { %v4514_v52 = vpop.permute.xlu0 %4513 }
 0x42e   : > { %v1745_v43 = vsel %vm1734_vm10, %v1728_v49, %v4495_v48  ;;  %v1746_v59 = vsel %vm1734_vm10, %v1729_v50, %v4496_v46  ;;  %v4516_v19 = vunpack.i.h.bf16 %v4514_v52  ;;  %v4515_v60 = vunpack.i.l.bf16 %v4514_v52  ;;  %v2085_v49 = vld [vmem:[#allocation4 + $0x40] ss:$2 sm:$0xf] }
 0x42f   : > { %v1756_v53 = vpack.c.bf16 %v1746_v59, %v1745_v43  ;;  %v4499_v56 = vpop.permute.xlu1 %4498  ;;  %v2373_v43 = vcombine.low %v2081_v38, %v2083_v45  ;;  %v2374_v59 = vcombine.low %v2085_v49, %v2087_v63  ;;  %v4699_v49 = vld [vmem:[#allocation18 + $0xd0] sm:$0xff]  }
 0x430   : > { %v1730_v7 = vsel %vm543_vm0, %v1714_v1, %v4515_v60  ;;  %v1731_v11 = vsel %vm543_vm0, %v1715_v51, %v4516_v19  ;;  %v4501_v22 = vunpack.i.h.bf16 %v4499_v56  ;;  %v4500_v12 = vunpack.i.l.bf16 %v4499_v56  ;;  %v2152_v51 = vld [vmem:[#allocation4 + $0xb1] ss:$2 sm:$0xf] }
 0x431   : > { %v4519_v61 = vpop.permute.xlu0 %4518  ;;  %4104 = vmatmul.mubr.msk.bf16.gmra.mrb[24].mxu0 %vm1203_vm7, %v1756_v53  ;;  %v2154_v1 = vld [vmem:[#allocation4 + $0xd1] ss:$2 sm:$0xf] }
 0x432   : > { %v4521_v2 = vunpack.i.h.bf16 %v4519_v61  ;;  %v4520_v6 = vunpack.i.l.bf16 %v4519_v61  ;;  %v1717_v57 = vsel %vm568_vm6, %v6094_v26, %v4501_v22  ;;  %v1716_v14 = vsel %vm568_vm6, %v6088_v8, %v4500_v12 }
 0x433   : > { %v4504_v31 = vpop.permute.xlu1 %4503 }
 0x434   : > { %v1747_v16 = vsel %vm1734_vm10, %v1730_v7, %v4520_v6  ;;  %v1748_v13 = vsel %vm1734_vm10, %v1731_v11, %v4521_v2  ;;  %v4506_v15 = vunpack.i.h.bf16 %v4504_v31  ;;  %v4505_v28 = vunpack.i.l.bf16 %v4504_v31  ;;  %v2156_v7 = vld [vmem:[#allocation4 + $0xf1] ss:$2 sm:$0xf] }
 0x435   : > { %v1757_v4 = vpack.c.bf16 %v1748_v13, %v1747_v16  ;;  %v4529_v5 = vpop.permute.xlu0 %4528  ;;  %v2158_v11 = vld [vmem:[#allocation4 + $0x111] ss:$2 sm:$0xf] }
 0x436   : > { %v1732_v27 = vsel %vm543_vm0, %v1716_v14, %v4505_v28  ;;  %v1733_v21 = vsel %vm543_vm0, %v1717_v57, %v4506_v15  ;;  %v4531_v35 = vunpack.i.h.bf16 %v4529_v5  ;;  %v4530_v33 = vunpack.i.l.bf16 %v4529_v5 }
 0x437   : > { %v4524_v36 = vpop.permute.xlu1 %4523  ;;  %4107 = vmatprep.mubr.msk.bf16.mxu0 %vm1203_vm7, %v1757_v4  ;;  %v2463_v4 = vcombine.low %v2152_v51, %v2154_v1  ;;  %v2464_v15 = vcombine.low %v2156_v7, %v2158_v11 }
 0x438   : > { %v4526_v9 = vunpack.i.h.bf16 %v4524_v36  ;;  %v4525_v25 = vunpack.i.l.bf16 %v4524_v36  ;;  %v2730_v37 = vsel %vm543_vm0, %v2462_v0, %v4531_v35  ;;  %v2729_v54 = vsel %vm543_vm0, %v2461_v29, %v4530_v33  ;;  %v2089_v35 = vld [vmem:[#allocation4 + $0xa0] ss:$2 sm:$0xf] }
 0x439   : > { %v4539_v32 = vpop.permute.xlu0 %4538  ;;  %v2091_v33 = vld [vmem:[#allocation4 + $0xc0] ss:$2 sm:$0xf] }
 0x43a   : > { %v1749_v34 = vsel %vm1734_vm10, %v1732_v27, %v4525_v25  ;;  %v1750_v26 = vsel %vm1734_vm10, %v1733_v21, %v4526_v9  ;;  %v4541_v10 = vunpack.i.h.bf16 %v4539_v32  ;;  %v4540_v8 = vunpack.i.l.bf16 %v4539_v32 }
 0x43b   : > { %v1758_v23 = vpack.c.bf16 %v1750_v26, %v1749_v34  ;;  %v4534_v47 = vpop.permute.xlu1 %4533  ;;  %v2095_v34 = vld [vmem:[#allocation4 + $0x100] ss:$2 sm:$0xf]  ;;  %v2375_v0 = vcombine.low %v2089_v35, %v2091_v33 }
 0x43c   : > { %v2733_v41 = vsel %vm1203_vm7, %v2729_v54, %v4540_v8  ;;  %v2734_v42 = vsel %vm1203_vm7, %v2730_v37, %v4541_v10  ;;  %v4536_v62 = vunpack.i.h.bf16 %v4534_v47  ;;  %v4535_v18 = vunpack.i.l.bf16 %v4534_v47  ;;  %v2093_v8 = vld [vmem:[#allocation4 + $0xe0] ss:$2 sm:$0xf] }
 0x43d   : > { %v4549_v55 = vpop.permute.xlu0 %4548  ;;  %4108 = vmatmul.mubr.msk.bf16.gmra.mrb[28].mxu0 %vm1203_vm7, %v1758_v23 }
 0x43e   : > { %v4551_v39 = vunpack.i.h.bf16 %v4549_v55  ;;  %v4550_v40 = vunpack.i.l.bf16 %v4549_v55  ;;  %v2718_v19 = vsel %vm543_vm0, %v2374_v59, %v4536_v62  ;;  %v2717_v60 = vsel %vm543_vm0, %v2373_v43, %v4535_v18  ;;  %v4695_v62 = vld [vmem:[#allocation18 + $0xc0] sm:$0xff]  }
 0x43f   : > { %v4544_v44 = vpop.permute.xlu1 %4543  ;;  %v2376_v55 = vcombine.low %v2093_v8, %v2095_v34  ;;  %v4696_v18 = vld [vmem:[#allocation18 + $0x80] sm:$0xff]   ;;  %3997 = vmatprep.subr.bf16.mxu0 %v4695_v62 }
 0x440   : > { %v2737_v46 = vsel %vm1220_vm8, %v2733_v41, %v4550_v40  ;;  %v2738_v48 = vsel %vm1220_vm8, %v2734_v42, %v4551_v39  ;;  %v4546_v50 = vunpack.i.h.bf16 %v4544_v44  ;;  %v4545_v52 = vunpack.i.l.bf16 %v4544_v44  ;;  %3998 = vmatpush3.bf16.msra.mxu0 %v4696_v18 }
 0x441   : > { %v4569_v3 = vpop.permute.xlu0 %4568  ;;  %v2810_v58 = vpack.c.bf16 %v2738_v48, %v2737_v46  ;;  %v4697_v46 = vld [vmem:[#allocation18 + $0xc8] sm:$0xff]  }
 0x442   : > { %v2721_v2 = vsel %vm1203_vm7, %v2717_v60, %v4545_v52  ;;  %v2722_v6 = vsel %vm1203_vm7, %v2718_v19, %v4546_v50  ;;  %v4571_v36 = vunpack.i.h.bf16 %v4569_v3  ;;  %v4570_v57 = vunpack.i.l.bf16 %v4569_v3  ;;  %v4698_v48 = vld [vmem:[#allocation18 + $0x88] sm:$0xff]   ;;  %3999 = vmatprep.subr.bf16.mxu0 %v4697_v46  ;;  %v4700_v50 = vld [vmem:[#allocation18 + $0x90] sm:$0xff]   ;;  %v4701_v52 = vld [vmem:[#allocation18 + $0xd8] sm:$0xff]  }
 0x443   : > { %v4554_v53 = vpop.permute.xlu1 %4553  ;;  %3152 = vmatprep.mubr.bf16.mxu1 %v2810_v58  ;;  %v4702_v3 = vld [vmem:[#allocation18 + $0x98] sm:$0xff]  }
 0x444   : > { %v4556_v56 = vunpack.i.h.bf16 %v4554_v53  ;;  %v4555_v61 = vunpack.i.l.bf16 %v4554_v53  ;;  %4000 = vmatpush3.bf16.msra.mxu0 %v4698_v48  ;;  %v6207_v58 = vld [vmem:[#allocation17] ss:$0 sm:$0xff] }
 0x445   : > { %v4579_v16 = vpop.permute.xlu0 %4578  ;;  %4001 = vmatprep.subr.bf16.mxu0 %v4699_v49 }
 0x446   : > { %v2725_v31 = vsel %vm1220_vm8, %v2721_v2, %v4555_v61  ;;  %v2726_v22 = vsel %vm1220_vm8, %v2722_v6, %v4556_v56  ;;  %v4581_v14 = vunpack.i.h.bf16 %v4579_v16  ;;  %v4580_v20 = vunpack.i.l.bf16 %v4579_v16 }
 0x447   : > { %v2809_v12 = vpack.c.bf16 %v2726_v22, %v2725_v31  ;;  %v4559_v13 = vpop.permute.xlu1 %4558 }
 0x448   : > { %v4561_v28 = vunpack.i.h.bf16 %v4559_v13  ;;  %v4560_v5 = vunpack.i.l.bf16 %v4559_v13  ;;  %4002 = vmatpush3.bf16.msra.mxu0 %v4700_v50 }
 0x449   : > { %3153 = vmatmul.mubr.bf16.vlgmr.msra.gmra.mrb[16].mxu1 %v2809_v12  ;;  %4003 = vmatprep.subr.bf16.mxu0 %v4701_v52 }
 0x44a   : > { %v2732_v24 = vsel %vm543_vm0, %v2464_v15, %v4561_v28  ;;  %v2731_v9 = vsel %vm543_vm0, %v2463_v4, %v4560_v5 }
 0x44b   : > { %v4564_v25 = vpop.permute.xlu1 %4563  ;;  %v2735_v27 = vsel %vm1203_vm7, %v2731_v9, %v4570_v57  ;;  %v2736_v21 = vsel %vm1203_vm7, %v2732_v24, %v4571_v36  ;;  %v2223_v24 = vld [vmem:[#allocation5] ss:$2 sm:$0xf] }
 0x44c   : > { %v2739_v17 = vsel %vm1220_vm8, %v2735_v27, %v4580_v20  ;;  %v2740_v30 = vsel %vm1220_vm8, %v2736_v21, %v4581_v14  ;;  %v4566_v23 = vunpack.i.h.bf16 %v4564_v25  ;;  %v4565_v10 = vunpack.i.l.bf16 %v4564_v25  ;;  %4004 = vmatpush3.bf16.msra.mxu0 %v4702_v3  ;;  %v4703_v25 = vld [vmem:[#allocation18 + $0xe0] sm:$0xff]  }
 0x44d   : > { %v2815_v32 = vpack.c.bf16 %v2740_v30, %v2739_v17  ;;  %v4704_v27 = vld [vmem:[#allocation18 + $0xa0] sm:$0xff]   ;;  %v4705_v30 = vld [vmem:[#allocation18 + $0xe8] sm:$0xff]   ;;  %4005 = vmatprep.subr.bf16.mxu0 %v4703_v25 }
 0x44e   : > { %v2720_v54 = vsel %vm543_vm0, %v2376_v55, %v4566_v23  ;;  %v2719_v38 = vsel %vm543_vm0, %v2375_v0, %v4565_v10  ;;  %v4706_v55 = vld [vmem:[#allocation18 + $0xa8] sm:$0xff]  }
 0x44f   : > { %v4574_v26 = vpop.permute.xlu1 %4573  ;;  %3160 = vmatprep.mubr.bf16.mxu1 %v2815_v32 }
 0x450   : > { %v4576_v47 = vunpack.i.h.bf16 %v4574_v26  ;;  %v4575_v29 = vunpack.i.l.bf16 %v4574_v26  ;;  %4006 = vmatpush3.bf16.msra.mxu0 %v4704_v27 }
 0x451   : > { %4007 = vmatprep.subr.bf16.mxu0 %v4705_v30 }
 0x452   : > { %v2723_v41 = vsel %vm1203_vm7, %v2719_v38, %v4575_v29  ;;  %v2724_v42 = vsel %vm1203_vm7, %v2720_v54, %v4576_v47 }
 0x453   : > { %v4584_v37 = vpop.permute.xlu1 %4583 }
 0x454   : > { %v4586_v39 = vunpack.i.h.bf16 %v4584_v37  ;;  %v4585_v40 = vunpack.i.l.bf16 %v4584_v37  ;;  %4008 = vmatpush3.bf16.msra.mxu0 %v4706_v55 }
 0x456   : > { %v2727_v45 = vsel %vm1220_vm8, %v2723_v41, %v4585_v40  ;;  %v2728_v63 = vsel %vm1220_vm8, %v2724_v42, %v4586_v39  ;;  %v2239_v41 = vld [vmem:[#allocation5 + $0x1] ss:$2 sm:$0xf] }
 0x457   : > { %v2814_v44 = vpack.c.bf16 %v2728_v63, %v2727_v45  ;;  %v4707_v63 = vld [vmem:[#allocation18 + $0xf0] sm:$0xff]  }
 0x458   : > { %4009 = vmatprep.subr.bf16.mxu0 %v4707_v63 }
 0x459   : > { %3161 = vmatmul.mubr.bf16.gmra.mrb[20].mxu1 %v2814_v44 }
 0x4ec   : > { %v4097_v43 = vpop.f32.mrb[16].mxu0 }
 0x4ed   : > { %v1865_v59 = vadd.f32 %v4097_v43, %v6207_v58  ;;  %v1856_v53 = vpop.f32.mrb[17].mxu0 }
 0x4ee   : > { %v1857_v19 = vadd.f32 %v6207_v58, %v1856_v53  ;;  %v4098_v60 = vpop.f32.mrb[18].mxu0 }
 0x4ef   : > { %v1921_v56 = vmax.f32 %v1865_v59, 0.0  ;;  %v1868_v61 = vadd.f32 %v4098_v60, %v6207_v58  ;;  %v1859_v51 = vpop.f32.mrb[19].mxu0 }
 0x4f0   : > { %v1919_v1 = vmax.f32 %v1857_v19, 0.0  ;;  %v1860_v2 = vadd.f32 %v6207_v58, %v1859_v51 }
 0x4f1   : > { %2067 = vst.msk [vmem:[#allocation5 + $0x31] sm:$0xff] %vm543_vm0, %v1921_v56  ;;  %v1922_v6 = vmax.f32 %v1868_v61, 0.0  ;;  %v4708_v56 = vld [vmem:[#allocation18 + $0xb0] sm:$0xff]  }
 0x4f2   : > { %2065 = vst.msk [vmem:[#allocation5 + $0x11] sm:$0xff] %vm543_vm0, %v1919_v1  ;;  %v1920_v7 = vmax.f32 %v1860_v2, 0.0  ;;  %4010 = vmatpush3.bf16.msra.mxu0 %v4708_v56 }
 0x4f3   : > { %2068 = vst.msk [vmem:[#allocation5 + $0x41] sm:$0xff] %vm543_vm0, %v1922_v6 }
 0x4f4   : > { %2066 = vst.msk [vmem:[#allocation5 + $0x21] sm:$0xff] %vm543_vm0, %v1920_v7 }
 0x4f8   : > { %v4101_v11 = vpop.f32.mrb[20].mxu0  ;;  %v2288_v20 = vld [vmem:[#allocation5 + $0x31] ss:$2 sm:$0xf] }
 0x4f9   : > { %v1881_v31 = vadd.f32 %v4101_v11, %v6207_v58  ;;  %v1872_v22 = vpop.f32.mrb[21].mxu0  ;;  %v2286_v14 = vld [vmem:[#allocation5 + $0x11] ss:$2 sm:$0xf] }
 0x4fa   : > { %v1873_v12 = vadd.f32 %v6207_v58, %v1872_v22  ;;  %v4102_v16 = vpop.f32.mrb[22].mxu0  ;;  %v2227_v34 = vld [vmem:[#allocation5 + $0x40] ss:$2 sm:$0xf]  ;;  %v2653_v47 = vcombine.low %v2286_v14, %v2288_v20 }
 0x4fb   : > { %v1925_v13 = vmax.f32 %v1881_v31, 0.0  ;;  %v1884_v4 = vadd.f32 %v4102_v16, %v6207_v58  ;;  %v1875_v15 = vpop.f32.mrb[23].mxu0  ;;  %v2225_v9 = vld [vmem:[#allocation5 + $0x20] ss:$2 sm:$0xf]  ;;  %v4710_v16 = vld [vmem:[#allocation18 + $0xb8] sm:$0xff]  }
 0x4fc   : > { %v1923_v28 = vmax.f32 %v1873_v12, 0.0  ;;  %v1876_v5 = vadd.f32 %v6207_v58, %v1875_v15  ;;  %v2302_v26 = vld [vmem:[#allocation5 + $0x12] ss:$2 sm:$0xf]  ;;  %v2565_v40 = vcombine.low %v2223_v24, %v2225_v9 }
 0x4fd   : > { %2071 = vst.msk [vmem:[#allocation5 + $0x71] sm:$0xff] %vm543_vm0, %v1925_v13  ;;  %v1926_v36 = vmax.f32 %v1884_v4, 0.0  ;;  %v2304_v23 = vld [vmem:[#allocation5 + $0x32] ss:$2 sm:$0xf] }
 0x4fe   : > { %2069 = vst.msk [vmem:[#allocation5 + $0x51] sm:$0xff] %vm543_vm0, %v1923_v28  ;;  %v1924_v57 = vmax.f32 %v1876_v5, 0.0  ;;  %v2241_v42 = vld [vmem:[#allocation5 + $0x21] ss:$2 sm:$0xf]  ;;  %v2677_v53 = vcombine.low %v2302_v26, %v2304_v23  ;;  %v4709_v12 = vld [vmem:[#allocation18 + $0xf8] sm:$0xff]  }
 0x4ff   : > { %2072 = vst.msk [vmem:[#allocation5 + $0x81] sm:$0xff] %vm543_vm0, %v1926_v36  ;;  %v2243_v45 = vld [vmem:[#allocation5 + $0x41] ss:$2 sm:$0xf]  ;;  %v2589_v2 = vcombine.low %v2239_v41, %v2241_v42  ;;  %4011 = vmatprep.subr.bf16.mxu0 %v4709_v12 }
 0x500   : > { %2070 = vst.msk [vmem:[#allocation5 + $0x61] sm:$0xff] %vm543_vm0, %v1924_v57  ;;  %v2318_v3 = vld [vmem:[#allocation5 + $0x20] ss:$2 sm:$0xf]  ;;  %4012 = vmatpush3.bf16.msra.mxu0 %v4710_v16 }
 0x501   : > { %v2320_v61 = vld [vmem:[#allocation5 + $0x40] ss:$2 sm:$0xf] }
 0x502   : > { %v2701_v31 = vcombine.low %v2318_v3, %v2320_v61  ;;  %v2255_v22 = vld [vmem:[#allocation5 + $0x2] ss:$2 sm:$0xf] }
 0x503   : > { %v2257_v13 = vld [vmem:[#allocation5 + $0x22] ss:$2 sm:$0xf] }
 0x504   : > { %v4105_v21 = vpop.f32.mrb[24].mxu0  ;;  %v2292_v17 = vld [vmem:[#allocation5 + $0x71] ss:$2 sm:$0xf]  ;;  %v2613_v24 = vcombine.low %v2255_v22, %v2257_v13 }
 0x505   : > { %v1897_v32 = vadd.f32 %v4105_v21, %v6207_v58  ;;  %v1888_v35 = vpop.f32.mrb[25].mxu0  ;;  %v2290_v33 = vld [vmem:[#allocation5 + $0x51] ss:$2 sm:$0xf] }
 0x506   : > { %v1889_v10 = vadd.f32 %v6207_v58, %v1888_v35  ;;  %v4106_v8 = vpop.f32.mrb[26].mxu0  ;;  %v2654_v29 = vcombine.low %v2290_v33, %v2292_v17  ;;  %v2306_v0 = vld [vmem:[#allocation5 + $0x52] ss:$2 sm:$0xf] }
 0x507   : > { %v1929_v37 = vmax.f32 %v1897_v32, 0.0  ;;  %v1900_v54 = vadd.f32 %v4106_v8, %v6207_v58  ;;  %v1891_v38 = vpop.f32.mrb[27].mxu0  ;;  %v2229_v39 = vld [vmem:[#allocation5 + $0x60] ss:$2 sm:$0xf] }
 0x508   : > { %v1927_v44 = vmax.f32 %v1889_v10, 0.0  ;;  %v1892_v62 = vadd.f32 %v6207_v58, %v1891_v38  ;;  %v4587_v18 = vpack.i.bf16 %v2654_v29, %v2653_v47  ;;  %v2566_v46 = vcombine.low %v2227_v34, %v2229_v39  ;;  %v2308_v48 = vld [vmem:[#allocation5 + $0x72] ss:$2 sm:$0xf] }
 0x509   : > { %2075 = vst.msk [vmem:[#allocation5 + $0xd1] sm:$0xff] %vm543_vm0, %v1929_v37  ;;  %v1930_v49 = vmax.f32 %v1900_v54, 0.0  ;;  %v2678_v50 = vcombine.low %v2306_v0, %v2308_v48  ;;  %v2245_v52 = vld [vmem:[#allocation5 + $0x61] ss:$2 sm:$0xf]  ;;  %v4711_v10 = vld [vmem:[#allocation18 + $0x100] sm:$0xff]  }
 0x50a   : > { %2073 = vst.msk [vmem:[#allocation5 + $0xb1] sm:$0xff] %vm543_vm0, %v1927_v44  ;;  %v1928_v43 = vmax.f32 %v1892_v62, 0.0  ;;  %4588 = vrot.lane.b32.xlu0 %v4587_v18, %s5130_s30  ;;  %v4597_v59 = vpack.i.bf16 %v2566_v46, %v2565_v40  ;;  %v2590_v19 = vcombine.low %v2243_v45, %v2245_v52  ;;  %v2322_v60 = vld [vmem:[#allocation5 + $0x60] ss:$2 sm:$0xf]  ;;  %4111 = vmatprep.subr.bf16.mxu1 %v4711_v10 }
 0x50b   : > { %2076 = vst.msk [vmem:[#allocation5 + $0xe1] sm:$0xff] %vm543_vm0, %v1930_v49  ;;  %v2324_v51 = vld [vmem:[#allocation5 + $0x80] ss:$2 sm:$0xf]  ;;  %v4592_v1 = vpack.i.bf16 %v2678_v50, %v2677_v53  ;;  %4112 = vmatpush3.bf16.msra.mxu1 %v4711_v10 }
 0x50c   : > { %2074 = vst.msk [vmem:[#allocation5 + $0xc1] sm:$0xff] %vm543_vm0, %v1928_v43  ;;  %4598 = vrot.lane.b32.xlu1 %v4597_v59, %s5130_s30  ;;  %v2702_v6 = vcombine.low %v2322_v60, %v2324_v51  ;;  %v2261_v7 = vld [vmem:[#allocation5 + $0x62] ss:$2 sm:$0xf]  ;;  %v4602_v11 = vpack.i.bf16 %v2590_v19, %v2589_v2 }
 0x50d   : > { %v2259_v4 = vld [vmem:[#allocation5 + $0x42] ss:$2 sm:$0xf]  ;;  %v2247_v44 = vld [vmem:[#allocation5 + $0xa1] ss:$2 sm:$0xf] }
 0x50e   : > { %4593 = vrot.lane.b32.xlu0 %v4592_v1, %s5131_s12  ;;  %v4607_v28 = vpack.i.bf16 %v2702_v6, %v2701_v31  ;;  %v2614_v5 = vcombine.low %v2259_v4, %v2261_v7  ;;  %v2231_v26 = vld [vmem:[#allocation5 + $0xa0] ss:$2 sm:$0xf] }
 0x50f   : > { %v4712_v54 = vld [vmem:[#allocation18 + $0x108] sm:$0xff]   ;;  %v4713_v46 = vld [vmem:[#allocation18 + $0x110] sm:$0xff]  }
 0x510   : > { %v4109_v15 = vpop.f32.mrb[28].mxu0  ;;  %4603 = vrot.lane.b32.xlu1 %v4602_v11, %s5131_s12  ;;  %v4612_v30 = vpack.i.bf16 %v2614_v5, %v2613_v24  ;;  %v2296_v34 = vld [vmem:[#allocation5 + $0xd1] ss:$2 sm:$0xf]  ;;  %4113 = vmatprep.subr.bf16.mxu1 %v4712_v54 }
 0x511   : > { %v1913_v36 = vadd.f32 %v4109_v15, %v6207_v58  ;;  %v1904_v57 = vpop.f32.mrb[29].mxu0  ;;  %v2294_v33 = vld [vmem:[#allocation5 + $0xb1] ss:$2 sm:$0xf]  ;;  %4114 = vmatpush3.bf16.msra.mxu1 %v4712_v54 }
 0x512   : > { %v1905_v14 = vadd.f32 %v6207_v58, %v1904_v57  ;;  %v4110_v20 = vpop.f32.mrb[30].mxu0  ;;  %4608 = vrot.lane.b32.xlu0 %v4607_v28, %s5132_s28  ;;  %v2235_v0 = vld [vmem:[#allocation5 + $0xe0] ss:$2 sm:$0xf]  ;;  %v2655_v40 = vcombine.low %v2294_v33, %v2296_v34  ;;  %4115 = vmatprep.subr.bf16.mxu1 %v4713_v46 }
 0x513   : > { %v1933_v9 = vmax.f32 %v1913_v36, 0.0  ;;  %v1916_v25 = vadd.f32 %v4110_v20, %v6207_v58  ;;  %v1907_v27 = vpop.f32.mrb[31].mxu0  ;;  %v2233_v23 = vld [vmem:[#allocation5 + $0xc0] ss:$2 sm:$0xf]  ;;  %v4714_v20 = vld [vmem:[#allocation18 + $0x118] sm:$0xff]  }
 0x514   : > { %v1931_v21 = vmax.f32 %v1905_v14, 0.0  ;;  %v1908_v17 = vadd.f32 %v6207_v58, %v1907_v27  ;;  %v2310_v55 = vld [vmem:[#allocation5 + $0xb2] ss:$2 sm:$0xf]  ;;  %v2567_v50 = vcombine.low %v2231_v26, %v2233_v23 }
 0x515   : > { %2079 = vst.msk [vmem:[#allocation5 + $0x111] sm:$0xff] %vm543_vm0, %v1933_v9  ;;  %v1934_v32 = vmax.f32 %v1916_v25, 0.0  ;;  %v2312_v37 = vld [vmem:[#allocation5 + $0xd2] ss:$2 sm:$0xf]  ;;  %4116 = vmatpush3.bf16.msra.mxu1 %v4713_v46 }
 0x516   : > { %2077 = vst.msk [vmem:[#allocation5 + $0xf1] sm:$0xff] %vm543_vm0, %v1931_v21  ;;  %v1932_v35 = vmax.f32 %v1908_v17, 0.0  ;;  %4613 = vrot.lane.b32.xlu0 %v4612_v30, %s5132_s28  ;;  %v2249_v62 = vld [vmem:[#allocation5 + $0xc1] ss:$2 sm:$0xf]  ;;  %v2679_v56 = vcombine.low %v2310_v55, %v2312_v37  ;;  %4117 = vmatprep.subr.bf16.mxu1 %v4714_v20 }
 0x517   : > { %2080 = vst.msk [vmem:[#allocation5 + $0x121] sm:$0xff] %vm543_vm0, %v1934_v32  ;;  %v2251_v18 = vld [vmem:[#allocation5 + $0xe1] ss:$2 sm:$0xf]  ;;  %v2591_v11 = vcombine.low %v2247_v44, %v2249_v62 }
 0x518   : > { %2078 = vst.msk [vmem:[#allocation5 + $0x101] sm:$0xff] %vm543_vm0, %v1932_v35  ;;  %v2326_v51 = vld [vmem:[#allocation5 + $0xc0] ss:$2 sm:$0xf] }
 0x519   : > { %v2328_v1 = vld [vmem:[#allocation5 + $0xe0] ss:$2 sm:$0xf]  ;;  %4118 = vmatpush3.bf16.msra.mxu1 %v4714_v20  ;;  %v2272_v55 = vld [vmem:[#allocation5 + $0x30] ss:$2 sm:$0xf] }
 0x51a   : > { %v2263_v2 = vld [vmem:[#allocation5 + $0xa2] ss:$2 sm:$0xf]  ;;  %v2703_v28 = vcombine.low %v2326_v51, %v2328_v1  ;;  %v2276_v54 = vld [vmem:[#allocation5 + $0x70] ss:$2 sm:$0xf] }
 0x51b   : > { %v2354_v22 = vld [vmem:[#allocation5 + $0x62] ss:$2 sm:$0xf] }
 0x51c   : > { %v3985_v8 = vpop.f32.mrb[16].mxu1  ;;  %v2300_v58 = vld [vmem:[#allocation5 + $0x111] ss:$2 sm:$0xf] }
 0x51d   : > { %v3986_v47 = vpop.f32.mrb[17].mxu1  ;;  %v2298_v29 = vld [vmem:[#allocation5 + $0xf1] ss:$2 sm:$0xf] }
 0x51e   : > { %v6247_v38 = vadd.f32 %v3986_v47, %v3985_v8  ;;  %v3988_v39 = vpop.f32.mrb[18].mxu1  ;;  %v2656_v41 = vcombine.low %v2298_v29, %v2300_v58  ;;  %v2314_v42 = vld [vmem:[#allocation5 + $0xf2] ss:$2 sm:$0xf] }
 0x51f   : > { %v3989_v45 = vpop.f32.mrb[19].mxu1  ;;  %v2237_v63 = vld [vmem:[#allocation5 + $0x100] ss:$2 sm:$0xf] }
 0x520   : > { %v6249_v48 = vadd.f32 %v3989_v45, %v3988_v39  ;;  %v4617_v49 = vpack.i.bf16 %v2656_v41, %v2655_v40  ;;  %v2568_v52 = vcombine.low %v2235_v0, %v2237_v63  ;;  %v2316_v3 = vld [vmem:[#allocation5 + $0x112] ss:$2 sm:$0xf]  ;;  %v2253_v43 = vld [vmem:[#allocation5 + $0x101] ss:$2 sm:$0xf] }
 0x521   : > { %v2680_v59 = vcombine.low %v2314_v42, %v2316_v3  ;;  %v2330_v53 = vld [vmem:[#allocation5 + $0x100] ss:$2 sm:$0xf]  ;;  %v2592_v61 = vcombine.low %v2251_v18, %v2253_v43  ;;  %v2270_v0 = vld [vmem:[#allocation5 + $0x10] ss:$2 sm:$0xf] }
 0x522   : > { %v2332_v19 = vld [vmem:[#allocation5 + $0x120] ss:$2 sm:$0xf]  ;;  %4618 = vrot.lane.b32.xlu0 %v4617_v49, %s5130_s30  ;;  %v4627_v60 = vpack.i.bf16 %v2568_v52, %v2567_v50  ;;  %v2274_v39 = vld [vmem:[#allocation5 + $0x50] ss:$2 sm:$0xf]  ;;  %v2637_v45 = vcombine.low %v2270_v0, %v2272_v55 }
 0x523   : > { %v2269_v6 = vld [vmem:[#allocation5 + $0x102] ss:$2 sm:$0xf]  ;;  %v4622_v7 = vpack.i.bf16 %v2680_v59, %v2679_v56  ;;  %v2704_v31 = vcombine.low %v2330_v53, %v2332_v19  ;;  %v4632_v15 = vpack.i.bf16 %v2592_v61, %v2591_v11  ;;  %v2638_v63 = vcombine.low %v2274_v39, %v2276_v54 }
 0x524   : > { %4628 = vrot.lane.b32.xlu1 %v4627_v60, %s5130_s30  ;;  %v2356_v12 = vld [vmem:[#allocation5 + $0x82] ss:$2 sm:$0xf] }
 0x525   : > { %v2265_v16 = vld [vmem:[#allocation5 + $0xc2] ss:$2 sm:$0xf]  ;;  %v4637_v24 = vpack.i.bf16 %v2704_v31, %v2703_v28  ;;  %v2790_v25 = vcombine.low %v2354_v22, %v2356_v12 }
 0x526   : > { %v2267_v13 = vld [vmem:[#allocation5 + $0xe2] ss:$2 sm:$0xf]  ;;  %4623 = vrot.lane.b32.xlu0 %v4622_v7, %s5131_s12  ;;  %v2615_v9 = vcombine.low %v2263_v2, %v2265_v16 }
 0x527   : > { %v2350_v4 = vld [vmem:[#allocation5 + $0x22] ss:$2 sm:$0xf]  ;;  %v2616_v5 = vcombine.low %v2267_v13, %v2269_v6 }
 0x528   : > { %v2352_v36 = vld [vmem:[#allocation5 + $0x42] ss:$2 sm:$0xf]  ;;  %4633 = vrot.lane.b32.xlu1 %v4632_v15, %s5131_s12 }
 0x529   : > { %v2362_v57 = vld [vmem:[#allocation5 + $0x102] ss:$2 sm:$0xf]  ;;  %v4647_v17 = vpack.i.bf16 %v2616_v5, %v2615_v9  ;;  %v2789_v30 = vcombine.low %v2350_v4, %v2352_v36 }
 0x52a   : > { %v2364_v14 = vld [vmem:[#allocation5 + $0x122] ss:$2 sm:$0xf]  ;;  %4638 = vrot.lane.b32.xlu0 %v4637_v24, %s5132_s28 }
 0x52b   : > { %v2358_v27 = vld [vmem:[#allocation5 + $0xc2] ss:$2 sm:$0xf]  ;;  %v2792_v32 = vcombine.low %v2362_v57, %v2364_v14  ;;  %v4642_v33 = vpack.i.bf16 %v2790_v25, %v2789_v30 }
 0x52c   : > { %v2360_v21 = vld [vmem:[#allocation5 + $0xe2] ss:$2 sm:$0xf]  ;;  %v3991_v35 = vpop.f32.mrb[20].mxu1  ;;  %4648 = vrot.lane.b32.xlu1 %v4647_v17, %s5132_s28  ;;  %s3539_s28 = scalar_lea.sflag [#allocation8], %s5541_s13 }
 0x52d   : > { %v2791_v34 = vcombine.low %v2358_v27, %v2360_v21  ;;  %v3992_v26 = vpop.f32.mrb[21].mxu1  ;;  %v2210_v18 = vld [vmem:[#allocation4 + $0x42] ss:$2 sm:$0xf] }
 0x52e   : > { %v6257_v23 = vadd.f32 %v3992_v26, %v3991_v35  ;;  %v3994_v10 = vpop.f32.mrb[22].mxu1  ;;  %4643 = vrot.lane.b32.xlu0 %v4642_v33, %s5130_s30  ;;  %v2212_v52 = vld [vmem:[#allocation4 + $0x62] ss:$2 sm:$0xf] }
 0x52f   : > { %v4652_v8 = vpack.i.bf16 %v2792_v32, %v2791_v34  ;;  %v3995_v58 = vpop.f32.mrb[23].mxu1  ;;  %v2214_v3 = vld [vmem:[#allocation4 + $0x82] ss:$2 sm:$0xf] }
 0x530   : > { %v6260_v47 = vadd.f32 %v3995_v58, %v3994_v10  ;;  %v2208_v56 = vld [vmem:[#allocation4 + $0x22] ss:$2 sm:$0xf]  ;;  %v2550_v7 = vcombine.low %v2212_v52, %v2214_v3  ;;  %v2278_v27 = vld [vmem:[#allocation5 + $0xb0] ss:$2 sm:$0xf] }
 0x531   : > { %4653 = vrot.lane.b32.xlu1 %v4652_v8, %s5130_s30  ;;  %v2549_v6 = vcombine.low %v2208_v56, %v2210_v18  ;;  %v2216_v24 = vld [vmem:[#allocation4 + $0xc2] ss:$2 sm:$0xf]  ;;  %v2280_v21 = vld [vmem:[#allocation5 + $0xd0] ss:$2 sm:$0xf] }
 0x532   : > { %v2218_v9 = vld [vmem:[#allocation4 + $0xe2] ss:$2 sm:$0xf]  ;;  %v2282_v32 = vld [vmem:[#allocation5 + $0xf0] ss:$2 sm:$0xf]  ;;  %v2639_v54 = vcombine.low %v2278_v27, %v2280_v21 }
 0x533   : > { %v2220_v17 = vld [vmem:[#allocation4 + $0x102] ss:$2 sm:$0xf]  ;;  %v2284_v35 = vld [vmem:[#allocation5 + $0x110] ss:$2 sm:$0xf] }
 0x534   : > { %v2222_v30 = vld [vmem:[#allocation4 + $0x122] ss:$2 sm:$0xf]  ;;  %v2334_v10 = vld [vmem:[#allocation5 + $0x21] ss:$2 sm:$0xf]  ;;  %v2640_v39 = vcombine.low %v2282_v32, %v2284_v35 }
 0x535   : > { %v2336_v8 = vld [vmem:[#allocation5 + $0x41] ss:$2 sm:$0xf]  ;;  %v4715_v32 = vld [vmem:[#allocation21] sm:$0xff]   ;;  %s6502_s30 = sld [smem:[#allocation35_spill]] }
 0x536   : > { %v2340_v52 = vld [vmem:[#allocation5 + $0x81] ss:$2 sm:$0xf]  ;;  %4123 = vmatprep.subr.bf16.mxu0 %v4715_v32 }
 0x537   : > { %v2344_v56 = vld [vmem:[#allocation5 + $0xe1] ss:$2 sm:$0xf] }
 0x538   : > { %v4716_v35 = vld [vmem:[#allocation21 + $0x8] sm:$0xff]  }
 0x57c   : > { %v4589_v29 = vpop.permute.xlu0 %4588 }
 0x57d   : > { %v4591_v40 = vunpack.i.h.bf16 %v4589_v29  ;;  %v4590_v41 = vunpack.i.l.bf16 %v4589_v29 }
 0x57e   : > { %v4599_v37 = vpop.permute.xlu1 %4598 }
 0x57f   : > { %v2753_v49 = vsel %vm543_vm0, %v2637_v45, %v4590_v41  ;;  %v2754_v50 = vsel %vm543_vm0, %v2638_v63, %v4591_v40  ;;  %v4601_v59 = vunpack.i.h.bf16 %v4599_v37  ;;  %v4600_v53 = vunpack.i.l.bf16 %v4599_v37 }
 0x580   : > { %v4594_v42 = vpop.permute.xlu0 %4593  ;;  %v2551_v40 = vcombine.low %v2216_v24, %v2218_v9  ;;  %v2552_v41 = vcombine.low %v2220_v17, %v2222_v30 }
 0x581   : > { %v4596_v44 = vunpack.i.h.bf16 %v4594_v42  ;;  %v4595_v62 = vunpack.i.l.bf16 %v4594_v42  ;;  %v2742_v16 = vsel %vm543_vm0, %v2550_v7, %v4601_v59  ;;  %v2741_v13 = vsel %vm543_vm0, %v2549_v6, %v4600_v53 }
 0x582   : > { %v4604_v46 = vpop.permute.xlu1 %4603 }
 0x583   : > { %v2757_v61 = vsel %vm1203_vm7, %v2753_v49, %v4595_v62  ;;  %v2758_v51 = vsel %vm1203_vm7, %v2754_v50, %v4596_v44  ;;  %v4606_v1 = vunpack.i.h.bf16 %v4604_v46  ;;  %v4605_v2 = vunpack.i.l.bf16 %v4604_v46  ;;  %v2338_v50 = vld [vmem:[#allocation5 + $0x61] ss:$2 sm:$0xf] }
 0x584   : > { %v4609_v43 = vpop.permute.xlu0 %4608  ;;  %v2773_v44 = vcombine.low %v2334_v10, %v2336_v8 }
 0x585   : > { %v4611_v19 = vunpack.i.h.bf16 %v4609_v43  ;;  %v4610_v60 = vunpack.i.l.bf16 %v4609_v43  ;;  %v2745_v28 = vsel %vm1203_vm7, %v2741_v13, %v4605_v2  ;;  %v2746_v5 = vsel %vm1203_vm7, %v2742_v16, %v4606_v1  ;;  %v2346_v1 = vld [vmem:[#allocation5 + $0x101] ss:$2 sm:$0xf] }
 0x586   : > { %v2348_v2 = vld [vmem:[#allocation5 + $0x121] ss:$2 sm:$0xf] }
 0x587   : > { %v2761_v11 = vsel %vm1220_vm8, %v2757_v61, %v4610_v60  ;;  %v2762_v31 = vsel %vm1220_vm8, %v2758_v51, %v4611_v19  ;;  %v2342_v60 = vld [vmem:[#allocation5 + $0xc1] ss:$2 sm:$0xf] }
 0x588   : > { %v4614_v22 = vpop.permute.xlu0 %4613  ;;  %v2812_v12 = vpack.c.bf16 %v2762_v31, %v2761_v11 }
 0x589   : > { %v4616_v4 = vunpack.i.h.bf16 %v4614_v22  ;;  %v4615_v15 = vunpack.i.l.bf16 %v4614_v22  ;;  %v2774_v22 = vcombine.low %v2338_v50, %v2340_v52 }
 0x58a   : > { %3201 = vmatprep.mubr.bf16.mxu0 %v2812_v12 }
 0x58b   : > { %v2750_v36 = vsel %vm1220_vm8, %v2746_v5, %v4616_v4  ;;  %v2749_v57 = vsel %vm1220_vm8, %v2745_v28, %v4615_v15  ;;  %v2775_v5 = vcombine.low %v2342_v60, %v2344_v56 }
 0x58c   : > { %v2811_v14 = vpack.c.bf16 %v2750_v36, %v2749_v57  ;;  %v2776_v36 = vcombine.low %v2346_v1, %v2348_v2  ;;  %v3919_v1 = vld [vmem:[#allocation23] ss:$0 sm:$0xff] }
 0x58e   : > { %3202 = vmatmul.mubr.bf16.vlgmr.msra.gmra.mrb[32].mxu0 %v2811_v14 }
 0x58f   : > { %4124 = vmatpush3.bf16.msra.mxu0 %v4715_v32 }
 0x590   : > { %4125 = vmatprep.subr.bf16.mxu0 %v4716_v35 }
 0x593   : > { %4126 = vmatpush3.bf16.msra.mxu0 %v4716_v35 }
 0x594   : > { %v4619_v20 = vpop.permute.xlu0 %4618 }
 0x595   : > { %v4621_v34 = vunpack.i.h.bf16 %v4619_v20  ;;  %v4620_v26 = vunpack.i.l.bf16 %v4619_v20 }
 0x596   : > { %v4629_v25 = vpop.permute.xlu1 %4628 }
 0x597   : > { %v4631_v58 = vunpack.i.h.bf16 %v4629_v25  ;;  %v4630_v29 = vunpack.i.l.bf16 %v4629_v25  ;;  %v2756_v62 = vsel %vm543_vm0, %v2640_v39, %v4621_v34  ;;  %v2755_v18 = vsel %vm543_vm0, %v2639_v54, %v4620_v26 }
 0x598   : > { %v4624_v33 = vpop.permute.xlu0 %4623 }
 0x599   : > { %v4626_v0 = vunpack.i.h.bf16 %v4624_v33  ;;  %v4625_v55 = vunpack.i.l.bf16 %v4624_v33  ;;  %v2744_v3 = vsel %vm543_vm0, %v2552_v41, %v4631_v58  ;;  %v2743_v43 = vsel %vm543_vm0, %v2551_v40, %v4630_v29  ;;  %v3880_v33 = vld [vmem:[#allocation20] ss:$0 sm:$0xff] }
 0x59a   : > { %v4634_v37 = vpop.permute.xlu1 %4633  ;;  %v3155_v10 = vadd.f32 %v6247_v38, %v3880_v33  ;;  %v3163_v41 = vadd.f32 %v6257_v23, %v3880_v33 }
 0x59b   : > { %v4636_v42 = vunpack.i.h.bf16 %v4634_v37  ;;  %v4635_v45 = vunpack.i.l.bf16 %v4634_v37  ;;  %v2759_v59 = vsel %vm1203_vm7, %v2755_v18, %v4625_v55  ;;  %v2760_v53 = vsel %vm1203_vm7, %v2756_v62, %v4626_v0 }
 0x59c   : > { %v4639_v63 = vpop.permute.xlu0 %4638  ;;  %v3158_v0 = vadd.f32 %v6249_v48, %v3880_v33 }
 0x59d   : > { %v4641_v46 = vunpack.i.h.bf16 %v4639_v63  ;;  %v4640_v49 = vunpack.i.l.bf16 %v4639_v63  ;;  %v2747_v11 = vsel %vm1203_vm7, %v2743_v43, %v4635_v45  ;;  %v2748_v31 = vsel %vm1203_vm7, %v2744_v3, %v4636_v42 }
 0x59e   : > { %v4649_v19 = vpop.permute.xlu1 %4648 }
 0x59f   : > { %v4651_v61 = vunpack.i.h.bf16 %v4649_v19  ;;  %v4650_v51 = vunpack.i.l.bf16 %v4649_v19  ;;  %v2763_v6 = vsel %vm1220_vm8, %v2759_v59, %v4640_v49  ;;  %v2764_v7 = vsel %vm1220_vm8, %v2760_v53, %v4641_v46 }
 0x5a0   : > { %v4644_v12 = vpop.permute.xlu0 %4643  ;;  %v2817_v16 = vpack.c.bf16 %v2764_v7, %v2763_v6 }
 0x5a1   : > { %v4646_v13 = vunpack.i.h.bf16 %v4644_v12  ;;  %v4645_v4 = vunpack.i.l.bf16 %v4644_v12  ;;  %v2751_v15 = vsel %vm1220_vm8, %v2747_v11, %v4650_v51  ;;  %v2752_v28 = vsel %vm1220_vm8, %v2748_v31, %v4651_v61 }
 0x5a2   : > { %3209 = vmatprep.mubr.bf16.mxu0 %v2817_v16  ;;  %v2816_v14 = vpack.c.bf16 %v2752_v28, %v2751_v15 }
 0x5a3   : > { %v4654_v57 = vpop.permute.xlu1 %4653  ;;  %v2806_v20 = vsel %vm543_vm0, %v2774_v22, %v4646_v13  ;;  %v2805_v24 = vsel %vm543_vm0, %v2773_v44, %v4645_v4  ;;  %v3166_v44 = vadd.f32 %v6260_v47, %v3880_v33  ;;  %v3363_v47 = vlaneseq }
 0x5a4   : > { %v4656_v9 = vunpack.i.h.bf16 %v4654_v57  ;;  %v4655_v25 = vunpack.i.l.bf16 %v4654_v57  ;;  %v2813_v27 = vpack.c.bf16 %v2806_v20, %v2805_v24  ;;  %3210 = vmatmul.mubr.bf16.gmra.mrb[36].mxu0 %v2816_v14 }
 0x5a5   : > { %v3364_v51 = vshrl.u32 %v3363_v47, 7 }
 0x5a6   : > { %v2808_v21 = vsel %vm543_vm0, %v2776_v36, %v4656_v9  ;;  %v2807_v17 = vsel %vm543_vm0, %v2775_v5, %v4655_v25  ;;  %4119 = vmatprep.mubr.msk.bf16.mxu1 %vm1203_vm7, %v2813_v27 }
 0x5a7   : > { %v2818_v30 = vpack.c.bf16 %v2808_v21, %v2807_v17  ;;  %v6299_v7 = vsub.s32 0, %v3364_v51  ;;  %v6301_v11 = vsub.s32 2, %v3364_v51  ;;  %v6303_v12 = vsub.s32 1, %v3364_v51 }
 0x5a8   : > { %v6305_v16 = vsub.s32 3, %v3364_v51 }
 0x5a9   : > { %4120 = vmatmul.mubr.msk.bf16.vlgmr.msra.gmra.mrb[24].mxu1 %vm1203_vm7, %v2818_v30 }
 0x661   : > { %v4013_v34 = vpop.f32.mrb[32].mxu0 }
 0x662   : > { %v4014_v26 = vpop.f32.mrb[33].mxu0 }
 0x663   : > { %v4015_v8 = vadd.f32 %v4014_v26, %v4013_v34  ;;  %v4016_v58 = vpop.f32.mrb[34].mxu0 }
 0x664   : > { %v4017_v29 = vpop.f32.mrb[35].mxu0 }
 0x665   : > { %v4018_v55 = vadd.f32 %v4017_v29, %v4016_v58  ;;  %v3204_v37 = vadd.f32 %v4015_v8, %v3155_v10 }
 0x667   : > { %v3207_v54 = vadd.f32 %v4018_v55, %v3158_v0 }
 0x677   : > { %v4019_v39 = vpop.f32.mrb[36].mxu0 }
 0x678   : > { %v4020_v40 = vpop.f32.mrb[37].mxu0 }
 0x679   : > { %v4021_v42 = vadd.f32 %v4020_v40, %v4019_v39  ;;  %v4022_v45 = vpop.f32.mrb[38].mxu0 }
 0x67a   : > { %v4023_v63 = vpop.f32.mrb[39].mxu0 }
 0x67b   : > { %v4024_v62 = vadd.f32 %v4023_v63, %v4022_v45  ;;  %v3212_v18 = vadd.f32 %v4021_v42, %v3163_v41 }
 0x67c   : > { %v4121_v38 = vpop.f32.mrb[24].mxu1 }
 0x67d   : > { %v3252_v46 = vpop.f32.mrb[25].mxu1  ;;  %v3261_v49 = vadd.f32 %v4121_v38, %v3212_v18  ;;  %v3215_v52 = vadd.f32 %v4024_v62, %v3166_v44 }
 0x67e   : > { %v3253_v50 = vadd.f32 %v3252_v46, %v3204_v37  ;;  %v4122_v48 = vpop.f32.mrb[26].mxu1 }
 0x67f   : > { %v3255_v3 = vpop.f32.mrb[27].mxu1  ;;  %v3264_v43 = vadd.f32 %v4122_v48, %v3215_v52  ;;  %v3269_v53 = vmax.f32 %v3261_v49, 0.0 }
 0x680   : > { %v3256_v59 = vadd.f32 %v3255_v3, %v3207_v54  ;;  %v3267_v19 = vmax.f32 %v3253_v50, 0.0 }
 0x681   : > { %v3270_v60 = vmax.f32 %v3264_v43, 0.0 }
 0x682   : > { %v3268_v23 = vmax.f32 %v3256_v59, 0.0 }
 0x683   : > { %v3272_v56 = vpack.c.bf16 %v3270_v60, %v3269_v53 }
 0x684   : > { %v3271_v61 = vpack.c.bf16 %v3268_v23, %v3267_v19 }
 0x686   : > { %4127 = vmatprep.mubr.msk.bf16.mxu0 %vm543_vm0, %v3271_v61 }
 0x687   : > { %4128 = vmatmul.mubr.msk.bf16.vlgmr.msra.gmra.mrb[40].mxu0 %vm543_vm0, %v3272_v56  ;;  %vm3405_vm0 = vcmask 1046534  }
 0x75a   : > { %v4129_v2 = vpop.f32.mrb[40].mxu0 }
 0x75b   : > { %v3345_v6 = vadd.f32 %v4129_v2, %v3919_v1  ;;  %v3336_v31 = vpop.f32.mrb[41].mxu0 }
 0x75c   : > { %v3337_v22 = vadd.f32 %v3919_v1, %v3336_v31  ;;  %v4130_v13 = vpop.f32.mrb[42].mxu0 }
 0x75d   : > { %v6307_v4 = vmax.f32 %v3345_v6, 0.0  ;;  %v3348_v15 = vadd.f32 %v4130_v13, %v3919_v1  ;;  %v3339_v28 = vpop.f32.mrb[43].mxu0 }
 0x75e   : > { %v6309_v5 = vmax.f32 %v3337_v22, 0.0  ;;  %v3340_v36 = vadd.f32 %v3919_v1, %v3339_v28 }
 0x75f   : > { %v6313_v57 = vcombine.high %v6307_v4, %v6307_v4  ;;  %v3382_v14 = vrot.slane %v6307_v4, %v6299_v7  ;;  %v3471_v20 = vrot.slane %v6307_v4, %v6301_v11  ;;  %v6319_v24 = vmax.f32 %v3348_v15, 0.0 }
 0x760   : > { %v3359_v9 = vcombine.high %v6309_v5, %v6309_v5  ;;  %v3366_v25 = vrot.slane %v6309_v5, %v6299_v7  ;;  %v3413_v27 = vrot.slane %v6309_v5, %v6303_v12  ;;  %v3455_v21 = vrot.slane %v6309_v5, %v6301_v11 }
 0x761   : > { %v3495_v17 = vrot.slane %v6309_v5, %v6305_v16  ;;  %v3362_v30 = vcombine.high %v6319_v24, %v6319_v24  ;;  %v3352_v32 = vmax.f32 %v3340_v36, 0.0  ;;  %v3511_v35 = vrot.slane %v6307_v4, %v6305_v16 }
 0x762   : > { %v3370_v33 = vrot.slane %v3359_v9, %v6299_v7  ;;  %v3459_v34 = vrot.slane %v3359_v9, %v6301_v11  ;;  %v3499_v26 = vrot.slane %v3359_v9, %v6305_v16  ;;  %v3515_v10 = vrot.slane %v6313_v57, %v6305_v16 }
 0x763   : > { %v3360_v8 = vcombine.high %v3352_v32, %v3352_v32  ;;  %v3374_v58 = vrot.slane %v3352_v32, %v6299_v7  ;;  %v3421_v29 = vrot.slane %v3352_v32, %v6303_v12  ;;  %v3463_v0 = vrot.slane %v3352_v32, %v6301_v11 }
 0x764   : > { %v3503_v55 = vrot.slane %v3352_v32, %v6305_v16  ;;  %v3519_v37 = vrot.slane %v6319_v24, %v6305_v16  ;;  %v3523_v54 = vrot.slane %v3362_v30, %v6305_v16  ;;  %v3524_v39 = vsel %vm3395_vm11, %v3499_v26, %v3495_v17 }
 0x765   : > { %v3507_v40 = vrot.slane %v3360_v8, %v6305_v16  ;;  %v3417_v41 = vrot.slane %v3359_v9, %v6303_v12  ;;  %v3425_v42 = vrot.slane %v3360_v8, %v6303_v12  ;;  %v3429_v45 = vrot.slane %v6307_v4, %v6303_v12 }
 0x766   : > { %v3525_v63 = vsel %vm3397_vm12, %v3503_v55, %v3524_v39  ;;  %v3433_v44 = vrot.slane %v6313_v57, %v6303_v12  ;;  %v3437_v62 = vrot.slane %v6319_v24, %v6303_v12  ;;  %v3441_v18 = vrot.slane %v3362_v30, %v6303_v12 }
 0x767   : > { %v3526_v38 = vsel %vm3399_vm13, %v3507_v40, %v3525_v63  ;;  %v3442_v46 = vsel %vm3395_vm11, %v3417_v41, %v3413_v27  ;;  %v3467_v49 = vrot.slane %v3360_v8, %v6301_v11  ;;  %v3475_v50 = vrot.slane %v6313_v57, %v6301_v11 }
 0x768   : > { %v3527_v52 = vsel %vm3401_vm14, %v3511_v35, %v3526_v38  ;;  %v3443_v48 = vsel %vm3397_vm12, %v3421_v29, %v3442_v46  ;;  %v3479_v3 = vrot.slane %v6319_v24, %v6301_v11  ;;  %v3483_v43 = vrot.slane %v3362_v30, %v6301_v11 }
 0x769   : > { %v3528_v59 = vsel %vm3403_vm15, %v3515_v10, %v3527_v52  ;;  %v3444_v53 = vsel %vm3399_vm13, %v3425_v42, %v3443_v48  ;;  %v3484_v19 = vsel %vm3395_vm11, %v3459_v34, %v3455_v21  ;;  %v3378_v60 = vrot.slane %v3360_v8, %v6299_v7 }
 0x76a   : > { %v3529_v23 = vsel %vm3405_vm0, %v3519_v37, %v3528_v59  ;;  %v3445_v56 = vsel %vm3401_vm14, %v3429_v45, %v3444_v53  ;;  %v3485_v61 = vsel %vm3397_vm12, %v3463_v0, %v3484_v19  ;;  %v3386_v47 = vrot.slane %v6313_v57, %v6299_v7 }
 0x76b   : > { %v3530_v51 = vsel %vm3407_vm1, %v3523_v54, %v3529_v23  ;;  %v3446_v1 = vsel %vm3403_vm15, %v3433_v44, %v3445_v56  ;;  %v3486_v2 = vsel %vm3399_vm13, %v3467_v49, %v3485_v61  ;;  %v3390_v6 = vrot.slane %v6319_v24, %v6299_v7 }
 0x76c   : > { %3531 = vrot.lane.b32.xlu1 %v3530_v51, %s5131_s12  ;;  %v3447_v11 = vsel %vm3405_vm0, %v3437_v62, %v3446_v1  ;;  %v3487_v31 = vsel %vm3401_vm14, %v3471_v20, %v3486_v2  ;;  %v3394_v22 = vrot.slane %v3362_v30, %v6299_v7  ;;  %v3396_v12 = vsel %vm3395_vm11, %v3370_v33, %v3366_v25 }
 0x76d   : > { %v3448_v16 = vsel %vm3407_vm1, %v3441_v18, %v3447_v11  ;;  %v3488_v13 = vsel %vm3403_vm15, %v3475_v50, %v3487_v31  ;;  %v3398_v15 = vsel %vm3397_vm12, %v3374_v58, %v3396_v12 }
 0x76e   : > { %3449 = vrot.lane.b32.xlu0 %v3448_v16, %s5131_s12  ;;  %v3489_v28 = vsel %vm3405_vm0, %v3479_v3, %v3488_v13  ;;  %v3400_v5 = vsel %vm3399_vm13, %v3378_v60, %v3398_v15  ;;  %s6408_s12 = scalar_lea.hbm %s6502_s30, %s3930_s14 }
 0x76f   : > { %v3490_v36 = vsel %vm3407_vm1, %v3483_v43, %v3489_v28  ;;  %v3402_v57 = vsel %vm3401_vm14, %v3382_v14, %v3400_v5 }
 0x770   : > { %v3404_v20 = vsel %vm3403_vm15, %v3386_v47, %v3402_v57 }
 0x771   : > { %v3406_v24 = vsel %vm3405_vm0, %v3390_v6, %v3404_v20 }
 0x772   : > { %v3408_v9 = vsel %vm3407_vm1, %v3394_v22, %v3406_v24 }
 0x7de   : > { %v3532_v25 = vpop.permute.xlu1 %3531 }
 0x7df   : > { %v3535_v27 = vsel %vm1203_vm7, %v3490_v36, %v3532_v25 }
 0x7e0   : > { %3537 = vst [vmem:[%s539_s24 + $0x8] sm:$0xff] %v3535_v27  ;;  %v3450_v21 = vpop.permute.xlu0 %3449 }
 0x7e1   : > { %v3534_v7 = vsel %vm1203_vm7, %v3408_v9, %v3450_v21 }
 0x7e2   : > { %3536 = vst [vmem:[%s539_s24] sm:$0xff] %v3534_v7 }
 0x7e3   : > { %5040 = shalt.err (!%p5037_p3)
}
 0x7e4   : > { %s5041_s13 = scalar_lea.hbm %s6408_s12, 256  ;;  %s5045_s25 = scalar_lea.hbm %s6502_s30, 512 }
 0x7e5   : > { %p5042_p5 = scmp.ne.s32.totalorder %s6408_s12, %s5041_s13  ;;  %p5046_p9 = scmp.lt.u32.totalorder %s6408_s12, %s6502_s30 }
 0x7e6   : > { %p5047_p12 = scmp.lt.u32.totalorder %s5045_s25, %s5041_s13  ;;  %p5049_p13 = scmp.lt.u32.totalorder %s5041_s13, %s6408_s12 }
 0x7e7   : > { %p5043_p7 = pnand %p5042_p5, %p6503_p0 }
 0x7e8   : > { %p5048_p1 = por %p5047_p12, %p5046_p9 }
 0x7e9   : > { %p5044_p6 = pneg %p5043_p7 }
 0x7ea   : > { %p5050_p2 = por %p5049_p13, %p5048_p1 }
 0x7ec   : > { %p5051_p8 = pnand %p5050_p2, %p5044_p6 }
 0x7ee   : > { %5054 = shalt.err (!%p5051_p8)
}
 0x7ef   : > { %4173 = dma.vmem_to_hbm [thread:$0]  (%p6503_p0), %s6410_s16, 256, %s6408_s12, %s3539_s28  }
 0x7f0 PF: > { %s3565_s23 = sand.u32 1, %s5101_s17   ;;  %p6504_p4 = scmp.ne.s32.totalorder %s6485_s29, 0 }
 0x7f1   : > { %p6505_p10 = scmp.ge.s32.totalorder %s5113_s20, 2  ;;  %s3566_s26 = scalar_lea.sflag [#allocation8], %s3565_s23 }
 0x7f3   : > { %p4211_p11 = pnand %p6505_p10, %p6504_p4 }
 0x7f5   : > { %5096 = dma.done.wait (!%p4211_p11), %s3566_s26, 256  }
 0x7f6   : > { %5098 = vsyncadd (!%p4211_p11), %s3566_s26, 4294967040  ;;  %p29_p3 = scmp.ge.s32.totalorder %s5459_s27, 4   ;;  %s6506_s17 = smov %s5105_s18 }
 0x7f7   : > { %s6507_s18 = smov %s5109_s19  ;;  %s6508_s19 = smov %s5470_s22 }
 0x7f8   : > { %s6509_s20 = smov %s5459_s27  ;;  %31 = sbr.rel (!%p29_p3) target bundleno = 14 (0xe), region = 297 }
 0x7ff   :  { %3571 = vsyncpa [#allocation7], 1 }
 0x800   :  { %3573 = vsyncpa [#allocation7 + $0x1], 1 }
 0x801   :  { %3574 = vsyncpa [#allocation10], 1 }
 0x802   :  { %3575 = vsyncpa [#allocation13], 1 }
 0x803   :  { %3576 = vsyncpa [#allocation16], 1 }
 0x804   :  { %3577 = vsyncpa [#allocation19], 1 }
 0x805   :  { %3578 = vsyncpa [#allocation22], 1 }
 0x806   :  { %3579 = vsyncpa [#allocation8], 1 }
 0x807   :  { %3581 = vsyncpa [#allocation8 + $0x1], 1 }

</bundles_post_ra>
